<compile_context>
chip_gen: v7x
topology: tpu7x:2x2x1
jax: 0.10.0
libtpu: 0.0.40
codegen_flags: <defaults>
</compile_context>

<pallas_src>
import functools

import jax
import jax.numpy as jnp
from jax.experimental import pallas as pl
from jax.experimental.pallas import tpu as pltpu

EPS = 1e-5
LANE = 128


def _round_up(x, m):
    return ((x + m - 1) // m) * m


# ----------------------------------------------------------------------------
# Kernels
# ----------------------------------------------------------------------------
def conv_stats_kernel(*refs, prenorm):
    """One image: [optional BN+ReLU of the input] -> 3x3 SAME conv -> raw conv
    output + per-channel [sum | sum_of_squares] partial BN statistics."""
    if prenorm:
        x_ref, scale_ref, shift_ref, w_ref, y_ref, stats_ref = refs
    else:
        x_ref, w_ref, y_ref, stats_ref = refs
        scale_ref = shift_ref = None

    H, W, Cin = x_ref.shape
    Cout = y_ref.shape[-1]
    mxu_dtype = w_ref.dtype

    v = x_ref[...]                                            # (H, W, Cin) f32
    if prenorm:
        # Fused BatchNorm (precomputed global scale/shift) + ReLU, in f32.
        v = jnp.maximum(v * scale_ref[...] + shift_ref[...], 0.0)

    # H halo: one zero row above/below (major-dim concat -> cheap, aligned).
    zrow = jnp.zeros((1, W, Cin), jnp.float32)
    base = jnp.concatenate([zrow, v, zrow], axis=0)           # (H+2, W, Cin)

    # W halo: sublane rotation + edge masking.  Keeps every slice/store at an
    # aligned offset; no (W+2)-wide padded scratch and no full-buffer zeroing.
    col = jax.lax.broadcasted_iota(jnp.int32, (1, W, 1), 1)
    left = jnp.where(col == 0, 0.0, pltpu.roll(base, 1, axis=1))        # col w-1
    right = jnp.where(col == W - 1, 0.0, pltpu.roll(base, W - 1, axis=1))  # col w+1

    # 3 fused MXU matmuls (one per kernel row): K = 3*Cin, flat M = H*W.
    # Only 3 unrolled steps -> an SSA accumulator is fine at this tile size;
    # at larger tiles accumulate into a VMEM scratch ref instead.
    acc = jnp.zeros((H * W, Cout), jnp.float32)
    for dh in range(3):
        patch = jnp.concatenate(                               # lane-aligned concat
            [left[dh:dh + H], base[dh:dh + H], right[dh:dh + H]], axis=-1)
        patch = patch.reshape(H * W, 3 * Cin).astype(mxu_dtype)
        acc = acc + jnp.dot(patch, w_ref[dh],
                            preferred_element_type=jnp.float32)

    y_ref[...] = acc.reshape(H, W, Cout)

    # One-pass BN statistics for this image (lane-concatenated: [sum | sumsq]).
    s = jnp.sum(acc, axis=0, keepdims=True)                   # (1, Cout)
    ss = jnp.sum(acc * acc, axis=0, keepdims=True)            # (1, Cout)
    stats_ref[...] = jnp.concatenate([s, ss], axis=-1)        # (1, 2*Cout)


def bn_relu_kernel(y_ref, scale_ref, shift_ref, out_ref):
    """Per-image fused BatchNorm (precomputed scale/shift) + ReLU."""
    out_ref[...] = jnp.maximum(y_ref[...] * scale_ref[...] + shift_ref[...], 0.0)


# ----------------------------------------------------------------------------
# pallas_call wrappers
# ----------------------------------------------------------------------------
def _conv_stats(x, w, scale=None, shift=None, *, prenorm):
    """x: (N, H, W, Cp_in) f32, w: (3, 3*Cp_in, Cp_out) in compute dtype.
    Returns raw conv output (N, H, W, Cp_out) f32 and per-image stats
    (N, 1, 2*Cp_out) f32.  grid=(N,) is pipelined and megacore-parallel."""
    N, H, W, Cin = x.shape
    Cout = w.shape[-1]

    in_specs = [pl.BlockSpec((None, H, W, Cin), lambda i: (i, 0, 0, 0))]
    args = [x]
    if prenorm:
        in_specs += [pl.BlockSpec((1, Cin), lambda i: (0, 0)),
                     pl.BlockSpec((1, Cin), lambda i: (0, 0))]
        args += [scale, shift]
    in_specs.append(pl.BlockSpec((3, 3 * Cin, Cout), lambda i: (0, 0, 0)))
    args.append(w)

    # Per-step VMEM use here is a few MiB (far below the scoped limit on
    # v5e/v6e/v7x).  For large H/W, additionally tile H (1-row halo) and set
    # pltpu.CompilerParams(vmem_limit_bytes=...) against v7x's 64 MiB VMEM.
    y, stats = pl.pallas_call(
        functools.partial(conv_stats_kernel, prenorm=prenorm),
        grid=(N,),
        in_specs=in_specs,
        out_specs=[
            pl.BlockSpec((None, H, W, Cout), lambda i: (i, 0, 0, 0)),
            pl.BlockSpec((None, 1, 2 * Cout), lambda i: (i, 0, 0)),
        ],
        out_shape=[
            jax.ShapeDtypeStruct((N, H, W, Cout), jnp.float32),
            jax.ShapeDtypeStruct((N, 1, 2 * Cout), jnp.float32),
        ],
        compiler_params=pltpu.CompilerParams(
            dimension_semantics=("parallel",)),
    )(*args)
    return y, stats


def _bn_relu(y, scale, shift):
    N, H, W, C = y.shape
    return pl.pallas_call(
        bn_relu_kernel,
        grid=(N,),
        in_specs=[pl.BlockSpec((None, H, W, C), lambda i: (i, 0, 0, 0)),
                  pl.BlockSpec((1, C), lambda i: (0, 0)),
                  pl.BlockSpec((1, C), lambda i: (0, 0))],
        out_specs=pl.BlockSpec((None, H, W, C), lambda i: (i, 0, 0, 0)),
        out_shape=jax.ShapeDtypeStruct((N, H, W, C), jnp.float32),
        compiler_params=pltpu.CompilerParams(
            dimension_semantics=("parallel",)),
    )(y, scale, shift)


def _bn_scale_shift(stats, gamma, beta, count, c_pad):
    """Fold per-image [sum | sumsq] partials into a global per-channel BN
    scale/shift (training-mode statistics over N,H,W).  O(C) work."""
    tot = jnp.sum(stats, axis=0)[0]                   # (2*c_pad,)
    mean = tot[:c_pad] / count
    var = jnp.maximum(tot[c_pad:] / count - mean * mean, 0.0)
    g = jnp.pad(gamma, (0, c_pad - gamma.shape[0]))   # padded channels -> 0
    b = jnp.pad(beta, (0, c_pad - beta.shape[0]))
    scale = g * jax.lax.rsqrt(var + EPS)
    shift = b - mean * scale
    return scale[None, :], shift[None, :]             # (1, c_pad) each


def _prep_weight(w_hwio, c_in_pad, c_out_pad, dtype):
    """(3, 3, Cin, Cout) HWIO -> lane-padded, dw-fused (3, 3*Cin_pad, Cout_pad)."""
    kh, kw, cin, cout = w_hwio.shape
    w = jnp.pad(w_hwio, ((0, 0), (0, 0),
                         (0, c_in_pad - cin), (0, c_out_pad - cout)))
    return w.reshape(kh, kw * c_in_pad, c_out_pad).astype(dtype)


def conv_block_pallas(x_nchw, params, *, compute_dtype=jnp.float32):
    """ConvBlock forward.  x_nchw: (N, Cin, H, W) f32 -> (N, Cout, H, W) f32.
    compute_dtype controls the MXU operand dtype (bf16 for v6e/v7x peak);
    accumulation and BN math are always f32."""
    N, Cin, H, W = x_nchw.shape
    Cout = params["g1"].shape[0]
    cin_p = _round_up(Cin, LANE)
    cout_p = _round_up(Cout, LANE)

    # NCHW -> NHWC with channels lane-padded to a multiple of 128.
    # TODO(synk): fold this transpose/pad into the first pallas_call
    # (allow_input_fusion) to avoid one extra HBM round-trip of the input.
    x = jnp.transpose(x_nchw, (0, 2, 3, 1)).astype(jnp.float32)
    x = jnp.pad(x, ((0, 0), (0, 0), (0, 0), (0, cin_p - Cin)))

    w1 = _prep_weight(params["w1"], cin_p, cout_p, compute_dtype)
    w2 = _prep_weight(params["w2"], cout_p, cout_p, compute_dtype)
    # NOTE: conv biases (params["b1"], params["b2"]) are intentionally NOT used:
    # a per-channel bias immediately followed by training-mode BatchNorm cancels
    # exactly (the batch mean absorbs it).

    count = N * H * W

    # stage 1: conv1 + per-image partial BN stats
    y1, st1 = _conv_stats(x, w1, prenorm=False)
    scale1, shift1 = _bn_scale_shift(st1, params["g1"], params["bt1"], count, cout_p)

    # stage 2: bn1 + relu + conv2 + per-image partial BN stats
    y2, st2 = _conv_stats(y1, w2, scale1, shift1, prenorm=True)
    scale2, shift2 = _bn_scale_shift(st2, params["g2"], params["bt2"], count, cout_p)

    # stage 3: bn2 + relu
    out = _bn_relu(y2, scale2, shift2)                # (N, H, W, cout_p)

    # drop channel padding, NHWC -> NCHW
    return jnp.transpose(out[..., :Cout], (0, 3, 1, 2))


# ----------------------------------------------------------------------------
# Pure-JAX reference (same semantics, includes the conv bias) + params
# ----------------------------------------------------------------------------
def conv_block_reference(x_nchw, params):
    x = jnp.transpose(x_nchw, (0, 2, 3, 1)).astype(jnp.float32)   # NHWC

    def conv(h, w, b):
        y = jax.lax.conv_general_dilated(
            h, w, window_strides=(1, 1), padding="SAME",
            dimension_numbers=("NHWC", "HWIO", "NHWC"))
        return y + b.reshape(1, 1, 1, -1)

    def bn_relu(y, g, bt):
        mean = jnp.mean(y, axis=(0, 1, 2), keepdims=True)
        var = jnp.mean((y - mean) ** 2, axis=(0, 1, 2), keepdims=True)
        yhat = (y - mean) * jax.lax.rsqrt(var + EPS)
        return jnp.maximum(yhat * g.reshape(1, 1, 1, -1) + bt.reshape(1, 1, 1, -1), 0.0)

    h1 = bn_relu(conv(x, params["w1"], params["b1"]), params["g1"], params["bt1"])
    h2 = bn_relu(conv(h1, params["w2"], params["b2"]), params["g2"], params["bt2"])
    return jnp.transpose(h2, (0, 3, 1, 2))


def init_params(key, in_channels, out_channels):
    k1, k2, k3, k4 = jax.random.split(key, 4)
    # conv weights in HWIO (3, 3, Cin, Cout); biases (Cout,);
    # BatchNorm affine at PyTorch defaults (gamma=1, beta=0).
    w1 = 0.1 * jax.random.normal(k1, (3, 3, in_channels, out_channels), jnp.float32)
    b1 = 0.1 * jax.random.normal(k2, (out_channels,), jnp.float32)
    w2 = 0.1 * jax.random.normal(k3, (3, 3, out_channels, out_channels), jnp.float32)
    b2 = 0.1 * jax.random.normal(k4, (out_channels,), jnp.float32)
    g1 = jnp.ones((out_channels,), jnp.float32)
    bt1 = jnp.zeros((out_channels,), jnp.float32)
    g2 = jnp.ones((out_channels,), jnp.float32)
    bt2 = jnp.zeros((out_channels,), jnp.float32)
    return dict(w1=w1, b1=b1, w2=w2, b2=b2, g1=g1, bt1=bt1, g2=g2, bt2=bt2)


if __name__ == "__main__":
    key = jax.random.PRNGKey(0)
    kx, kp = jax.random.split(key)

    N, Cin, Cout, H, W = 2, 4, 8, 16, 16
    x = jax.random.normal(kx, (N, Cin, H, W), jnp.float32)
    params = init_params(kp, Cin, Cout)

    fwd = jax.jit(conv_block_pallas, static_argnames=("compute_dtype",))

    ref = jax.block_until_ready(conv_block_reference(x, params))

    # f32 MXU-operand path: must match the reference tightly.
    out = jax.block_until_ready(fwd(x, params, compute_dtype=jnp.float32))
    assert out.shape == (N, Cout, H, W), out.shape
    assert jnp.allclose(out, ref, atol=1e-4, rtol=1e-4), \
        f"f32 path max abs diff {float(jnp.max(jnp.abs(out - ref)))}"

    # bf16 MXU-operand path (v6e/v7x peak throughput); f32 accumulate + f32 BN.
    out_bf16 = jax.block_until_ready(fwd(x, params, compute_dtype=jnp.bfloat16))
    err_bf16 = float(jnp.max(jnp.abs(out_bf16 - ref)))
    assert bool(jnp.all(jnp.isfinite(out_bf16))) and err_bf16 < 1e-1, \
        f"bf16 path max abs diff {err_bf16}"

    print("KERNEL_OK")
</pallas_src>

<mosaic_0001>
module attributes {stable_mosaic.version = 11 : i64} {
  func.func @conv_stats_kernel(%arg0: i32, %arg1: memref<1x16x16x128xf32, #tpu.memory_space<vmem>>, %arg2: memref<3x384x128xf32, #tpu.memory_space<vmem>>, %arg3: memref<1x16x16x128xf32, #tpu.memory_space<vmem>>, %arg4: memref<1x1x256xf32, #tpu.memory_space<vmem>>) attributes {dimension_semantics = [#tpu.dimension_semantics<parallel>], iteration_bounds = array<i64: 2>, scalar_prefetch = 0 : i64, scratch_operands = 0 : i64, tpu.core_type = #tpu.core_type<tc>, window_params = [{transform_indices = @transform_0, window_bounds = array<i64: 1, 16, 16, 128>}, {pipeline_mode = #tpu.pipeline_mode<synchronous>, transform_indices = @transform_1, window_bounds = array<i64: 3, 384, 128>}, {transform_indices = @transform_2, window_bounds = array<i64: 1, 16, 16, 128>}, {transform_indices = @transform_3, window_bounds = array<i64: 1, 1, 256>}]} {
    %c0 = arith.constant 0 : index
    %c0_0 = arith.constant 0 : index
    %c0_1 = arith.constant 0 : index
    %c0_2 = arith.constant 0 : index
    %0 = vector.load %arg1[%c0, %c0_0, %c0_1, %c0_2] : memref<1x16x16x128xf32, #tpu.memory_space<vmem>>, vector<1x16x16x128xf32>
    %1 = vector.shape_cast %0 : vector<1x16x16x128xf32> to vector<16x16x128xf32>
    %cst = arith.constant 0.000000e+00 : f32
    %2 = vector.broadcast %cst : f32 to vector<1x16x128xf32>
    %3 = tpu.concatenate %2, %1, %2 in 0 : vector<1x16x128xf32>, vector<16x16x128xf32>, vector<1x16x128xf32> -> vector<18x16x128xf32>
    %4 = tpu.iota {dimensions = array<i32: 1>} : vector<1x16x1xi32>
    %c0_i32 = arith.constant 0 : i32
    %5 = vector.broadcast %c0_i32 : i32 to vector<1x16x1xi32>
    %6 = arith.cmpi eq, %4, %5 : vector<1x16x1xi32>
    %c1_i32 = arith.constant 1 : i32
    %7 = tpu.dynamic_rotate %3 by %c1_i32 dim 1 : vector<18x16x128xf32>, i32 -> vector<18x16x128xf32>
    %cst_3 = arith.constant 0.000000e+00 : f32
    %8 = vector.shape_cast %6 : vector<1x16x1xi1> to vector<1x16x1xi1>
    %9 = vector.broadcast %8 : vector<1x16x1xi1> to vector<18x16x128xi1>
    %10 = vector.broadcast %cst_3 : f32 to vector<18x16x128xf32>
    %11 = arith.select %9, %10, %7 : vector<18x16x128xi1>, vector<18x16x128xf32>
    %c15_i32 = arith.constant 15 : i32
    %12 = vector.broadcast %c15_i32 : i32 to vector<1x16x1xi32>
    %13 = arith.cmpi eq, %4, %12 : vector<1x16x1xi32>
    %c15_i32_4 = arith.constant 15 : i32
    %14 = tpu.dynamic_rotate %3 by %c15_i32_4 dim 1 : vector<18x16x128xf32>, i32 -> vector<18x16x128xf32>
    %cst_5 = arith.constant 0.000000e+00 : f32
    %15 = vector.shape_cast %13 : vector<1x16x1xi1> to vector<1x16x1xi1>
    %16 = vector.broadcast %15 : vector<1x16x1xi1> to vector<18x16x128xi1>
    %17 = vector.broadcast %cst_5 : f32 to vector<18x16x128xf32>
    %18 = arith.select %16, %17, %14 : vector<18x16x128xi1>, vector<18x16x128xf32>
    %cst_6 = arith.constant 0.000000e+00 : f32
    %19 = vector.broadcast %cst_6 : f32 to vector<256x128xf32>
    %20 = vector.extract_strided_slice %11 {offsets = [0, 0, 0], sizes = [16, 16, 128], strides = [1, 1, 1]} : vector<18x16x128xf32> to vector<16x16x128xf32>
    %21 = vector.extract_strided_slice %3 {offsets = [0, 0, 0], sizes = [16, 16, 128], strides = [1, 1, 1]} : vector<18x16x128xf32> to vector<16x16x128xf32>
    %22 = vector.extract_strided_slice %18 {offsets = [0, 0, 0], sizes = [16, 16, 128], strides = [1, 1, 1]} : vector<18x16x128xf32> to vector<16x16x128xf32>
    %23 = tpu.concatenate %20, %21, %22 in 2 : vector<16x16x128xf32>, vector<16x16x128xf32>, vector<16x16x128xf32> -> vector<16x16x384xf32>
    %24 = vector.shape_cast %23 : vector<16x16x384xf32> to vector<256x384xf32>
    %c0_7 = arith.constant 0 : index
    %c0_8 = arith.constant 0 : index
    %c0_9 = arith.constant 0 : index
    %25 = vector.load %arg2[%c0_7, %c0_8, %c0_9] : memref<3x384x128xf32, #tpu.memory_space<vmem>>, vector<1x384x128xf32>
    %26 = vector.shape_cast %25 : vector<1x384x128xf32> to vector<384x128xf32>
    %cst_10 = arith.constant dense<0.000000e+00> : vector<256x128xf32>
    %27 = tpu.matmul %24, %26, %cst_10 {dimension_numbers = #tpu.dot_dimension_numbers<[1], [0], [0], [1], [0, 0, 1, 1], [], []>} : vector<256x384xf32>, vector<384x128xf32>, vector<256x128xf32> -> vector<256x128xf32>
    %28 = arith.addf %19, %27 : vector<256x128xf32>
    %29 = vector.extract_strided_slice %11 {offsets = [1, 0, 0], sizes = [16, 16, 128], strides = [1, 1, 1]} : vector<18x16x128xf32> to vector<16x16x128xf32>
    %30 = vector.extract_strided_slice %3 {offsets = [1, 0, 0], sizes = [16, 16, 128], strides = [1, 1, 1]} : vector<18x16x128xf32> to vector<16x16x128xf32>
    %31 = vector.extract_strided_slice %18 {offsets = [1, 0, 0], sizes = [16, 16, 128], strides = [1, 1, 1]} : vector<18x16x128xf32> to vector<16x16x128xf32>
    %32 = tpu.concatenate %29, %30, %31 in 2 : vector<16x16x128xf32>, vector<16x16x128xf32>, vector<16x16x128xf32> -> vector<16x16x384xf32>
    %33 = vector.shape_cast %32 : vector<16x16x384xf32> to vector<256x384xf32>
    %c1 = arith.constant 1 : index
    %c0_11 = arith.constant 0 : index
    %c0_12 = arith.constant 0 : index
    %34 = vector.load %arg2[%c1, %c0_11, %c0_12] : memref<3x384x128xf32, #tpu.memory_space<vmem>>, vector<1x384x128xf32>
    %35 = vector.shape_cast %34 : vector<1x384x128xf32> to vector<384x128xf32>
    %cst_13 = arith.constant dense<0.000000e+00> : vector<256x128xf32>
    %36 = tpu.matmul %33, %35, %cst_13 {dimension_numbers = #tpu.dot_dimension_numbers<[1], [0], [0], [1], [0, 0, 1, 1], [], []>} : vector<256x384xf32>, vector<384x128xf32>, vector<256x128xf32> -> vector<256x128xf32>
    %37 = arith.addf %28, %36 : vector<256x128xf32>
    %38 = vector.extract_strided_slice %11 {offsets = [2, 0, 0], sizes = [16, 16, 128], strides = [1, 1, 1]} : vector<18x16x128xf32> to vector<16x16x128xf32>
    %39 = vector.extract_strided_slice %3 {offsets = [2, 0, 0], sizes = [16, 16, 128], strides = [1, 1, 1]} : vector<18x16x128xf32> to vector<16x16x128xf32>
    %40 = vector.extract_strided_slice %18 {offsets = [2, 0, 0], sizes = [16, 16, 128], strides = [1, 1, 1]} : vector<18x16x128xf32> to vector<16x16x128xf32>
    %41 = tpu.concatenate %38, %39, %40 in 2 : vector<16x16x128xf32>, vector<16x16x128xf32>, vector<16x16x128xf32> -> vector<16x16x384xf32>
    %42 = vector.shape_cast %41 : vector<16x16x384xf32> to vector<256x384xf32>
    %c2 = arith.constant 2 : index
    %c0_14 = arith.constant 0 : index
    %c0_15 = arith.constant 0 : index
    %43 = vector.load %arg2[%c2, %c0_14, %c0_15] : memref<3x384x128xf32, #tpu.memory_space<vmem>>, vector<1x384x128xf32>
    %44 = vector.shape_cast %43 : vector<1x384x128xf32> to vector<384x128xf32>
    %cst_16 = arith.constant dense<0.000000e+00> : vector<256x128xf32>
    %45 = tpu.matmul %42, %44, %cst_16 {dimension_numbers = #tpu.dot_dimension_numbers<[1], [0], [0], [1], [0, 0, 1, 1], [], []>} : vector<256x384xf32>, vector<384x128xf32>, vector<256x128xf32> -> vector<256x128xf32>
    %46 = arith.addf %37, %45 : vector<256x128xf32>
    %47 = vector.shape_cast %46 : vector<256x128xf32> to vector<16x16x128xf32>
    %c0_17 = arith.constant 0 : index
    %c0_18 = arith.constant 0 : index
    %c0_19 = arith.constant 0 : index
    %c0_20 = arith.constant 0 : index
    %48 = vector.load %arg3[%c0_17, %c0_18, %c0_19, %c0_20] : memref<1x16x16x128xf32, #tpu.memory_space<vmem>>, vector<1x16x16x128xf32>
    %49 = vector.shape_cast %48 : vector<1x16x16x128xf32> to vector<16x16x128xf32>
    %50 = vector.shape_cast %47 : vector<16x16x128xf32> to vector<1x16x16x128xf32>
    tpu.vector_store %arg3[%c0_17, %c0_18, %c0_19, %c0_20], %50 {strides = array<i32>} : memref<1x16x16x128xf32, #tpu.memory_space<vmem>>, vector<1x16x16x128xf32>,
    %cst_21 = arith.constant dense<0.000000e+00> : vector<128xf32>
    %51 = vector.multi_reduction <add>, %46, %cst_21 [0] : vector<256x128xf32> to vector<128xf32>
    %52 = vector.shape_cast %51 : vector<128xf32> to vector<1x128xf32>
    %53 = arith.mulf %46, %46 : vector<256x128xf32>
    %cst_22 = arith.constant dense<0.000000e+00> : vector<128xf32>
    %54 = vector.multi_reduction <add>, %53, %cst_22 [0] : vector<256x128xf32> to vector<128xf32>
    %55 = vector.shape_cast %54 : vector<128xf32> to vector<1x128xf32>
    %56 = tpu.concatenate %52, %55 in 1 : vector<1x128xf32>, vector<1x128xf32> -> vector<1x256xf32>
    %c0_23 = arith.constant 0 : index
    %c0_24 = arith.constant 0 : index
    %c0_25 = arith.constant 0 : index
    %57 = vector.load %arg4[%c0_23, %c0_24, %c0_25] : memref<1x1x256xf32, #tpu.memory_space<vmem>>, vector<1x1x256xf32>
    %58 = vector.shape_cast %57 : vector<1x1x256xf32> to vector<1x256xf32>
    %59 = vector.shape_cast %56 : vector<1x256xf32> to vector<1x1x256xf32>
    tpu.vector_store %arg4[%c0_23, %c0_24, %c0_25], %59 {strides = array<i32>} : memref<1x1x256xf32, #tpu.memory_space<vmem>>, vector<1x1x256xf32>,
    return
  }
  func.func @transform_0(%arg0: i32) -> (i32, i32, i32, i32) {
    %c0_i32 = arith.constant 0 : i32
    %c0_i32_0 = arith.constant 0 : i32
    %c0_i32_1 = arith.constant 0 : i32
    %c0_i32_2 = arith.constant 0 : i32
    return %arg0, %c0_i32, %c0_i32_0, %c0_i32_1 : i32, i32, i32, i32
  }
  func.func @transform_1(%arg0: i32) -> (i32, i32, i32) {
    %c0_i32 = arith.constant 0 : i32
    %c0_i32_0 = arith.constant 0 : i32
    %c0_i32_1 = arith.constant 0 : i32
    %c0_i32_2 = arith.constant 0 : i32
    return %c0_i32, %c0_i32_0, %c0_i32_1 : i32, i32, i32
  }
  func.func @transform_2(%arg0: i32) -> (i32, i32, i32, i32) {
    %c0_i32 = arith.constant 0 : i32
    %c0_i32_0 = arith.constant 0 : i32
    %c0_i32_1 = arith.constant 0 : i32
    %c0_i32_2 = arith.constant 0 : i32
    return %arg0, %c0_i32, %c0_i32_0, %c0_i32_1 : i32, i32, i32, i32
  }
  func.func @transform_3(%arg0: i32) -> (i32, i32, i32) {
    %c0_i32 = arith.constant 0 : i32
    %c0_i32_0 = arith.constant 0 : i32
    %c0_i32_1 = arith.constant 0 : i32
    return %arg0, %c0_i32, %c0_i32_0 : i32, i32, i32
  }
}

module attributes {stable_mosaic.version = 11 : i64} {
  func.func @conv_stats_kernel(%arg0: i32, %arg1: memref<1x16x16x128xf32, #tpu.memory_space<vmem>>, %arg2: memref<1x128xf32, #tpu.memory_space<vmem>>, %arg3: memref<1x128xf32, #tpu.memory_space<vmem>>, %arg4: memref<3x384x128xf32, #tpu.memory_space<vmem>>, %arg5: memref<1x16x16x128xf32, #tpu.memory_space<vmem>>, %arg6: memref<1x1x256xf32, #tpu.memory_space<vmem>>) attributes {dimension_semantics = [#tpu.dimension_semantics<parallel>], iteration_bounds = array<i64: 2>, scalar_prefetch = 0 : i64, scratch_operands = 0 : i64, tpu.core_type = #tpu.core_type<tc>, window_params = [{transform_indices = @transform_0, window_bounds = array<i64: 1, 16, 16, 128>}, {pipeline_mode = #tpu.pipeline_mode<synchronous>, transform_indices = @transform_1, window_bounds = array<i64: 1, 128>}, {pipeline_mode = #tpu.pipeline_mode<synchronous>, transform_indices = @transform_2, window_bounds = array<i64: 1, 128>}, {pipeline_mode = #tpu.pipeline_mode<synchronous>, transform_indices = @transform_3, window_bounds = array<i64: 3, 384, 128>}, {transform_indices = @transform_4, window_bounds = array<i64: 1, 16, 16, 128>}, {transform_indices = @transform_5, window_bounds = array<i64: 1, 1, 256>}]} {
    %c0 = arith.constant 0 : index
    %c0_0 = arith.constant 0 : index
    %c0_1 = arith.constant 0 : index
    %c0_2 = arith.constant 0 : index
    %0 = vector.load %arg1[%c0, %c0_0, %c0_1, %c0_2] : memref<1x16x16x128xf32, #tpu.memory_space<vmem>>, vector<1x16x16x128xf32>
    %1 = vector.shape_cast %0 : vector<1x16x16x128xf32> to vector<16x16x128xf32>
    %c0_3 = arith.constant 0 : index
    %c0_4 = arith.constant 0 : index
    %2 = vector.load %arg2[%c0_3, %c0_4] : memref<1x128xf32, #tpu.memory_space<vmem>>, vector<1x128xf32>
    %3 = vector.shape_cast %2 : vector<1x128xf32> to vector<1x1x128xf32>
    %4 = vector.broadcast %3 : vector<1x1x128xf32> to vector<16x16x128xf32>
    %5 = arith.mulf %1, %4 : vector<16x16x128xf32>
    %c0_5 = arith.constant 0 : index
    %c0_6 = arith.constant 0 : index
    %6 = vector.load %arg3[%c0_5, %c0_6] : memref<1x128xf32, #tpu.memory_space<vmem>>, vector<1x128xf32>
    %7 = vector.shape_cast %6 : vector<1x128xf32> to vector<1x1x128xf32>
    %8 = vector.broadcast %7 : vector<1x1x128xf32> to vector<16x16x128xf32>
    %9 = arith.addf %5, %8 : vector<16x16x128xf32>
    %cst = arith.constant 0.000000e+00 : f32
    %10 = vector.broadcast %cst : f32 to vector<16x16x128xf32>
    %11 = arith.maximumf %9, %10 : vector<16x16x128xf32>
    %cst_7 = arith.constant 0.000000e+00 : f32
    %12 = vector.broadcast %cst_7 : f32 to vector<1x16x128xf32>
    %13 = tpu.concatenate %12, %11, %12 in 0 : vector<1x16x128xf32>, vector<16x16x128xf32>, vector<1x16x128xf32> -> vector<18x16x128xf32>
    %14 = tpu.iota {dimensions = array<i32: 1>} : vector<1x16x1xi32>
    %c0_i32 = arith.constant 0 : i32
    %15 = vector.broadcast %c0_i32 : i32 to vector<1x16x1xi32>
    %16 = arith.cmpi eq, %14, %15 : vector<1x16x1xi32>
    %c1_i32 = arith.constant 1 : i32
    %17 = tpu.dynamic_rotate %13 by %c1_i32 dim 1 : vector<18x16x128xf32>, i32 -> vector<18x16x128xf32>
    %cst_8 = arith.constant 0.000000e+00 : f32
    %18 = vector.shape_cast %16 : vector<1x16x1xi1> to vector<1x16x1xi1>
    %19 = vector.broadcast %18 : vector<1x16x1xi1> to vector<18x16x128xi1>
    %20 = vector.broadcast %cst_8 : f32 to vector<18x16x128xf32>
    %21 = arith.select %19, %20, %17 : vector<18x16x128xi1>, vector<18x16x128xf32>
    %c15_i32 = arith.constant 15 : i32
    %22 = vector.broadcast %c15_i32 : i32 to vector<1x16x1xi32>
    %23 = arith.cmpi eq, %14, %22 : vector<1x16x1xi32>
    %c15_i32_9 = arith.constant 15 : i32
    %24 = tpu.dynamic_rotate %13 by %c15_i32_9 dim 1 : vector<18x16x128xf32>, i32 -> vector<18x16x128xf32>
    %cst_10 = arith.constant 0.000000e+00 : f32
    %25 = vector.shape_cast %23 : vector<1x16x1xi1> to vector<1x16x1xi1>
    %26 = vector.broadcast %25 : vector<1x16x1xi1> to vector<18x16x128xi1>
    %27 = vector.broadcast %cst_10 : f32 to vector<18x16x128xf32>
    %28 = arith.select %26, %27, %24 : vector<18x16x128xi1>, vector<18x16x128xf32>
    %cst_11 = arith.constant 0.000000e+00 : f32
    %29 = vector.broadcast %cst_11 : f32 to vector<256x128xf32>
    %30 = vector.extract_strided_slice %21 {offsets = [0, 0, 0], sizes = [16, 16, 128], strides = [1, 1, 1]} : vector<18x16x128xf32> to vector<16x16x128xf32>
    %31 = vector.extract_strided_slice %13 {offsets = [0, 0, 0], sizes = [16, 16, 128], strides = [1, 1, 1]} : vector<18x16x128xf32> to vector<16x16x128xf32>
    %32 = vector.extract_strided_slice %28 {offsets = [0, 0, 0], sizes = [16, 16, 128], strides = [1, 1, 1]} : vector<18x16x128xf32> to vector<16x16x128xf32>
    %33 = tpu.concatenate %30, %31, %32 in 2 : vector<16x16x128xf32>, vector<16x16x128xf32>, vector<16x16x128xf32> -> vector<16x16x384xf32>
    %34 = vector.shape_cast %33 : vector<16x16x384xf32> to vector<256x384xf32>
    %c0_12 = arith.constant 0 : index
    %c0_13 = arith.constant 0 : index
    %c0_14 = arith.constant 0 : index
    %35 = vector.load %arg4[%c0_12, %c0_13, %c0_14] : memref<3x384x128xf32, #tpu.memory_space<vmem>>, vector<1x384x128xf32>
    %36 = vector.shape_cast %35 : vector<1x384x128xf32> to vector<384x128xf32>
    %cst_15 = arith.constant dense<0.000000e+00> : vector<256x128xf32>
    %37 = tpu.matmul %34, %36, %cst_15 {dimension_numbers = #tpu.dot_dimension_numbers<[1], [0], [0], [1], [0, 0, 1, 1], [], []>} : vector<256x384xf32>, vector<384x128xf32>, vector<256x128xf32> -> vector<256x128xf32>
    %38 = arith.addf %29, %37 : vector<256x128xf32>
    %39 = vector.extract_strided_slice %21 {offsets = [1, 0, 0], sizes = [16, 16, 128], strides = [1, 1, 1]} : vector<18x16x128xf32> to vector<16x16x128xf32>
    %40 = vector.extract_strided_slice %13 {offsets = [1, 0, 0], sizes = [16, 16, 128], strides = [1, 1, 1]} : vector<18x16x128xf32> to vector<16x16x128xf32>
    %41 = vector.extract_strided_slice %28 {offsets = [1, 0, 0], sizes = [16, 16, 128], strides = [1, 1, 1]} : vector<18x16x128xf32> to vector<16x16x128xf32>
    %42 = tpu.concatenate %39, %40, %41 in 2 : vector<16x16x128xf32>, vector<16x16x128xf32>, vector<16x16x128xf32> -> vector<16x16x384xf32>
    %43 = vector.shape_cast %42 : vector<16x16x384xf32> to vector<256x384xf32>
    %c1 = arith.constant 1 : index
    %c0_16 = arith.constant 0 : index
    %c0_17 = arith.constant 0 : index
    %44 = vector.load %arg4[%c1, %c0_16, %c0_17] : memref<3x384x128xf32, #tpu.memory_space<vmem>>, vector<1x384x128xf32>
    %45 = vector.shape_cast %44 : vector<1x384x128xf32> to vector<384x128xf32>
    %cst_18 = arith.constant dense<0.000000e+00> : vector<256x128xf32>
    %46 = tpu.matmul %43, %45, %cst_18 {dimension_numbers = #tpu.dot_dimension_numbers<[1], [0], [0], [1], [0, 0, 1, 1], [], []>} : vector<256x384xf32>, vector<384x128xf32>, vector<256x128xf32> -> vector<256x128xf32>
    %47 = arith.addf %38, %46 : vector<256x128xf32>
    %48 = vector.extract_strided_slice %21 {offsets = [2, 0, 0], sizes = [16, 16, 128], strides = [1, 1, 1]} : vector<18x16x128xf32> to vector<16x16x128xf32>
    %49 = vector.extract_strided_slice %13 {offsets = [2, 0, 0], sizes = [16, 16, 128], strides = [1, 1, 1]} : vector<18x16x128xf32> to vector<16x16x128xf32>
    %50 = vector.extract_strided_slice %28 {offsets = [2, 0, 0], sizes = [16, 16, 128], strides = [1, 1, 1]} : vector<18x16x128xf32> to vector<16x16x128xf32>
    %51 = tpu.concatenate %48, %49, %50 in 2 : vector<16x16x128xf32>, vector<16x16x128xf32>, vector<16x16x128xf32> -> vector<16x16x384xf32>
    %52 = vector.shape_cast %51 : vector<16x16x384xf32> to vector<256x384xf32>
    %c2 = arith.constant 2 : index
    %c0_19 = arith.constant 0 : index
    %c0_20 = arith.constant 0 : index
    %53 = vector.load %arg4[%c2, %c0_19, %c0_20] : memref<3x384x128xf32, #tpu.memory_space<vmem>>, vector<1x384x128xf32>
    %54 = vector.shape_cast %53 : vector<1x384x128xf32> to vector<384x128xf32>
    %cst_21 = arith.constant dense<0.000000e+00> : vector<256x128xf32>
    %55 = tpu.matmul %52, %54, %cst_21 {dimension_numbers = #tpu.dot_dimension_numbers<[1], [0], [0], [1], [0, 0, 1, 1], [], []>} : vector<256x384xf32>, vector<384x128xf32>, vector<256x128xf32> -> vector<256x128xf32>
    %56 = arith.addf %47, %55 : vector<256x128xf32>
    %57 = vector.shape_cast %56 : vector<256x128xf32> to vector<16x16x128xf32>
    %c0_22 = arith.constant 0 : index
    %c0_23 = arith.constant 0 : index
    %c0_24 = arith.constant 0 : index
    %c0_25 = arith.constant 0 : index
    %58 = vector.load %arg5[%c0_22, %c0_23, %c0_24, %c0_25] : memref<1x16x16x128xf32, #tpu.memory_space<vmem>>, vector<1x16x16x128xf32>
    %59 = vector.shape_cast %58 : vector<1x16x16x128xf32> to vector<16x16x128xf32>
    %60 = vector.shape_cast %57 : vector<16x16x128xf32> to vector<1x16x16x128xf32>
    tpu.vector_store %arg5[%c0_22, %c0_23, %c0_24, %c0_25], %60 {strides = array<i32>} : memref<1x16x16x128xf32, #tpu.memory_space<vmem>>, vector<1x16x16x128xf32>,
    %cst_26 = arith.constant dense<0.000000e+00> : vector<128xf32>
    %61 = vector.multi_reduction <add>, %56, %cst_26 [0] : vector<256x128xf32> to vector<128xf32>
    %62 = vector.shape_cast %61 : vector<128xf32> to vector<1x128xf32>
    %63 = arith.mulf %56, %56 : vector<256x128xf32>
    %cst_27 = arith.constant dense<0.000000e+00> : vector<128xf32>
    %64 = vector.multi_reduction <add>, %63, %cst_27 [0] : vector<256x128xf32> to vector<128xf32>
    %65 = vector.shape_cast %64 : vector<128xf32> to vector<1x128xf32>
    %66 = tpu.concatenate %62, %65 in 1 : vector<1x128xf32>, vector<1x128xf32> -> vector<1x256xf32>
    %c0_28 = arith.constant 0 : index
    %c0_29 = arith.constant 0 : index
    %c0_30 = arith.constant 0 : index
    %67 = vector.load %arg6[%c0_28, %c0_29, %c0_30] : memref<1x1x256xf32, #tpu.memory_space<vmem>>, vector<1x1x256xf32>
    %68 = vector.shape_cast %67 : vector<1x1x256xf32> to vector<1x256xf32>
    %69 = vector.shape_cast %66 : vector<1x256xf32> to vector<1x1x256xf32>
    tpu.vector_store %arg6[%c0_28, %c0_29, %c0_30], %69 {strides = array<i32>} : memref<1x1x256xf32, #tpu.memory_space<vmem>>, vector<1x1x256xf32>,
    return
  }
  func.func @transform_0(%arg0: i32) -> (i32, i32, i32, i32) {
    %c0_i32 = arith.constant 0 : i32
    %c0_i32_0 = arith.constant 0 : i32
    %c0_i32_1 = arith.constant 0 : i32
    %c0_i32_2 = arith.constant 0 : i32
    return %arg0, %c0_i32, %c0_i32_0, %c0_i32_1 : i32, i32, i32, i32
  }
  func.func @transform_1(%arg0: i32) -> (i32, i32) {
    %c0_i32 = arith.constant 0 : i32
    %c0_i32_0 = arith.constant 0 : i32
    %c0_i32_1 = arith.constant 0 : i32
    return %c0_i32, %c0_i32_0 : i32, i32
  }
  func.func @transform_2(%arg0: i32) -> (i32, i32) {
    %c0_i32 = arith.constant 0 : i32
    %c0_i32_0 = arith.constant 0 : i32
    %c0_i32_1 = arith.constant 0 : i32
    return %c0_i32, %c0_i32_0 : i32, i32
  }
  func.func @transform_3(%arg0: i32) -> (i32, i32, i32) {
    %c0_i32 = arith.constant 0 : i32
    %c0_i32_0 = arith.constant 0 : i32
    %c0_i32_1 = arith.constant 0 : i32
    %c0_i32_2 = arith.constant 0 : i32
    return %c0_i32, %c0_i32_0, %c0_i32_1 : i32, i32, i32
  }
  func.func @transform_4(%arg0: i32) -> (i32, i32, i32, i32) {
    %c0_i32 = arith.constant 0 : i32
    %c0_i32_0 = arith.constant 0 : i32
    %c0_i32_1 = arith.constant 0 : i32
    %c0_i32_2 = arith.constant 0 : i32
    return %arg0, %c0_i32, %c0_i32_0, %c0_i32_1 : i32, i32, i32, i32
  }
  func.func @transform_5(%arg0: i32) -> (i32, i32, i32) {
    %c0_i32 = arith.constant 0 : i32
    %c0_i32_0 = arith.constant 0 : i32
    %c0_i32_1 = arith.constant 0 : i32
    return %arg0, %c0_i32, %c0_i32_0 : i32, i32, i32
  }
}

module attributes {stable_mosaic.version = 11 : i64} {
  func.func @bn_relu_kernel(%arg0: i32, %arg1: memref<1x16x16x128xf32, #tpu.memory_space<vmem>>, %arg2: memref<1x128xf32, #tpu.memory_space<vmem>>, %arg3: memref<1x128xf32, #tpu.memory_space<vmem>>, %arg4: memref<1x16x16x128xf32, #tpu.memory_space<vmem>>) attributes {dimension_semantics = [#tpu.dimension_semantics<parallel>], iteration_bounds = array<i64: 2>, scalar_prefetch = 0 : i64, scratch_operands = 0 : i64, tpu.core_type = #tpu.core_type<tc>, window_params = [{transform_indices = @transform_0, window_bounds = array<i64: 1, 16, 16, 128>}, {pipeline_mode = #tpu.pipeline_mode<synchronous>, transform_indices = @transform_1, window_bounds = array<i64: 1, 128>}, {pipeline_mode = #tpu.pipeline_mode<synchronous>, transform_indices = @transform_2, window_bounds = array<i64: 1, 128>}, {transform_indices = @transform_3, window_bounds = array<i64: 1, 16, 16, 128>}]} {
    %c0 = arith.constant 0 : index
    %c0_0 = arith.constant 0 : index
    %c0_1 = arith.constant 0 : index
    %c0_2 = arith.constant 0 : index
    %0 = vector.load %arg1[%c0, %c0_0, %c0_1, %c0_2] : memref<1x16x16x128xf32, #tpu.memory_space<vmem>>, vector<1x16x16x128xf32>
    %1 = vector.shape_cast %0 : vector<1x16x16x128xf32> to vector<16x16x128xf32>
    %c0_3 = arith.constant 0 : index
    %c0_4 = arith.constant 0 : index
    %2 = vector.load %arg2[%c0_3, %c0_4] : memref<1x128xf32, #tpu.memory_space<vmem>>, vector<1x128xf32>
    %3 = vector.shape_cast %2 : vector<1x128xf32> to vector<1x1x128xf32>
    %4 = vector.broadcast %3 : vector<1x1x128xf32> to vector<16x16x128xf32>
    %5 = arith.mulf %1, %4 : vector<16x16x128xf32>
    %c0_5 = arith.constant 0 : index
    %c0_6 = arith.constant 0 : index
    %6 = vector.load %arg3[%c0_5, %c0_6] : memref<1x128xf32, #tpu.memory_space<vmem>>, vector<1x128xf32>
    %7 = vector.shape_cast %6 : vector<1x128xf32> to vector<1x1x128xf32>
    %8 = vector.broadcast %7 : vector<1x1x128xf32> to vector<16x16x128xf32>
    %9 = arith.addf %5, %8 : vector<16x16x128xf32>
    %cst = arith.constant 0.000000e+00 : f32
    %10 = vector.broadcast %cst : f32 to vector<16x16x128xf32>
    %11 = arith.maximumf %9, %10 : vector<16x16x128xf32>
    %c0_7 = arith.constant 0 : index
    %c0_8 = arith.constant 0 : index
    %c0_9 = arith.constant 0 : index
    %c0_10 = arith.constant 0 : index
    %12 = vector.load %arg4[%c0_7, %c0_8, %c0_9, %c0_10] : memref<1x16x16x128xf32, #tpu.memory_space<vmem>>, vector<1x16x16x128xf32>
    %13 = vector.shape_cast %12 : vector<1x16x16x128xf32> to vector<16x16x128xf32>
    %14 = vector.shape_cast %11 : vector<16x16x128xf32> to vector<1x16x16x128xf32>
    tpu.vector_store %arg4[%c0_7, %c0_8, %c0_9, %c0_10], %14 {strides = array<i32>} : memref<1x16x16x128xf32, #tpu.memory_space<vmem>>, vector<1x16x16x128xf32>,
    return
  }
  func.func @transform_0(%arg0: i32) -> (i32, i32, i32, i32) {
    %c0_i32 = arith.constant 0 : i32
    %c0_i32_0 = arith.constant 0 : i32
    %c0_i32_1 = arith.constant 0 : i32
    %c0_i32_2 = arith.constant 0 : i32
    return %arg0, %c0_i32, %c0_i32_0, %c0_i32_1 : i32, i32, i32, i32
  }
  func.func @transform_1(%arg0: i32) -> (i32, i32) {
    %c0_i32 = arith.constant 0 : i32
    %c0_i32_0 = arith.constant 0 : i32
    %c0_i32_1 = arith.constant 0 : i32
    return %c0_i32, %c0_i32_0 : i32, i32
  }
  func.func @transform_2(%arg0: i32) -> (i32, i32) {
    %c0_i32 = arith.constant 0 : i32
    %c0_i32_0 = arith.constant 0 : i32
    %c0_i32_1 = arith.constant 0 : i32
    return %c0_i32, %c0_i32_0 : i32, i32
  }
  func.func @transform_3(%arg0: i32) -> (i32, i32, i32, i32) {
    %c0_i32 = arith.constant 0 : i32
    %c0_i32_0 = arith.constant 0 : i32
    %c0_i32_1 = arith.constant 0 : i32
    %c0_i32_2 = arith.constant 0 : i32
    return %arg0, %c0_i32, %c0_i32_0, %c0_i32_1 : i32, i32, i32, i32
  }
}

</mosaic_0001>

<bundles_post_ra>
// kernel: conv_block_pallas.5
= control target key start
LH: loop header
LB: loop body
LE: loop exit
PB: predicated region body
PF: predicated region fallthrough
CT: control target
= control target key end

     0   :  { %s451_s12 = smov 0   ;;  %s610_s0 = inlined_call_operand.vmem [shape: f32[2,16,16,128], index: 0, kind: input, shape index: {}]   ;;  %s611_s1 = inlined_call_operand.vmem [shape: f32[1,128], index: 1, kind: input, shape index: {}]   ;;  %s612_s2 = inlined_call_operand.vmem [shape: f32[1,128], index: 2, kind: input, shape index: {}]   ;;  %s613_s3 = inlined_call_operand.vmem [shape: f32[2,16,16,128], index: 3, kind: output, shape index: {}]  }
   0x1 LB: > { %s400_s13 = sadd.s32 4294967295, %s429_s12   ;;  %p404_p0 = scmp.ge.s32.totalorder %s429_s12, 1  ;;  %s429_s12 = sphi %s451_s12, %s13_s12  }
   0x2   : > { %p137_p1 = scmp.lt.s32.totalorder %s429_s12, 3 }
   0x4   : > { %p138_p2 = pnand %p404_p0, %p137_p1 }
   0x5   : > { %p161_p3 = scmp.lt.s32.totalorder (!%p138_p2), %s400_s13, 1  ;;  %v462_v0 = vld [vmem:[%s611_s1] ss:$0 sm:$0xff] (!%p138_p2) }
   0x6   : > { %141 = sbr.rel (%p138_p2) target bundleno = 46 (0x2e), region = 32  ;;  %v472_v1 = vld [vmem:[%s612_s2] ss:$0 sm:$0xff] (!%p138_p2) }
   0xd   : > { %s615_s13 = smov (!%p161_p3, %s400_s13), 1 }
   0xe   : > { %s413_s14 = sshll.u32 %s615_s13, 8 }
   0xf   : > { %s467_s19 = scalar_lea.vmem %s610_s0, %s413_s14  ;;  %s495_s24 = scalar_lea.vmem %s613_s3, %s413_s14 }
  0x10   : > { %v171_v2 = vld [vmem:[%s467_s19] sm:$0xff]  ;;  %v172_v3 = vld [vmem:[%s467_s19 + $0x8] sm:$0xff]  ;;  %v173_v4 = vld [vmem:[%s467_s19 + $0x10] sm:$0xff] }
  0x11   : > { %v210_v5 = vmul.f32 %v462_v0, %v171_v2  ;;  %v211_v6 = vmul.f32 %v462_v0, %v172_v3  ;;  %v212_v7 = vmul.f32 %v462_v0, %v173_v4  ;;  %v174_v8 = vld [vmem:[%s467_s19 + $0x18] sm:$0xff]  ;;  %v175_v9 = vld [vmem:[%s467_s19 + $0x20] sm:$0xff]  ;;  %v176_v10 = vld [vmem:[%s467_s19 + $0x28] sm:$0xff] }
  0x12   : > { %v213_v11 = vmul.f32 %v462_v0, %v174_v8  ;;  %v214_v12 = vmul.f32 %v462_v0, %v175_v9  ;;  %v215_v13 = vmul.f32 %v462_v0, %v176_v10  ;;  %v177_v14 = vld [vmem:[%s467_s19 + $0x30] sm:$0xff]  ;;  %v178_v15 = vld [vmem:[%s467_s19 + $0x38] sm:$0xff]  ;;  %v179_v24 = vld [vmem:[%s467_s19 + $0x40] sm:$0xff] }
  0x13   : > { %v249_v16 = vadd.f32 %v472_v1, %v210_v5  ;;  %v250_v17 = vadd.f32 %v472_v1, %v211_v6  ;;  %v251_v18 = vadd.f32 %v472_v1, %v212_v7  ;;  %v216_v19 = vmul.f32 %v462_v0, %v177_v14  ;;  %v180_v25 = vld [vmem:[%s467_s19 + $0x48] sm:$0xff]  ;;  %v181_v26 = vld [vmem:[%s467_s19 + $0x50] sm:$0xff]  ;;  %v182_v31 = vld [vmem:[%s467_s19 + $0x58] sm:$0xff] }
  0x14   : > { %v252_v20 = vadd.f32 %v472_v1, %v213_v11  ;;  %v253_v21 = vadd.f32 %v472_v1, %v214_v12  ;;  %v254_v22 = vadd.f32 %v472_v1, %v215_v13  ;;  %v217_v23 = vmul.f32 %v462_v0, %v178_v15  ;;  %v183_v32 = vld [vmem:[%s467_s19 + $0x60] sm:$0xff]  ;;  %v184_v33 = vld [vmem:[%s467_s19 + $0x68] sm:$0xff]  ;;  %v185_v38 = vld [vmem:[%s467_s19 + $0x70] sm:$0xff] }
  0x15   : > { %v281_v27 = vmax.f32 %v249_v16, 0.0  ;;  %v282_v28 = vmax.f32 %v250_v17, 0.0  ;;  %v283_v29 = vmax.f32 %v251_v18, 0.0  ;;  %v255_v30 = vadd.f32 %v472_v1, %v216_v19  ;;  %v186_v43 = vld [vmem:[%s467_s19 + $0x78] sm:$0xff]  ;;  %v187_v56 = vld [vmem:[%s467_s19 + $0x80] sm:$0xff]  ;;  %v188_v57 = vld [vmem:[%s467_s19 + $0x88] sm:$0xff] }
  0x16   : > { %v284_v34 = vmax.f32 %v252_v20, 0.0  ;;  %v285_v35 = vmax.f32 %v253_v21, 0.0  ;;  %v286_v36 = vmax.f32 %v254_v22, 0.0  ;;  %v256_v37 = vadd.f32 %v472_v1, %v217_v23  ;;  %v189_v58 = vld [vmem:[%s467_s19 + $0x90] sm:$0xff]  ;;  %v190_v63 = vld [vmem:[%s467_s19 + $0x98] sm:$0xff]  ;;  %v191_v2 = vld [vmem:[%s467_s19 + $0xa0] sm:$0xff] }
  0x17   : > { %313 = vst [vmem:[%s495_s24] sm:$0xff] %v281_v27  ;;  %314 = vst [vmem:[%s495_s24 + $0x8] sm:$0xff] %v282_v28  ;;  %v287_v39 = vmax.f32 %v255_v30, 0.0  ;;  %v218_v40 = vmul.f32 %v462_v0, %v179_v24  ;;  %v219_v41 = vmul.f32 %v462_v0, %v180_v25  ;;  %v220_v42 = vmul.f32 %v462_v0, %v181_v26  ;;  %v192_v3 = vld [vmem:[%s467_s19 + $0xa8] sm:$0xff]  ;;  %v193_v8 = vld [vmem:[%s467_s19 + $0xb0] sm:$0xff] }
  0x18   : > { %315 = vst [vmem:[%s495_s24 + $0x10] sm:$0xff] %v283_v29  ;;  %316 = vst [vmem:[%s495_s24 + $0x18] sm:$0xff] %v284_v34  ;;  %v288_v44 = vmax.f32 %v256_v37, 0.0  ;;  %v221_v45 = vmul.f32 %v462_v0, %v182_v31  ;;  %v222_v46 = vmul.f32 %v462_v0, %v183_v32  ;;  %v223_v47 = vmul.f32 %v462_v0, %v184_v33  ;;  %v194_v13 = vld [vmem:[%s467_s19 + $0xb8] sm:$0xff]  ;;  %v195_v26 = vld [vmem:[%s467_s19 + $0xc0] sm:$0xff] }
  0x19   : > { %317 = vst [vmem:[%s495_s24 + $0x20] sm:$0xff] %v285_v35  ;;  %318 = vst [vmem:[%s495_s24 + $0x28] sm:$0xff] %v286_v36  ;;  %v257_v48 = vadd.f32 %v472_v1, %v218_v40  ;;  %v258_v49 = vadd.f32 %v472_v1, %v219_v41  ;;  %v259_v50 = vadd.f32 %v472_v1, %v220_v42  ;;  %v196_v27 = vld [vmem:[%s467_s19 + $0xc8] sm:$0xff]  ;;  %v197_v28 = vld [vmem:[%s467_s19 + $0xd0] sm:$0xff] }
  0x1a   : > { %319 = vst [vmem:[%s495_s24 + $0x30] sm:$0xff] %v287_v39  ;;  %v224_v51 = vmul.f32 %v462_v0, %v185_v38  ;;  %320 = vst [vmem:[%s495_s24 + $0x38] sm:$0xff] %v288_v44  ;;  %v260_v52 = vadd.f32 %v472_v1, %v221_v45  ;;  %v261_v53 = vadd.f32 %v472_v1, %v222_v46  ;;  %v198_v33 = vld [vmem:[%s467_s19 + $0xd8] sm:$0xff]  ;;  %v199_v34 = vld [vmem:[%s467_s19 + $0xe0] sm:$0xff] }
  0x1b   : > { %v262_v54 = vadd.f32 %v472_v1, %v223_v47  ;;  %v225_v55 = vmul.f32 %v462_v0, %v186_v43  ;;  %v289_v59 = vmax.f32 %v257_v48, 0.0  ;;  %v290_v60 = vmax.f32 %v258_v49, 0.0  ;;  %v200_v35 = vld [vmem:[%s467_s19 + $0xe8] sm:$0xff]  ;;  %v201_v40 = vld [vmem:[%s467_s19 + $0xf0] sm:$0xff]  ;;  %v202_v45 = vld [vmem:[%s467_s19 + $0xf8] sm:$0xff] }
  0x1c   : > { %v291_v61 = vmax.f32 %v259_v50, 0.0  ;;  %v263_v62 = vadd.f32 %v472_v1, %v224_v51  ;;  %v292_v4 = vmax.f32 %v260_v52, 0.0  ;;  %v293_v5 = vmax.f32 %v261_v53, 0.0 }
  0x1d   : > { %v294_v6 = vmax.f32 %v262_v54, 0.0  ;;  %v264_v7 = vadd.f32 %v472_v1, %v225_v55  ;;  %321 = vst [vmem:[%s495_s24 + $0x40] sm:$0xff] %v289_v59  ;;  %322 = vst [vmem:[%s495_s24 + $0x48] sm:$0xff] %v290_v60  ;;  %v226_v10 = vmul.f32 %v462_v0, %v187_v56  ;;  %v227_v11 = vmul.f32 %v462_v0, %v188_v57 }
  0x1e   : > { %323 = vst [vmem:[%s495_s24 + $0x50] sm:$0xff] %v291_v61  ;;  %v295_v9 = vmax.f32 %v263_v62, 0.0  ;;  %v228_v12 = vmul.f32 %v462_v0, %v189_v58  ;;  %324 = vst [vmem:[%s495_s24 + $0x58] sm:$0xff] %v292_v4  ;;  %v229_v15 = vmul.f32 %v462_v0, %v190_v63  ;;  %v230_v16 = vmul.f32 %v462_v0, %v191_v2 }
  0x1f   : > { %325 = vst [vmem:[%s495_s24 + $0x60] sm:$0xff] %v293_v5  ;;  %326 = vst [vmem:[%s495_s24 + $0x68] sm:$0xff] %v294_v6  ;;  %v296_v14 = vmax.f32 %v264_v7, 0.0  ;;  %v231_v17 = vmul.f32 %v462_v0, %v192_v3  ;;  %v265_v18 = vadd.f32 %v472_v1, %v226_v10  ;;  %v266_v19 = vadd.f32 %v472_v1, %v227_v11 }
  0x20   : > { %327 = vst [vmem:[%s495_s24 + $0x70] sm:$0xff] %v295_v9  ;;  %v267_v20 = vadd.f32 %v472_v1, %v228_v12  ;;  %v232_v21 = vmul.f32 %v462_v0, %v193_v8  ;;  %v268_v22 = vadd.f32 %v472_v1, %v229_v15  ;;  %v269_v23 = vadd.f32 %v472_v1, %v230_v16 }
  0x21   : > { %328 = vst [vmem:[%s495_s24 + $0x78] sm:$0xff] %v296_v14  ;;  %v270_v24 = vadd.f32 %v472_v1, %v231_v17  ;;  %v233_v25 = vmul.f32 %v462_v0, %v194_v13  ;;  %v297_v29 = vmax.f32 %v265_v18, 0.0  ;;  %v298_v30 = vmax.f32 %v266_v19, 0.0 }
  0x22   : > { %v299_v31 = vmax.f32 %v267_v20, 0.0  ;;  %v271_v32 = vadd.f32 %v472_v1, %v232_v21  ;;  %v300_v36 = vmax.f32 %v268_v22, 0.0  ;;  %v301_v37 = vmax.f32 %v269_v23, 0.0 }
  0x23   : > { %v302_v38 = vmax.f32 %v270_v24, 0.0  ;;  %v272_v39 = vadd.f32 %v472_v1, %v233_v25  ;;  %329 = vst [vmem:[%s495_s24 + $0x80] sm:$0xff] %v297_v29  ;;  %330 = vst [vmem:[%s495_s24 + $0x88] sm:$0xff] %v298_v30  ;;  %v234_v42 = vmul.f32 %v462_v0, %v195_v26  ;;  %v235_v43 = vmul.f32 %v462_v0, %v196_v27 }
  0x24   : > { %331 = vst [vmem:[%s495_s24 + $0x90] sm:$0xff] %v299_v31  ;;  %v303_v41 = vmax.f32 %v271_v32, 0.0  ;;  %v236_v44 = vmul.f32 %v462_v0, %v197_v28  ;;  %332 = vst [vmem:[%s495_s24 + $0x98] sm:$0xff] %v300_v36  ;;  %v237_v47 = vmul.f32 %v462_v0, %v198_v33  ;;  %v238_v48 = vmul.f32 %v462_v0, %v199_v34 }
  0x25   : > { %333 = vst [vmem:[%s495_s24 + $0xa0] sm:$0xff] %v301_v37  ;;  %334 = vst [vmem:[%s495_s24 + $0xa8] sm:$0xff] %v302_v38  ;;  %v304_v46 = vmax.f32 %v272_v39, 0.0  ;;  %v239_v49 = vmul.f32 %v462_v0, %v200_v35  ;;  %v273_v50 = vadd.f32 %v472_v1, %v234_v42  ;;  %v274_v51 = vadd.f32 %v472_v1, %v235_v43 }
  0x26   : > { %335 = vst [vmem:[%s495_s24 + $0xb0] sm:$0xff] %v303_v41  ;;  %v275_v52 = vadd.f32 %v472_v1, %v236_v44  ;;  %v240_v53 = vmul.f32 %v462_v0, %v201_v40  ;;  %v276_v54 = vadd.f32 %v472_v1, %v237_v47  ;;  %v277_v55 = vadd.f32 %v472_v1, %v238_v48 }
  0x27   : > { %336 = vst [vmem:[%s495_s24 + $0xb8] sm:$0xff] %v304_v46  ;;  %v278_v56 = vadd.f32 %v472_v1, %v239_v49  ;;  %v241_v57 = vmul.f32 %v462_v0, %v202_v45  ;;  %v305_v58 = vmax.f32 %v273_v50, 0.0  ;;  %v306_v59 = vmax.f32 %v274_v51, 0.0 }
  0x28   : > { %v307_v60 = vmax.f32 %v275_v52, 0.0  ;;  %v279_v61 = vadd.f32 %v472_v1, %v240_v53  ;;  %v308_v62 = vmax.f32 %v276_v54, 0.0  ;;  %v309_v63 = vmax.f32 %v277_v55, 0.0 }
  0x29   : > { %v310_v2 = vmax.f32 %v278_v56, 0.0  ;;  %v280_v3 = vadd.f32 %v472_v1, %v241_v57  ;;  %337 = vst [vmem:[%s495_s24 + $0xc0] sm:$0xff] %v305_v58  ;;  %338 = vst [vmem:[%s495_s24 + $0xc8] sm:$0xff] %v306_v59 }
  0x2a   : > { %339 = vst [vmem:[%s495_s24 + $0xd0] sm:$0xff] %v307_v60  ;;  %v311_v4 = vmax.f32 %v279_v61, 0.0  ;;  %340 = vst [vmem:[%s495_s24 + $0xd8] sm:$0xff] %v308_v62 }
  0x2b   : > { %341 = vst [vmem:[%s495_s24 + $0xe0] sm:$0xff] %v309_v63  ;;  %342 = vst [vmem:[%s495_s24 + $0xe8] sm:$0xff] %v310_v2  ;;  %v312_v0 = vmax.f32 %v280_v3, 0.0 }
  0x2c   : > { %343 = vst [vmem:[%s495_s24 + $0xf0] sm:$0xff] %v311_v4 }
  0x2d   : > { %344 = vst [vmem:[%s495_s24 + $0xf8] sm:$0xff] %v312_v0 }
  0x2e PF: > { %s13_s12 = sadd.s32 1, %s429_s12  }
  0x2f   : > { %p10_p4 = scmp.ge.s32.totalorder %s13_s12, 4  }
  0x31   :  { %12 = sbr.rel (!%p10_p4) target bundleno = 1 (0x1), region = 62 }

// kernel: conv_block_pallas.3
= control target key start
LH: loop header
LB: loop body
LE: loop exit
PB: predicated region body
PF: predicated region fallthrough
CT: control target
= control target key end

     0   :  { %s3194_s12 = smov 0   ;;  %s4964_s0 = inlined_call_operand.vmem [shape: f32[2,16,16,128], index: 0, kind: input, shape index: {}]   ;;  %s4965_s1 = inlined_call_operand.vmem [shape: f32[3,384,128], index: 1, kind: input, shape index: {}]   ;;  %s4966_s2 = inlined_call_operand.vmem [shape: f32[2,16,16,128], index: 2, kind: output, shape index: {0}]   ;;  %s4967_s3 = inlined_call_operand.vmem [shape: f32[2,1,256], index: 3, kind: output, shape index: {1}]  }
   0x1 LB: > { %s2202_s13 = sadd.s32 4294967295, %s3169_s12   ;;  %p2206_p0 = scmp.ge.s32.totalorder %s3169_s12, 1  ;;  %s3169_s12 = sphi %s3194_s12, %s14_s12  }
   0x2   : > { %p140_p1 = scmp.lt.s32.totalorder %s3169_s12, 3 }
   0x4   : > { %p141_p2 = pnand %p2206_p0, %p140_p1 }
   0x6   : > { %144 = sbr.rel (%p141_p2) target bundleno = 604 (0x25c), region = 28 }
   0xd   : > { %v2212_v0 = vld [vmem:[%s4965_s1 + $0x180] sm:$0xff]  ;;  %v2213_v1 = vld [vmem:[%s4965_s1 + $0x188] sm:$0xff]  ;;  %p168_p3 = scmp.lt.s32.totalorder %s2202_s13, 1  ;;  %v4969_v3 = vmov 0.0|0.0   ;;  %v2214_v6 = vld [vmem:[%s4965_s1 + $0x190] sm:$0xff]  ;;  %v4968_v15 = vlaneseq }
   0xe   : > { %v2244_v2 = vld [vmem:[%s4965_s1 + $0x280] sm:$0xff]  ;;  %2882 = vmatprep.subr.bf16.mxu0 %v4969_v3  ;;  %v2883_v4 = vpack.c.bf16 %v2213_v1, %v2212_v0  ;;  %v2245_v5 = vld [vmem:[%s4965_s1 + $0x288] sm:$0xff]  ;;  %v2215_v7 = vld [vmem:[%s4965_s1 + $0x198] sm:$0xff] }
   0xf   : > { %v2930_v8 = vpack.c.bf16 %v2245_v5, %v2244_v2  ;;  %v2246_v9 = vld [vmem:[%s4965_s1 + $0x290] sm:$0xff]  ;;  %v2247_v10 = vld [vmem:[%s4965_s1 + $0x298] sm:$0xff]  ;;  %s5069_s13 = smov (!%p168_p3, %s2202_s13), 1  ;;  %v2886_v11 = vpack.c.bf16 %v2215_v7, %v2214_v6  ;;  %v2248_v13 = vld [vmem:[%s4965_s1 + $0x2a0] sm:$0xff]  ;;  %v3257_v22 = vshrl.u32 %v4968_v15, 7 }
  0x10   : > { %2884 = vmatpush1.bf16.msra.mxu0 %v2883_v4  ;;  %v2934_v12 = vpack.c.bf16 %v2247_v10, %v2246_v9  ;;  %v2249_v14 = vld [vmem:[%s4965_s1 + $0x2a8] sm:$0xff]  ;;  %v2216_v16 = vld [vmem:[%s4965_s1 + $0x1a0] sm:$0xff]  ;;  %s2494_s11 = sshll.u32 %s5069_s13, 8  ;;  %v2250_v20 = vld [vmem:[%s4965_s1 + $0x2b0] sm:$0xff] }
  0x11   : > { %2931 = vmatprep.subr.bf16.mxu1 %v2930_v8  ;;  %2885 = vmatprep.subr.bf16.mxu0 %v4969_v3  ;;  %v2217_v17 = vld [vmem:[%s4965_s1 + $0x1a8] sm:$0xff]  ;;  %v2938_v18 = vpack.c.bf16 %v2249_v14, %v2248_v13  ;;  %v2251_v21 = vld [vmem:[%s4965_s1 + $0x2b8] sm:$0xff]  ;;  %s3254_s20 = scalar_lea.vmem %s4964_s0, %s2494_s11  ;;  %v2218_v23 = vld [vmem:[%s4965_s1 + $0x1b0] sm:$0xff]  ;;  %vm356_vm0 = vcmp.lt.s32.totalorder %v3257_v22, 7  ;;  %v3349_v60 = vadd.s32 8, %v3257_v22  ;;  %vm251_vm2 = vcmp.lt.s32.totalorder %v3257_v22, 1  ;;  %s4883_s29 = scalar_lea.vmem %s4966_s2, %s2494_s11 }
  0x12   : > { %2933 = vmatpush3.bf16.msra.mxu1 %v2930_v8  ;;  %v2889_v19 = vpack.c.bf16 %v2217_v17, %v2216_v16  ;;  %v2219_v24 = vld [vmem:[%s4965_s1 + $0x1b8] sm:$0xff]  ;;  %v2942_v25 = vpack.c.bf16 %v2251_v21, %v2250_v20  ;;  %v3267_v26 = vld [vmem:[%s3254_s20] sm:$0xff]  ;;  %v2253_v29 = vld [vmem:[%s4965_s1 + $0x2c8] sm:$0xff]  ;;  %vm2496_vm3 = vcmp.ne.s32.totalorder %v3257_v22, 0  ;;  %s2211_s11 = sshll.u32 %s5069_s13, 1 }
  0x13   : > { %2935 = vmatprep.subr.bf16.mxu1 %v2934_v12  ;;  %v2892_v27 = vpack.c.bf16 %v2219_v24, %v2218_v23  ;;  %v2252_v28 = vld [vmem:[%s4965_s1 + $0x2c0] sm:$0xff]  ;;  %v3276_v30 = vld [vmem:[%s3254_s20 + $0x8] sm:$0xff]  ;;  %v324_v31 = vrot.slane %v3267_v26, 1  ;;  %588 = vmatprep.mubr.f32.mxu0 %v3267_v26  ;;  %v2254_v38 = vld [vmem:[%s4965_s1 + $0x2d0] sm:$0xff]  ;;  %vm2497_vm1 = vcmp.ne.s32.totalorder %v3349_v60, 15  ;;  %s181_s5 = scalar_lea.vmem %s4967_s3, %s2211_s11 }
  0x14   : > { %2887 = vmatpush1.bf16.msra.mxu0 %v2886_v11  ;;  %v2220_v32 = vld [vmem:[%s4965_s1 + $0x1c0] sm:$0xff]  ;;  %v2221_v33 = vld [vmem:[%s4965_s1 + $0x1c8] sm:$0xff]  ;;  %v340_v34 = vrot.slane %v3276_v30, 1  ;;  %v2946_v35 = vpack.c.bf16 %v2253_v29, %v2252_v28  ;;  %v2255_v39 = vld [vmem:[%s4965_s1 + $0x2d8] sm:$0xff] }
  0x15   : > { %2888 = vmatprep.subr.bf16.mxu0 %v4969_v3  ;;  %v2895_v37 = vpack.c.bf16 %v2221_v33, %v2220_v32  ;;  %v2222_v40 = vld [vmem:[%s4965_s1 + $0x1d0] sm:$0xff]  ;;  %v2223_v41 = vld [vmem:[%s4965_s1 + $0x1d8] sm:$0xff]  ;;  %v2950_v42 = vpack.c.bf16 %v2255_v39, %v2254_v38  ;;  %v2256_v44 = vld [vmem:[%s4965_s1 + $0x2e0] sm:$0xff] }
  0x16   : > { %2937 = vmatpush3.bf16.msra.mxu1 %v2934_v12  ;;  %v3293_v36 = vsel %vm356_vm0, %v324_v31, %v340_v34  ;;  %v2898_v43 = vpack.c.bf16 %v2223_v41, %v2222_v40  ;;  %v2257_v45 = vld [vmem:[%s4965_s1 + $0x2e8] sm:$0xff]  ;;  %v2224_v46 = vld [vmem:[%s4965_s1 + $0x1e0] sm:$0xff]  ;;  %v2258_v50 = vld [vmem:[%s4965_s1 + $0x2f0] sm:$0xff]  ;;  %v3377_v7 = vsel %vm356_vm0, %v340_v34, %v324_v31 }
  0x17   : > { %2939 = vmatprep.subr.bf16.mxu1 %v2938_v18  ;;  %2674 = vmatprep.mubr.f32.mxu1 %v3293_v36  ;;  %v2225_v47 = vld [vmem:[%s4965_s1 + $0x1e8] sm:$0xff]  ;;  %v2954_v48 = vpack.c.bf16 %v2257_v45, %v2256_v44  ;;  %v2259_v51 = vld [vmem:[%s4965_s1 + $0x2f8] sm:$0xff]  ;;  %v2226_v52 = vld [vmem:[%s4965_s1 + $0x1f0] sm:$0xff] }
  0x18   : > { %2890 = vmatpush1.bf16.msra.mxu0 %v2889_v19  ;;  %v2901_v49 = vpack.c.bf16 %v2225_v47, %v2224_v46  ;;  %v2227_v53 = vld [vmem:[%s4965_s1 + $0x1f8] sm:$0xff]  ;;  %v2958_v54 = vpack.c.bf16 %v2259_v51, %v2258_v50  ;;  %v3336_v56 = vld [vmem:[%s3254_s20 + $0x10] sm:$0xff]  ;;  %v2228_v58 = vld [vmem:[%s4965_s1 + $0x200] sm:$0xff] }
  0x19   : > { %2891 = vmatprep.subr.bf16.mxu0 %v4969_v3  ;;  %v2904_v55 = vpack.c.bf16 %v2227_v53, %v2226_v52  ;;  %v3339_v57 = vld [vmem:[%s3254_s20 + $0x18] sm:$0xff]  ;;  %v2229_v59 = vld [vmem:[%s4965_s1 + $0x208] sm:$0xff]  ;;  %v427_v61 = vld [vmem:[%s4965_s1] sm:$0xff]  ;;  %v325_v63 = vrot.slane %v3336_v56, 1 }
  0x1a   : > { %2941 = vmatpush3.bf16.msra.mxu1 %v2938_v18  ;;  %v428_v62 = vld [vmem:[%s4965_s1 + $0x8] sm:$0xff]  ;;  %v341_v0 = vrot.slane %v3339_v57, 1  ;;  %v2907_v1 = vpack.c.bf16 %v2229_v59, %v2228_v58  ;;  %v3360_v2 = vld [vmem:[%s3254_s20 + $0x20] sm:$0xff]  ;;  %v2230_v5 = vld [vmem:[%s4965_s1 + $0x210] sm:$0xff] }
  0x1b   : > { %2943 = vmatprep.subr.bf16.mxu1 %v2942_v25  ;;  %v3363_v4 = vld [vmem:[%s3254_s20 + $0x28] sm:$0xff]  ;;  %v2231_v6 = vld [vmem:[%s4965_s1 + $0x218] sm:$0xff]  ;;  %v2963_v8 = vpack.c.bf16 %v428_v62, %v427_v61  ;;  %v429_v10 = vld [vmem:[%s4965_s1 + $0x10] sm:$0xff]  ;;  %v326_v12 = vrot.slane %v3360_v2, 1 }
  0x1c   : > { %2893 = vmatpush1.bf16.msra.mxu0 %v2892_v27  ;;  %v3382_v9 = vsel %vm356_vm0, %v325_v63, %v341_v0  ;;  %v430_v11 = vld [vmem:[%s4965_s1 + $0x18] sm:$0xff]  ;;  %v342_v13 = vrot.slane %v3363_v4, 1  ;;  %v2910_v14 = vpack.c.bf16 %v2231_v6, %v2230_v5  ;;  %v3393_v16 = vld [vmem:[%s3254_s20 + $0x30] sm:$0xff]  ;;  %v2232_v18 = vld [vmem:[%s4965_s1 + $0x220] sm:$0xff]  ;;  %v3411_v20 = vsel %vm356_vm0, %v341_v0, %v325_v63 }
  0x1d   : > { %2894 = vmatprep.subr.bf16.mxu0 %v4969_v3  ;;  %v3396_v17 = vld [vmem:[%s3254_s20 + $0x38] sm:$0xff]  ;;  %v2233_v19 = vld [vmem:[%s4965_s1 + $0x228] sm:$0xff]  ;;  %v2966_v21 = vpack.c.bf16 %v430_v11, %v429_v10  ;;  %v431_v24 = vld [vmem:[%s4965_s1 + $0x20] sm:$0xff]  ;;  %v327_v27 = vrot.slane %v3393_v16, 1 }
  0x1e   : > { %2945 = vmatpush3.bf16.msra.mxu1 %v2942_v25  ;;  %v3416_v23 = vsel %vm356_vm0, %v326_v12, %v342_v13  ;;  %v432_v25 = vld [vmem:[%s4965_s1 + $0x28] sm:$0xff]  ;;  %v343_v28 = vrot.slane %v3396_v17, 1  ;;  %v2913_v29 = vpack.c.bf16 %v2233_v19, %v2232_v18  ;;  %v3427_v31 = vld [vmem:[%s3254_s20 + $0x40] sm:$0xff]  ;;  %v2234_v33 = vld [vmem:[%s4965_s1 + $0x230] sm:$0xff] }
  0x1f   : > { %2947 = vmatprep.subr.bf16.mxu1 %v2946_v35  ;;  %5018 = vst [vmem:[#allocation2_spill] sm:$0xff] %v3416_v23  ;;  %v3430_v32 = vld [vmem:[%s3254_s20 + $0x48] sm:$0xff]  ;;  %v2235_v34 = vld [vmem:[%s4965_s1 + $0x238] sm:$0xff]  ;;  %v433_v39 = vld [vmem:[%s4965_s1 + $0x30] sm:$0xff]  ;;  %v328_v41 = vrot.slane %v3427_v31, 1 }
  0x20   : > { %2896 = vmatpush1.bf16.msra.mxu0 %v2895_v37  ;;  %v2969_v37 = vpack.c.bf16 %v432_v25, %v431_v24  ;;  %v3450_v38 = vsel %vm356_vm0, %v327_v27, %v343_v28  ;;  %v434_v40 = vld [vmem:[%s4965_s1 + $0x38] sm:$0xff]  ;;  %v3461_v44 = vld [vmem:[%s3254_s20 + $0x50] sm:$0xff]  ;;  %v2236_v46 = vld [vmem:[%s4965_s1 + $0x240] sm:$0xff] }
  0x21   : > { %2897 = vmatprep.subr.bf16.mxu0 %v4969_v3  ;;  %5020 = vst [vmem:[#allocation4_spill] sm:$0xff] %v3450_v38  ;;  %v3464_v45 = vld [vmem:[%s3254_s20 + $0x58] sm:$0xff]  ;;  %v2237_v47 = vld [vmem:[%s4965_s1 + $0x248] sm:$0xff]  ;;  %v435_v51 = vld [vmem:[%s4965_s1 + $0x40] sm:$0xff]  ;;  %v329_v53 = vrot.slane %v3461_v44, 1 }
  0x22   : > { %2949 = vmatpush3.bf16.msra.mxu1 %v2946_v35  ;;  %v3445_v35 = vsel %vm356_vm0, %v342_v13, %v326_v12  ;;  %v436_v52 = vld [vmem:[%s4965_s1 + $0x48] sm:$0xff]  ;;  %v3495_v58 = vld [vmem:[%s3254_s20 + $0x60] sm:$0xff]  ;;  %v2238_v61 = vld [vmem:[%s4965_s1 + $0x250] sm:$0xff] }
  0x23   : > { %2951 = vmatprep.subr.bf16.mxu1 %v2950_v42  ;;  %5019 = vst [vmem:[#allocation3_spill] sm:$0xff] %v3445_v35  ;;  %v3498_v59 = vld [vmem:[%s3254_s20 + $0x68] sm:$0xff]  ;;  %v2239_v62 = vld [vmem:[%s4965_s1 + $0x258] sm:$0xff]  ;;  %v2975_v0 = vpack.c.bf16 %v436_v52, %v435_v51  ;;  %v437_v5 = vld [vmem:[%s4965_s1 + $0x50] sm:$0xff] }
  0x24   : > { %2899 = vmatpush1.bf16.msra.mxu0 %v2898_v43  ;;  %v2916_v43 = vpack.c.bf16 %v2235_v34, %v2234_v33  ;;  %v438_v6 = vld [vmem:[%s4965_s1 + $0x58] sm:$0xff]  ;;  %v346_v10 = vrot.slane %v3498_v59, 1  ;;  %v2922_v11 = vpack.c.bf16 %v2239_v62, %v2238_v61  ;;  %v3529_v12 = vld [vmem:[%s3254_s20 + $0x70] sm:$0xff]  ;;  %v2241_v18 = vld [vmem:[%s4965_s1 + $0x268] sm:$0xff]  ;;  %v235_v61 = vrot.slane %v3276_v30, 7 }
  0x25   : > { %2900 = vmatprep.subr.bf16.mxu0 %v4969_v3  ;;  %v3532_v13 = vld [vmem:[%s3254_s20 + $0x78] sm:$0xff]  ;;  %v439_v25 = vld [vmem:[%s4965_s1 + $0x60] sm:$0xff]  ;;  %v3605_v62 = vld [vmem:[%s3254_s20 + $0x90] sm:$0xff] }
  0x26   : > { %2953 = vmatpush3.bf16.msra.mxu1 %v2950_v42  ;;  %v344_v42 = vrot.slane %v3430_v32, 1  ;;  %v3563_v34 = vld [vmem:[%s3254_s20 + $0x80] sm:$0xff]  ;;  %v442_v51 = vld [vmem:[%s4965_s1 + $0x78] sm:$0xff] }
  0x27   : > { %2955 = vmatprep.subr.bf16.mxu1 %v2954_v48  ;;  %v332_v52 = vrot.slane %v3563_v34, 1 }
  0x28   : > { %2902 = vmatpush1.bf16.msra.mxu0 %v2901_v49  ;;  %v2972_v49 = vpack.c.bf16 %v434_v40, %v433_v39  ;;  %v3484_v50 = vsel %vm356_vm0, %v328_v41, %v344_v42  ;;  %v3513_v63 = vsel %vm356_vm0, %v344_v42, %v328_v41  ;;  %v2242_v39 = vld [vmem:[%s4965_s1 + $0x270] sm:$0xff]  ;;  %v2243_v40 = vld [vmem:[%s4965_s1 + $0x278] sm:$0xff] }
  0x29   : > { %2903 = vmatprep.subr.bf16.mxu0 %v4969_v3  ;;  %5022 = vst [vmem:[#allocation6_spill] sm:$0xff] %v3484_v50  ;;  %5023 = vst [vmem:[#allocation7_spill] sm:$0xff] %v3513_v63 }
  0x2a   : > { %2957 = vmatpush3.bf16.msra.mxu1 %v2954_v48  ;;  %v3479_v48 = vsel %vm356_vm0, %v343_v28, %v327_v27  ;;  %v440_v27 = vld [vmem:[%s4965_s1 + $0x68] sm:$0xff]  ;;  %v331_v28 = vrot.slane %v3529_v12, 1 }
  0x2b   : > { %2959 = vmatprep.subr.bf16.mxu1 %v2958_v54  ;;  %5021 = vst [vmem:[#allocation5_spill] sm:$0xff] %v3479_v48  ;;  %v2981_v42 = vpack.c.bf16 %v440_v27, %v439_v25  ;;  %v333_v25 = vrot.slane %v3605_v62, 1 }
  0x2c   : > { %2905 = vmatpush1.bf16.msra.mxu0 %v2904_v55  ;;  %v2919_v55 = vpack.c.bf16 %v2237_v47, %v2236_v46  ;;  %v460_v46 = vld [vmem:[%s4965_s1 + $0x108] sm:$0xff] }
  0x2d   : > { %2906 = vmatprep.subr.bf16.mxu0 %v4969_v3 }
  0x2e   : > { %2961 = vmatpush3.bf16.msra.mxu1 %v2958_v54  ;;  %v345_v54 = vrot.slane %v3464_v45, 1 }
  0x2f   : > { %2962 = vmatprep.subr.bf16.mxu1 %v4969_v3 }
  0x30   : > { %2908 = vmatpush1.bf16.msra.mxu0 %v2907_v1  ;;  %v3518_v1 = vsel %vm356_vm0, %v329_v53, %v345_v54  ;;  %v3547_v19 = vsel %vm356_vm0, %v345_v54, %v329_v53  ;;  %v2928_v54 = vpack.c.bf16 %v2243_v40, %v2242_v39 }
  0x31   : > { %2675 = vmatmul.mubr.msk.f32.vlgmr.msra.gmra.mrb[0].mxu1 %vm2497_vm1, %v3377_v7  ;;  %2909 = vmatprep.subr.bf16.mxu0 %v4969_v3  ;;  %5024 = vst [vmem:[#allocation8_spill] sm:$0xff] %v3518_v1  ;;  %5025 = vst [vmem:[#allocation9_spill] sm:$0xff] %v3547_v19 }
  0x32   : > { %2964 = vmatpush1.bf16.msra.mxu1 %v2963_v8  ;;  %2677 = vmatprep.mubr.f32.mxu1 %v3382_v9  ;;  %v330_v8 = vrot.slane %v3495_v58, 1 }
  0x33   : > { %2965 = vmatprep.subr.bf16.mxu1 %v4969_v3 }
  0x34   : > { %2911 = vmatpush1.bf16.msra.mxu0 %v2910_v14  ;;  %v2240_v14 = vld [vmem:[%s4965_s1 + $0x260] sm:$0xff]  ;;  %v3552_v24 = vsel %vm356_vm0, %v330_v8, %v346_v10  ;;  %v3581_v41 = vsel %vm356_vm0, %v346_v10, %v330_v8  ;;  %v461_v10 = vld [vmem:[%s4965_s1 + $0x110] sm:$0xff] }
  0x35   : > { %2678 = vmatmul.mubr.msk.f32.gmra.mrb[2].mxu1 %vm2497_vm1, %v3411_v20  ;;  %2912 = vmatprep.subr.bf16.mxu0 %v4969_v3  ;;  %5026 = vst [vmem:[#allocation10_spill] sm:$0xff] %v3552_v24  ;;  %v2925_v33 = vpack.c.bf16 %v2241_v18, %v2240_v14  ;;  %5027 = vst [vmem:[#allocation11_spill] sm:$0xff] %v3581_v41  ;;  %v443_v18 = vld [vmem:[%s4965_s1 + $0x80] sm:$0xff] }
  0x36   : > { %2967 = vmatpush1.bf16.msra.mxu1 %v2966_v21  ;;  %2680 = vmatprep.mubr.f32.mxu1 %v3416_v23  ;;  %v2978_v21 = vpack.c.bf16 %v438_v6, %v437_v5  ;;  %v473_v23 = vld [vmem:[%s4965_s1 + $0x170] sm:$0xff] }
  0x37   : > { %2968 = vmatprep.subr.bf16.mxu1 %v4969_v3 }
  0x38   : > { %2914 = vmatpush1.bf16.msra.mxu0 %v2913_v29  ;;  %v347_v29 = vrot.slane %v3532_v13, 1 }
  0x39   : > { %2681 = vmatmul.mubr.msk.f32.gmra.mrb[4].mxu1 %vm2497_vm1, %v3445_v35  ;;  %2915 = vmatprep.subr.bf16.mxu0 %v4969_v3 }
  0x3a   : > { %2970 = vmatpush1.bf16.msra.mxu1 %v2969_v37  ;;  %2683 = vmatprep.mubr.f32.mxu1 %v3450_v38  ;;  %v3566_v37 = vld [vmem:[%s3254_s20 + $0x88] sm:$0xff]  ;;  %v3592_v47 = vsel %vm356_vm0, %v331_v28, %v347_v29  ;;  %v3618_v6 = vsel %vm356_vm0, %v347_v29, %v331_v28  ;;  %v3645_v29 = vld [vmem:[%s3254_s20 + $0xa0] sm:$0xff]  ;;  %v3855_v38 = vld [vmem:[%s3254_s20 + $0xf8] sm:$0xff] }
  0x3b   : > { %2971 = vmatprep.subr.bf16.mxu1 %v4969_v3  ;;  %5028 = vst [vmem:[#allocation12_spill] sm:$0xff] %v3592_v47  ;;  %v348_v53 = vrot.slane %v3566_v37, 1  ;;  %5029 = vst [vmem:[#allocation13_spill] sm:$0xff] %v3618_v6 }
  0x3c   : > { %2917 = vmatpush1.bf16.msra.mxu0 %v2916_v43  ;;  %v459_v43 = vld [vmem:[%s4965_s1 + $0x100] sm:$0xff] }
  0x3d   : > { %2684 = vmatmul.mubr.msk.f32.gmra.mrb[6].mxu1 %vm2497_vm1, %v3479_v48  ;;  %2918 = vmatprep.subr.bf16.mxu0 %v4969_v3  ;;  %v3010_v5 = vpack.c.bf16 %v460_v46, %v459_v43  ;;  %v3629_v14 = vsel %vm356_vm0, %v332_v52, %v348_v53  ;;  %v3656_v40 = vsel %vm356_vm0, %v348_v53, %v332_v52  ;;  %v463_v43 = vld [vmem:[%s4965_s1 + $0x120] sm:$0xff]  ;;  %v464_v46 = vld [vmem:[%s4965_s1 + $0x128] sm:$0xff]  ;;  %v446_v52 = vld [vmem:[%s4965_s1 + $0x98] sm:$0xff]  ;;  %v334_v53 = vrot.slane %v3645_v29, 1 }
  0x3e   : > { %2973 = vmatpush1.bf16.msra.mxu1 %v2972_v49  ;;  %2686 = vmatprep.mubr.f32.mxu1 %v3484_v50  ;;  %v441_v49 = vld [vmem:[%s4965_s1 + $0x70] sm:$0xff]  ;;  %5030 = vst [vmem:[#allocation14_spill] sm:$0xff] %v3629_v14  ;;  %5031 = vst [vmem:[#allocation15_spill] sm:$0xff] %v3656_v40  ;;  %v3018_v15 = vpack.c.bf16 %v464_v46, %v463_v43  ;;  %v5034_v43 = vmov 0.0|0.0  }
  0x3f   : > { %2974 = vmatprep.subr.bf16.mxu1 %v4969_v3  ;;  %v2984_v8 = vpack.c.bf16 %v442_v51, %v441_v49  ;;  %v445_v51 = vld [vmem:[%s4965_s1 + $0x90] sm:$0xff] }
  0x40   : > { %2920 = vmatpush1.bf16.msra.mxu0 %v2919_v55  ;;  %v219_v55 = vrot.slane %v3267_v26, 7  ;;  %v3852_v48 = vld [vmem:[%s3254_s20 + $0xf0] sm:$0xff] }
  0x41   : > { %2687 = vmatmul.mubr.msk.f32.gmra.mrb[8].mxu1 %vm2497_vm1, %v3513_v63  ;;  %2921 = vmatprep.subr.bf16.mxu0 %v4969_v3 }
  0x42   : > { %2976 = vmatpush1.bf16.msra.mxu1 %v2975_v0  ;;  %2689 = vmatprep.mubr.f32.mxu1 %v3518_v1  ;;  %v3608_v0 = vld [vmem:[%s3254_s20 + $0x98] sm:$0xff]  ;;  %v3642_v28 = vsel %vm251_vm2, %v235_v61, %v219_v55 }
  0x43   : > { %2977 = vmatprep.subr.bf16.mxu1 %v4969_v3  ;;  %v349_v27 = vrot.slane %v3608_v0, 1 }
  0x44   : > { %2923 = vmatpush1.bf16.msra.mxu0 %v2922_v11  ;;  %v462_v11 = vld [vmem:[%s4965_s1 + $0x118] sm:$0xff] }
  0x45   : > { %2690 = vmatmul.mubr.msk.f32.gmra.mrb[10].mxu1 %vm2497_vm1, %v3547_v19  ;;  %2924 = vmatprep.subr.bf16.mxu0 %v4969_v3  ;;  %v3014_v39 = vpack.c.bf16 %v462_v11, %v461_v10  ;;  %v3670_v49 = vsel %vm356_vm0, %v333_v25, %v349_v27  ;;  %v220_v10 = vrot.slane %v3336_v56, 7  ;;  %v236_v11 = vrot.slane %v3339_v57, 7 }
  0x46   : > { %2979 = vmatpush1.bf16.msra.mxu1 %v2978_v21  ;;  %2692 = vmatprep.mubr.f32.mxu1 %v3552_v24  ;;  %v444_v21 = vld [vmem:[%s4965_s1 + $0x88] sm:$0xff]  ;;  %5032 = vst [vmem:[#allocation16_spill] sm:$0xff] %v3670_v49  ;;  %v3773_v24 = vld [vmem:[%s3254_s20 + $0xd8] sm:$0xff] }
  0x47   : > { %2980 = vmatprep.subr.bf16.mxu1 %v4969_v3 }
  0x48   : > { %2926 = vmatpush1.bf16.msra.mxu0 %v2925_v33  ;;  %v3648_v33 = vld [vmem:[%s3254_s20 + $0xa8] sm:$0xff] }
  0x49   : > { %2693 = vmatmul.mubr.msk.f32.gmra.mrb[12].mxu1 %vm2497_vm1, %v3581_v41  ;;  %2927 = vmatprep.subr.bf16.mxu0 %v4969_v3  ;;  %v3770_v41 = vld [vmem:[%s3254_s20 + $0xd0] sm:$0xff] }
  0x4a   : > { %2982 = vmatpush1.bf16.msra.mxu1 %v2981_v42  ;;  %2695 = vmatprep.mubr.f32.mxu1 %v3592_v47  ;;  %v2987_v42 = vpack.c.bf16 %v444_v21, %v443_v18  ;;  %v3688_v18 = vld [vmem:[%s3254_s20 + $0xb0] sm:$0xff]  ;;  %v3691_v21 = vld [vmem:[%s3254_s20 + $0xb8] sm:$0xff] }
  0x4b   : > { %2983 = vmatprep.subr.bf16.mxu1 %v4969_v3  ;;  %v335_v46 = vrot.slane %v3688_v18, 1 }
  0x4c   : > { %2929 = vmatpush1.bf16.msra.mxu0 %v2928_v54  ;;  %v350_v54 = vrot.slane %v3648_v33, 1 }
  0x4d   : > { %2696 = vmatmul.mubr.msk.f32.gmra.mrb[14].mxu1 %vm2497_vm1, %v3618_v6  ;;  %3011 = vmatprep.subr.bf16.mxu0 %v3010_v5 }
  0x4e   : > { %2985 = vmatpush1.bf16.msra.mxu1 %v2984_v8  ;;  %2698 = vmatprep.mubr.f32.mxu1 %v3629_v14  ;;  %v3683_v8 = vsel %vm251_vm2, %v219_v55, %v235_v61  ;;  %v3699_v55 = vsel %vm356_vm0, %v349_v27, %v333_v25  ;;  %v2990_v61 = vpack.c.bf16 %v446_v52, %v445_v51  ;;  %v447_v25 = vld [vmem:[%s4965_s1 + $0xa0] sm:$0xff]  ;;  %v448_v27 = vld [vmem:[%s4965_s1 + $0xa8] sm:$0xff]  ;;  %v351_v51 = vrot.slane %v3691_v21, 1 }
  0x4f   : > { %2261 = vmatmul.mubr.msk.f32.vlgmr.msra.gmra.mrb[0].mxu0 %vm2496_vm3, %v3642_v28  ;;  %2986 = vmatprep.subr.bf16.mxu1 %v4969_v3  ;;  %5033 = vst [vmem:[#allocation17_spill] sm:$0xff] %v3699_v55  ;;  %v466_v3 = vld [vmem:[%s4965_s1 + $0x138] sm:$0xff]  ;;  %v3724_v52 = vsel %vm251_vm2, %v236_v11, %v220_v10  ;;  %v3738_v6 = vsel %vm356_vm0, %v350_v54, %v334_v53 }
  0x50   : > { %593 = vmatprep.mubr.f32.mxu0 %v3276_v30  ;;  %3013 = vmatpush3.bf16.msra.mxu0 %v3010_v5  ;;  %v465_v5 = vld [vmem:[%s4965_s1 + $0x130] sm:$0xff]  ;;  %5036 = vst [vmem:[#allocation19_spill] sm:$0xff] %v3738_v6  ;;  %v2993_v47 = vpack.c.bf16 %v448_v27, %v447_v25  ;;  %v3765_v25 = vsel %vm251_vm2, %v220_v10, %v236_v11  ;;  %v221_v27 = vrot.slane %v3360_v2, 7 }
  0x51   : > { %2699 = vmatmul.mubr.msk.f32.gmra.mrb[16].mxu1 %vm2497_vm1, %v3656_v40  ;;  %3015 = vmatprep.subr.bf16.mxu0 %v3014_v39  ;;  %v3730_v40 = vld [vmem:[%s3254_s20 + $0xc8] sm:$0xff]  ;;  %v3022_v14 = vpack.c.bf16 %v466_v3, %v465_v5  ;;  %v3752_v3 = vsel %vm356_vm0, %v335_v46, %v351_v51  ;;  %v3781_v10 = vsel %vm356_vm0, %v351_v51, %v335_v46  ;;  %v337_v51 = vrot.slane %v3770_v41, 1 }
  0x52   : > { %2988 = vmatpush1.bf16.msra.mxu1 %v2987_v42  ;;  %2701 = vmatprep.mubr.f32.mxu1 %v3670_v49  ;;  %v3711_v42 = vsel %vm356_vm0, %v334_v53, %v350_v54  ;;  %v3727_v49 = vld [vmem:[%s3254_s20 + $0xc0] sm:$0xff]  ;;  %5037 = vst [vmem:[#allocation20_spill] sm:$0xff] %v3752_v3  ;;  %v449_v53 = vld [vmem:[%s4965_s1 + $0xb0] sm:$0xff]  ;;  %v450_v54 = vld [vmem:[%s4965_s1 + $0xb8] sm:$0xff]  ;;  %v352_v5 = vrot.slane %v3730_v40, 1 }
  0x53   : > { %594 = vmatmul.mubr.f32.gmra.mrb[2].mxu0 %v3683_v8  ;;  %2989 = vmatprep.subr.bf16.mxu1 %v5034_v43  ;;  %5035 = vst [vmem:[#allocation18_spill] sm:$0xff] %v3711_v42  ;;  %5038 = vst [vmem:[#allocation21_spill] sm:$0xff] %v3781_v10  ;;  %v2996_v11 = vpack.c.bf16 %v450_v54, %v449_v53  ;;  %v452_v46 = vld [vmem:[%s4965_s1 + $0xc8] sm:$0xff]  ;;  %v3809_v54 = vld [vmem:[%s3254_s20 + $0xe0] sm:$0xff] }
  0x54   : > { %598 = vmatprep.mubr.f32.mxu0 %v3336_v56  ;;  %3017 = vmatpush3.bf16.msra.mxu0 %v3014_v39  ;;  %v467_v39 = vld [vmem:[%s4965_s1 + $0x140] sm:$0xff] }
  0x55   : > { %2702 = vmatmul.mubr.msk.f32.gmra.mrb[18].mxu1 %vm2497_vm1, %v3699_v55  ;;  %3019 = vmatprep.subr.bf16.mxu0 %v3018_v15  ;;  %v468_v55 = vld [vmem:[%s4965_s1 + $0x148] sm:$0xff] }
  0x56   : > { %2991 = vmatpush1.bf16.msra.mxu1 %v2990_v61  ;;  %2704 = vmatprep.mubr.f32.mxu1 %v3711_v42  ;;  %v336_v61 = vrot.slane %v3727_v49, 1  ;;  %v237_v42 = vrot.slane %v3363_v4, 7  ;;  %v3026_v19 = vpack.c.bf16 %v468_v55, %v467_v39  ;;  %v451_v55 = vld [vmem:[%s4965_s1 + $0xc0] sm:$0xff]  ;;  %v353_v39 = vrot.slane %v3773_v24, 1 }
  0x57   : > { %2263 = vmatmul.mubr.msk.f32.gmra.mrb[4].mxu0 %vm2496_vm3, %v3724_v52  ;;  %2992 = vmatprep.subr.bf16.mxu1 %v5034_v43  ;;  %v2999_v50 = vpack.c.bf16 %v452_v46, %v451_v55  ;;  %v222_v46 = vrot.slane %v3393_v16, 7 }
  0x58   : > { %603 = vmatprep.mubr.f32.mxu0 %v3339_v57  ;;  %3021 = vmatpush3.bf16.msra.mxu0 %v3018_v15  ;;  %v469_v15 = vld [vmem:[%s4965_s1 + $0x150] sm:$0xff]  ;;  %v3806_v53 = vsel %vm251_vm2, %v237_v42, %v221_v27  ;;  %v3820_v63 = vsel %vm356_vm0, %v352_v5, %v336_v61  ;;  %v3847_v55 = vsel %vm251_vm2, %v221_v27, %v237_v42 }
  0x59   : > { %2705 = vmatmul.mubr.msk.f32.gmra.mrb[20].mxu1 %vm2497_vm1, %v3738_v6  ;;  %3023 = vmatprep.subr.bf16.mxu0 %v3022_v14  ;;  %v470_v6 = vld [vmem:[%s4965_s1 + $0x158] sm:$0xff]  ;;  %5040 = vst [vmem:[#allocation23_spill] sm:$0xff] %v3820_v63  ;;  %v3863_v42 = vsel %vm356_vm0, %v353_v39, %v337_v51 }
  0x5a   : > { %2994 = vmatpush1.bf16.msra.mxu1 %v2993_v47  ;;  %2707 = vmatprep.mubr.f32.mxu1 %v3752_v3  ;;  %v3793_v47 = vsel %vm356_vm0, %v336_v61, %v352_v5  ;;  %v3812_v3 = vld [vmem:[%s3254_s20 + $0xe8] sm:$0xff]  ;;  %v3030_v1 = vpack.c.bf16 %v470_v6, %v469_v15  ;;  %v3834_v6 = vsel %vm356_vm0, %v337_v51, %v353_v39  ;;  %v453_v61 = vld [vmem:[%s4965_s1 + $0xd0] sm:$0xff]  ;;  %v454_v5 = vld [vmem:[%s4965_s1 + $0xd8] sm:$0xff]  ;;  %v339_v39 = vrot.slane %v3852_v48, 1 }
  0x5b   : > { %604 = vmatmul.mubr.f32.gmra.mrb[6].mxu0 %v3765_v25  ;;  %2995 = vmatprep.subr.bf16.mxu1 %v5034_v43  ;;  %5039 = vst [vmem:[#allocation22_spill] sm:$0xff] %v3793_v47  ;;  %5041 = vst [vmem:[#allocation24_spill] sm:$0xff] %v3834_v6  ;;  %v354_v15 = vrot.slane %v3812_v3, 1  ;;  %v3002_v27 = vpack.c.bf16 %v454_v5, %v453_v61  ;;  %v456_v51 = vld [vmem:[%s4965_s1 + $0xe8] sm:$0xff] }
  0x5c   : > { %608 = vmatprep.mubr.f32.mxu0 %v3360_v2  ;;  %3025 = vmatpush3.bf16.msra.mxu0 %v3022_v14  ;;  %v471_v14 = vld [vmem:[%s4965_s1 + $0x160] sm:$0xff] }
  0x5d   : > { %2708 = vmatmul.mubr.msk.f32.gmra.mrb[22].mxu1 %vm2497_vm1, %v3781_v10  ;;  %3027 = vmatprep.subr.bf16.mxu0 %v3026_v19  ;;  %v472_v10 = vld [vmem:[%s4965_s1 + $0x168] sm:$0xff] }
  0x5e   : > { %2997 = vmatpush1.bf16.msra.mxu1 %v2996_v11  ;;  %2710 = vmatprep.mubr.f32.mxu1 %v3793_v47  ;;  %v338_v11 = vrot.slane %v3809_v54, 1  ;;  %v238_v47 = vrot.slane %v3396_v17, 7  ;;  %v3034_v35 = vpack.c.bf16 %v472_v10, %v471_v14  ;;  %v455_v10 = vld [vmem:[%s4965_s1 + $0xe0] sm:$0xff]  ;;  %v355_v14 = vrot.slane %v3855_v38, 1 }
  0x5f   : > { %2265 = vmatmul.mubr.msk.f32.gmra.mrb[8].mxu0 %vm2496_vm3, %v3806_v53  ;;  %2998 = vmatprep.subr.bf16.mxu1 %v5034_v43 }
  0x60   : > { %613 = vmatprep.mubr.f32.mxu0 %v3363_v4  ;;  %3029 = vmatpush3.bf16.msra.mxu0 %v3026_v19  ;;  %v474_v19 = vld [vmem:[%s4965_s1 + $0x178] sm:$0xff]  ;;  %v3888_v61 = vsel %vm251_vm2, %v238_v47, %v222_v46 }
  0x61   : > { %2711 = vmatmul.mubr.msk.f32.gmra.mrb[24].mxu1 %vm2497_vm1, %v3820_v63  ;;  %3031 = vmatprep.subr.bf16.mxu0 %v3030_v1  ;;  %v3038_v5 = vpack.c.bf16 %v474_v19, %v473_v23  ;;  %v3005_v63 = vpack.c.bf16 %v456_v51, %v455_v10  ;;  %v457_v23 = vld [vmem:[%s4965_s1 + $0xf0] sm:$0xff]  ;;  %v239_v19 = vrot.slane %v3430_v32, 7  ;;  %v3925_v10 = vsel %vm356_vm0, %v355_v14, %v339_v39 }
  0x62   : > { %3000 = vmatpush1.bf16.msra.mxu1 %v2999_v50  ;;  %2713 = vmatprep.mubr.f32.mxu1 %v3834_v6  ;;  %v3875_v50 = vsel %vm356_vm0, %v338_v11, %v354_v15  ;;  %v3896_v6 = vsel %vm356_vm0, %v354_v15, %v338_v11  ;;  %v458_v11 = vld [vmem:[%s4965_s1 + $0xf8] sm:$0xff]  ;;  %v3915_v15 = vsel %vm251_vm2, %v222_v46, %v238_v47  ;;  %v2385_v47 = vld [vmem:[%s4965_s1 + $0x308] sm:$0xff]  ;;  %v2416_v46 = vld [vmem:[%s4965_s1 + $0x400] sm:$0xff] }
  0x63   : > { %614 = vmatmul.mubr.f32.gmra.mrb[10].mxu0 %v3847_v55  ;;  %3001 = vmatprep.subr.bf16.mxu1 %v5034_v43  ;;  %5042 = vst [vmem:[#allocation25_spill] sm:$0xff] %v3925_v10  ;;  %v3008_v51 = vpack.c.bf16 %v458_v11, %v457_v23 }
  0x64   : > { %618 = vmatprep.mubr.f32.mxu0 %v3393_v16  ;;  %3033 = vmatpush3.bf16.msra.mxu0 %v3030_v1  ;;  %v3904_v1 = vsel %vm356_vm0, %v339_v39, %v355_v14  ;;  %v2417_v39 = vld [vmem:[%s4965_s1 + $0x408] sm:$0xff]  ;;  %v3172_v14 = vmov 0.0  }
  0x65   : > { %2714 = vmatmul.mubr.msk.f32.gmra.mrb[26].mxu1 %vm2497_vm1, %v3863_v42  ;;  %3035 = vmatprep.subr.bf16.mxu0 %v3034_v35  ;;  %v3950_v11 = vpack.c.bf16 %v2417_v39, %v2416_v46  ;;  %v240_v46 = vrot.slane %v3464_v45, 7 }
  0x66   : > { %3003 = vmatpush1.bf16.msra.mxu1 %v3002_v27  ;;  %2716 = vmatprep.mubr.f32.mxu1 %v3875_v50  ;;  %v223_v27 = vrot.slane %v3427_v31, 7 }
  0x67   : > { %2267 = vmatmul.mubr.msk.f32.gmra.mrb[12].mxu0 %vm2496_vm3, %v3888_v61  ;;  %3004 = vmatprep.subr.bf16.mxu1 %v5034_v43 }
  0x68   : > { %623 = vmatprep.mubr.f32.mxu0 %v3396_v17  ;;  %3037 = vmatpush3.bf16.msra.mxu0 %v3034_v35  ;;  %v2384_v35 = vld [vmem:[%s4965_s1 + $0x300] sm:$0xff] }
  0x69   : > { %2717 = vmatmul.mubr.msk.f32.gmra.mrb[28].mxu1 %vm2497_vm1, %v3896_v6  ;;  %3039 = vmatprep.subr.bf16.mxu0 %v3038_v5  ;;  %v3043_v23 = vpack.c.bf16 %v2385_v47, %v2384_v35  ;;  %v3965_v35 = vsel %vm251_vm2, %v223_v27, %v239_v19  ;;  %v224_v47 = vrot.slane %v3461_v44, 7 }
  0x6a   : > { %3006 = vmatpush1.bf16.msra.mxu1 %v3005_v63  ;;  %2719 = vmatprep.mubr.f32.mxu1 %v3904_v1  ;;  %v3938_v63 = vsel %vm251_vm2, %v239_v19, %v223_v27  ;;  %v2388_v27 = vld [vmem:[%s4965_s1 + $0x320] sm:$0xff]  ;;  %v2389_v19 = vld [vmem:[%s4965_s1 + $0x328] sm:$0xff] }
  0x6b   : > { %624 = vmatmul.mubr.f32.gmra.mrb[14].mxu0 %v3915_v15  ;;  %3007 = vmatprep.subr.bf16.mxu1 %v5034_v43 }
  0x6c   : > { %628 = vmatprep.mubr.f32.mxu0 %v3427_v31  ;;  %3041 = vmatpush3.bf16.msra.mxu0 %v3038_v5  ;;  %v2386_v5 = vld [vmem:[%s4965_s1 + $0x310] sm:$0xff] }
  0x6d   : > { %2720 = vmatmul.mubr.msk.f32.gmra.mrb[30].mxu1 %vm2497_vm1, %v3925_v10  ;;  %3091 = vmatprep.subr.bf16.mxu0 %v3950_v11  ;;  %v2391_v10 = vld [vmem:[%s4965_s1 + $0x338] sm:$0xff] }
  0x6e   : > { %3009 = vmatpush1.bf16.msra.mxu1 %v3008_v51  ;;  %1038 = vmatprep.mubr.f32.mxu1 %v3172_v14  ;;  %v2387_v51 = vld [vmem:[%s4965_s1 + $0x318] sm:$0xff] }
  0x6f   : > { %2269 = vmatmul.mubr.msk.f32.gmra.mrb[16].mxu0 %vm2496_vm3, %v3938_v63  ;;  %3042 = vmatprep.subr.bf16.mxu1 %v5034_v43  ;;  %v3046_v39 = vpack.c.bf16 %v2387_v51, %v2386_v5  ;;  %v3049_v5 = vpack.c.bf16 %v2389_v19, %v2388_v27  ;;  %v2390_v51 = vld [vmem:[%s4965_s1 + $0x330] sm:$0xff]  ;;  %v241_v27 = vrot.slane %v3498_v59, 7 }
  0x70   : > { %633 = vmatprep.mubr.f32.mxu0 %v3430_v32  ;;  %v3052_v19 = vpack.c.bf16 %v2391_v10, %v2390_v51  ;;  %v2394_v10 = vld [vmem:[%s4965_s1 + $0x350] sm:$0xff]  ;;  %v242_v51 = vrot.slane %v3532_v13, 7 }
  0x71   : > { %1039 = vmatmul.mubr.f32.vlgmr.msra.gmra.mrb[32].mxu1 %v3172_v14 }
  0x72   : > { %3044 = vmatpush1.bf16.msra.mxu1 %v3043_v23  ;;  %1043 = vmatprep.mubr.f32.mxu1 %v3172_v14  ;;  %v3983_v23 = vsel %vm251_vm2, %v240_v46, %v224_v47 }
  0x73   : > { %634 = vmatmul.mubr.f32.gmra.mrb[18].mxu0 %v3965_v35  ;;  %3045 = vmatprep.subr.bf16.mxu1 %v5034_v43 }
  0x74   : > { %638 = vmatprep.mubr.f32.mxu0 %v3461_v44 }
  0x75   : > { %1044 = vmatmul.mubr.f32.gmra.mrb[34].mxu1 %v3172_v14 }
  0x76   : > { %1048 = vmatprep.mubr.f32.mxu1 %v3267_v26  ;;  %3047 = vmatpush1.bf16.msra.mxu1 %v3046_v39  ;;  %v4000_v26 = vsel %vm251_vm2, %v224_v47, %v240_v46  ;;  %v225_v39 = vrot.slane %v3495_v58, 7  ;;  %v2392_v47 = vld [vmem:[%s4965_s1 + $0x340] sm:$0xff]  ;;  %v2393_v46 = vld [vmem:[%s4965_s1 + $0x348] sm:$0xff] }
  0x77   : > { %2271 = vmatmul.mubr.msk.f32.gmra.mrb[20].mxu0 %vm2496_vm3, %v3983_v23  ;;  %3048 = vmatprep.subr.bf16.mxu1 %v5034_v43 }
  0x78   : > { %643 = vmatprep.mubr.f32.mxu0 %v3464_v45 }
  0x79   : > { %2325 = vmatmul.mubr.msk.f32.gmra.mrb[36].mxu1 %vm2496_vm3, %v3642_v28  ;;  %v4019_v28 = vsel %vm251_vm2, %v241_v27, %v225_v39 }
  0x7a   : > { %1053 = vmatprep.mubr.f32.mxu1 %v3276_v30  ;;  %3050 = vmatpush1.bf16.msra.mxu1 %v3049_v5  ;;  %v3055_v30 = vpack.c.bf16 %v2393_v46, %v2392_v47  ;;  %v2395_v5 = vld [vmem:[%s4965_s1 + $0x358] sm:$0xff]  ;;  %v2398_v46 = vld [vmem:[%s4965_s1 + $0x370] sm:$0xff] }
  0x7b   : > { %644 = vmatmul.mubr.f32.gmra.mrb[22].mxu0 %v4000_v26  ;;  %3051 = vmatprep.subr.bf16.mxu1 %v5034_v43 }
  0x7c   : > { %648 = vmatprep.mubr.f32.mxu0 %v3495_v58 }
  0x7d   : > { %1054 = vmatmul.mubr.f32.gmra.mrb[38].mxu1 %v3683_v8  ;;  %v226_v8 = vrot.slane %v3529_v12, 7 }
  0x7e   : > { %1058 = vmatprep.mubr.f32.mxu1 %v3336_v56  ;;  %3053 = vmatpush1.bf16.msra.mxu1 %v3052_v19  ;;  %v4036_v56 = vsel %vm251_vm2, %v225_v39, %v241_v27  ;;  %v3058_v19 = vpack.c.bf16 %v2395_v5, %v2394_v10  ;;  %v2396_v39 = vld [vmem:[%s4965_s1 + $0x360] sm:$0xff]  ;;  %v2397_v27 = vld [vmem:[%s4965_s1 + $0x368] sm:$0xff]  ;;  %v227_v10 = vrot.slane %v3563_v34, 7  ;;  %v243_v5 = vrot.slane %v3566_v37, 7 }
  0x7f   : > { %2273 = vmatmul.mubr.msk.f32.gmra.mrb[24].mxu0 %vm2496_vm3, %v4019_v28  ;;  %3054 = vmatprep.subr.bf16.mxu1 %v5034_v43  ;;  %v4055_v47 = vsel %vm251_vm2, %v242_v51, %v226_v8 }
  0x80   : > { %653 = vmatprep.mubr.f32.mxu0 %v3498_v59 }
  0x81   : > { %2327 = vmatmul.mubr.msk.f32.gmra.mrb[40].mxu1 %vm2496_vm3, %v3724_v52 }
  0x82   : > { %1063 = vmatprep.mubr.f32.mxu1 %v3339_v57  ;;  %3056 = vmatpush1.bf16.msra.mxu1 %v3055_v30  ;;  %v3061_v57 = vpack.c.bf16 %v2397_v27, %v2396_v39  ;;  %v2399_v30 = vld [vmem:[%s4965_s1 + $0x378] sm:$0xff]  ;;  %v4091_v39 = vsel %vm251_vm2, %v243_v5, %v227_v10  ;;  %v2402_v27 = vld [vmem:[%s4965_s1 + $0x390] sm:$0xff] }
  0x83   : > { %654 = vmatmul.mubr.f32.gmra.mrb[26].mxu0 %v4036_v56  ;;  %3057 = vmatprep.subr.bf16.mxu1 %v5034_v43 }
  0x84   : > { %658 = vmatprep.mubr.f32.mxu0 %v3529_v12 }
  0x85   : > { %1064 = vmatmul.mubr.f32.gmra.mrb[42].mxu1 %v3765_v25 }
  0x86   : > { %1068 = vmatprep.mubr.f32.mxu1 %v3360_v2  ;;  %3059 = vmatpush1.bf16.msra.mxu1 %v3058_v19  ;;  %v4072_v2 = vsel %vm251_vm2, %v226_v8, %v242_v51  ;;  %v3064_v19 = vpack.c.bf16 %v2399_v30, %v2398_v46  ;;  %v2400_v8 = vld [vmem:[%s4965_s1 + $0x380] sm:$0xff]  ;;  %v2401_v51 = vld [vmem:[%s4965_s1 + $0x388] sm:$0xff]  ;;  %v228_v46 = vrot.slane %v3605_v62, 7  ;;  %v244_v30 = vrot.slane %v3608_v0, 7 }
  0x87   : > { %2275 = vmatmul.mubr.msk.f32.gmra.mrb[28].mxu0 %vm2496_vm3, %v4055_v47  ;;  %3060 = vmatprep.subr.bf16.mxu1 %v5034_v43 }
  0x88   : > { %663 = vmatprep.mubr.f32.mxu0 %v3532_v13 }
  0x89   : > { %2329 = vmatmul.mubr.msk.f32.gmra.mrb[44].mxu1 %vm2496_vm3, %v3806_v53 }
  0x8a   : > { %1073 = vmatprep.mubr.f32.mxu1 %v3363_v4  ;;  %3062 = vmatpush1.bf16.msra.mxu1 %v3061_v57  ;;  %v3067_v4 = vpack.c.bf16 %v2401_v51, %v2400_v8  ;;  %v2403_v57 = vld [vmem:[%s4965_s1 + $0x398] sm:$0xff]  ;;  %v4127_v8 = vsel %vm251_vm2, %v244_v30, %v228_v46  ;;  %v2406_v51 = vld [vmem:[%s4965_s1 + $0x3b0] sm:$0xff] }
  0x8b   : > { %664 = vmatmul.mubr.f32.gmra.mrb[30].mxu0 %v4072_v2  ;;  %3063 = vmatprep.subr.bf16.mxu1 %v5034_v43 }
  0x8c   : > { %668 = vmatprep.mubr.f32.mxu0 %v3563_v34 }
  0x8d   : > { %1074 = vmatmul.mubr.f32.gmra.mrb[46].mxu1 %v3847_v55 }
  0x8e   : > { %1078 = vmatprep.mubr.f32.mxu1 %v3393_v16  ;;  %3065 = vmatpush1.bf16.msra.mxu1 %v3064_v19  ;;  %v4108_v16 = vsel %vm251_vm2, %v227_v10, %v243_v5  ;;  %v3070_v19 = vpack.c.bf16 %v2403_v57, %v2402_v27  ;;  %v2404_v10 = vld [vmem:[%s4965_s1 + $0x3a0] sm:$0xff]  ;;  %v2405_v5 = vld [vmem:[%s4965_s1 + $0x3a8] sm:$0xff]  ;;  %v229_v27 = vrot.slane %v3645_v29, 7  ;;  %v245_v57 = vrot.slane %v3648_v33, 7 }
  0x8f   : > { %2277 = vmatmul.mubr.msk.f32.gmra.mrb[32].mxu0 %vm2496_vm3, %v4091_v39  ;;  %3066 = vmatprep.subr.bf16.mxu1 %v5034_v43 }
  0x90   : > { %673 = vmatprep.mubr.f32.mxu0 %v3566_v37 }
  0x91   : > { %2331 = vmatmul.mubr.msk.f32.gmra.mrb[48].mxu1 %vm2496_vm3, %v3888_v61 }
  0x92   : > { %1083 = vmatprep.mubr.f32.mxu1 %v3396_v17  ;;  %3068 = vmatpush1.bf16.msra.mxu1 %v3067_v4  ;;  %v3073_v17 = vpack.c.bf16 %v2405_v5, %v2404_v10  ;;  %v2407_v4 = vld [vmem:[%s4965_s1 + $0x3b8] sm:$0xff]  ;;  %v4163_v10 = vsel %vm251_vm2, %v245_v57, %v229_v27  ;;  %v2410_v5 = vld [vmem:[%s4965_s1 + $0x3d0] sm:$0xff] }
  0x93   : > { %674 = vmatmul.mubr.f32.gmra.mrb[34].mxu0 %v4108_v16  ;;  %3069 = vmatprep.subr.bf16.mxu1 %v5034_v43 }
  0x94   : > { %678 = vmatprep.mubr.f32.mxu0 %v3605_v62 }
  0x95   : > { %1084 = vmatmul.mubr.f32.gmra.mrb[50].mxu1 %v3915_v15 }
  0x96   : > { %1088 = vmatprep.mubr.f32.mxu1 %v3427_v31  ;;  %3071 = vmatpush1.bf16.msra.mxu1 %v3070_v19  ;;  %v4144_v31 = vsel %vm251_vm2, %v228_v46, %v244_v30  ;;  %v3076_v19 = vpack.c.bf16 %v2407_v4, %v2406_v51  ;;  %v2408_v46 = vld [vmem:[%s4965_s1 + $0x3c0] sm:$0xff]  ;;  %v2409_v30 = vld [vmem:[%s4965_s1 + $0x3c8] sm:$0xff]  ;;  %v230_v51 = vrot.slane %v3688_v18, 7  ;;  %v246_v4 = vrot.slane %v3691_v21, 7 }
  0x97   : > { %2279 = vmatmul.mubr.msk.f32.gmra.mrb[36].mxu0 %vm2496_vm3, %v4127_v8  ;;  %3072 = vmatprep.subr.bf16.mxu1 %v5034_v43 }
  0x98   : > { %683 = vmatprep.mubr.f32.mxu0 %v3608_v0 }
  0x99   : > { %2333 = vmatmul.mubr.msk.f32.gmra.mrb[52].mxu1 %vm2496_vm3, %v3938_v63 }
  0x9a   : > { %1093 = vmatprep.mubr.f32.mxu1 %v3430_v32  ;;  %3074 = vmatpush1.bf16.msra.mxu1 %v3073_v17  ;;  %v3079_v32 = vpack.c.bf16 %v2409_v30, %v2408_v46  ;;  %v2411_v17 = vld [vmem:[%s4965_s1 + $0x3d8] sm:$0xff]  ;;  %v4199_v46 = vsel %vm251_vm2, %v246_v4, %v230_v51  ;;  %v2414_v30 = vld [vmem:[%s4965_s1 + $0x3f0] sm:$0xff] }
  0x9b   : > { %684 = vmatmul.mubr.f32.gmra.mrb[38].mxu0 %v4144_v31  ;;  %3075 = vmatprep.subr.bf16.mxu1 %v5034_v43 }
  0x9c   : > { %688 = vmatprep.mubr.f32.mxu0 %v3645_v29 }
  0x9d   : > { %1094 = vmatmul.mubr.f32.gmra.mrb[54].mxu1 %v3965_v35 }
  0x9e   : > { %1098 = vmatprep.mubr.f32.mxu1 %v3461_v44  ;;  %3077 = vmatpush1.bf16.msra.mxu1 %v3076_v19  ;;  %v4180_v44 = vsel %vm251_vm2, %v229_v27, %v245_v57  ;;  %v3082_v19 = vpack.c.bf16 %v2411_v17, %v2410_v5  ;;  %v2412_v27 = vld [vmem:[%s4965_s1 + $0x3e0] sm:$0xff]  ;;  %v2413_v57 = vld [vmem:[%s4965_s1 + $0x3e8] sm:$0xff]  ;;  %v231_v5 = vrot.slane %v3727_v49, 7  ;;  %v247_v17 = vrot.slane %v3730_v40, 7 }
  0x9f   : > { %2281 = vmatmul.mubr.msk.f32.gmra.mrb[40].mxu0 %vm2496_vm3, %v4163_v10  ;;  %3078 = vmatprep.subr.bf16.mxu1 %v5034_v43 }
  0xa0   : > { %693 = vmatprep.mubr.f32.mxu0 %v3648_v33 }
  0xa1   : > { %2335 = vmatmul.mubr.msk.f32.gmra.mrb[56].mxu1 %vm2496_vm3, %v3983_v23 }
  0xa2   : > { %1103 = vmatprep.mubr.f32.mxu1 %v3464_v45  ;;  %3080 = vmatpush1.bf16.msra.mxu1 %v3079_v32  ;;  %v3085_v45 = vpack.c.bf16 %v2413_v57, %v2412_v27  ;;  %v2415_v32 = vld [vmem:[%s4965_s1 + $0x3f8] sm:$0xff]  ;;  %v233_v27 = vrot.slane %v3809_v54, 7  ;;  %v249_v57 = vrot.slane %v3812_v3, 7 }
  0xa3   : > { %694 = vmatmul.mubr.f32.gmra.mrb[42].mxu0 %v4180_v44  ;;  %3081 = vmatprep.subr.bf16.mxu1 %v5034_v43 }
  0xa4   : > { %698 = vmatprep.mubr.f32.mxu0 %v3688_v18 }
  0xa5   : > { %1104 = vmatmul.mubr.f32.gmra.mrb[58].mxu1 %v4000_v26 }
  0xa6   : > { %1108 = vmatprep.mubr.f32.mxu1 %v3495_v58  ;;  %3083 = vmatpush1.bf16.msra.mxu1 %v3082_v19  ;;  %v4216_v58 = vsel %vm251_vm2, %v230_v51, %v246_v4  ;;  %v3088_v19 = vpack.c.bf16 %v2415_v32, %v2414_v30  ;;  %v4229_v51 = vsel %vm251_vm2, %v247_v17, %v231_v5  ;;  %v248_v4 = vrot.slane %v3773_v24, 7  ;;  %v2421_v32 = vld [vmem:[%s4965_s1 + $0x428] sm:$0xff] }
  0xa7   : > { %2283 = vmatmul.mubr.msk.f32.gmra.mrb[44].mxu0 %vm2496_vm3, %v4199_v46  ;;  %3084 = vmatprep.subr.bf16.mxu1 %v5034_v43  ;;  %v250_v30 = vrot.slane %v3855_v38, 7 }
  0xa8   : > { %703 = vmatprep.mubr.f32.mxu0 %v3691_v21 }
  0xa9   : > { %2337 = vmatmul.mubr.msk.f32.gmra.mrb[60].mxu1 %vm2496_vm3, %v4019_v28 }
  0xaa   : > { %1113 = vmatprep.mubr.f32.mxu1 %v3498_v59  ;;  %3086 = vmatpush1.bf16.msra.mxu1 %v3085_v45  ;;  %v4239_v59 = vsel %vm251_vm2, %v231_v5, %v247_v17  ;;  %v234_v45 = vrot.slane %v3852_v48, 7  ;;  %v2422_v5 = vld [vmem:[%s4965_s1 + $0x430] sm:$0xff]  ;;  %v2423_v17 = vld [vmem:[%s4965_s1 + $0x438] sm:$0xff] }
  0xab   : > { %704 = vmatmul.mubr.f32.gmra.mrb[46].mxu0 %v4216_v58  ;;  %3087 = vmatprep.subr.bf16.mxu1 %v5034_v43  ;;  %v232_v43 = vrot.slane %v3770_v41, 7 }
  0xac   : > { %708 = vmatprep.mubr.f32.mxu0 %v3727_v49 }
  0xad   : > { %1114 = vmatmul.mubr.f32.gmra.mrb[62].mxu1 %v4036_v56 }
  0xae   : > { %1118 = vmatprep.mubr.f32.mxu1 %v3529_v12  ;;  %3089 = vmatpush1.bf16.msra.mxu1 %v3088_v19  ;;  %v4251_v12 = vsel %vm251_vm2, %v248_v4, %v232_v43  ;;  %v2426_v19 = vld [vmem:[%s4965_s1 + $0x450] sm:$0xff] }
  0xaf   : > { %2285 = vmatmul.mubr.msk.f32.gmra.mrb[48].mxu0 %vm2496_vm3, %v4229_v51 }
  0xb0   : > { %713 = vmatprep.mubr.f32.mxu0 %v3730_v40 }
  0xb1   : > { %2339 = vmatmul.mubr.msk.f32.gmra.mrb[64].mxu1 %vm2496_vm3, %v4055_v47 }
  0xb2   : > { %1123 = vmatprep.mubr.f32.mxu1 %v3532_v13  ;;  %v4261_v13 = vsel %vm251_vm2, %v232_v43, %v248_v4  ;;  %v2427_v43 = vld [vmem:[%s4965_s1 + $0x458] sm:$0xff]  ;;  %v5044_v4 = vld [vmem:[#allocation3_spill] sm:$0xff] }
  0xb3   : > { %714 = vmatmul.mubr.f32.gmra.mrb[50].mxu0 %v4239_v59 }
  0xb4   : > { %718 = vmatprep.mubr.f32.mxu0 %v3770_v41 }
  0xb5   : > { %1124 = vmatmul.mubr.f32.gmra.mrb[66].mxu1 %v4072_v2 }
  0xb6   : > { %1128 = vmatprep.mubr.f32.mxu1 %v3563_v34  ;;  %v4273_v34 = vsel %vm251_vm2, %v249_v57, %v233_v27 }
  0xb7   : > { %2287 = vmatmul.mubr.msk.f32.gmra.mrb[52].mxu0 %vm2496_vm3, %v4251_v12 }
  0xb8   : > { %723 = vmatprep.mubr.f32.mxu0 %v3773_v24 }
  0xb9   : > { %2341 = vmatmul.mubr.msk.f32.gmra.mrb[68].mxu1 %vm2496_vm3, %v4091_v39 }
  0xba   : > { %1133 = vmatprep.mubr.f32.mxu1 %v3566_v37  ;;  %v4283_v37 = vsel %vm251_vm2, %v233_v27, %v249_v57  ;;  %v5045_v27 = vld [vmem:[#allocation4_spill] sm:$0xff]  ;;  %v3110_v57 = vpack.c.bf16 %v2427_v43, %v2426_v19  ;;  %v3135_v43 = vld [vmem:[%s3254_s20 + $0x20] sm:$0xff] }
  0xbb   : > { %724 = vmatmul.mubr.f32.gmra.mrb[54].mxu0 %v4261_v13  ;;  %v5057_v19 = vld [vmem:[#allocation16_spill] sm:$0xff] }
  0xbc   : > { %728 = vmatprep.mubr.f32.mxu0 %v3809_v54 }
  0xbd   : > { %1134 = vmatmul.mubr.f32.gmra.mrb[70].mxu1 %v4108_v16 }
  0xbe   : > { %1138 = vmatprep.mubr.f32.mxu1 %v3605_v62  ;;  %v4295_v62 = vsel %vm251_vm2, %v250_v30, %v234_v45 }
  0xbf   : > { %2289 = vmatmul.mubr.msk.f32.gmra.mrb[56].mxu0 %vm2496_vm3, %v4273_v34 }
  0xc0   : > { %733 = vmatprep.mubr.f32.mxu0 %v3812_v3 }
  0xc1   : > { %2343 = vmatmul.mubr.msk.f32.gmra.mrb[72].mxu1 %vm2496_vm3, %v4127_v8 }
  0xc2   : > { %1143 = vmatprep.mubr.f32.mxu1 %v3608_v0  ;;  %v4305_v0 = vsel %vm251_vm2, %v234_v45, %v250_v30  ;;  %v2429_v45 = vld [vmem:[%s4965_s1 + $0x468] sm:$0xff]  ;;  %v5046_v30 = vld [vmem:[#allocation5_spill] sm:$0xff] }
  0xc3   : > { %734 = vmatmul.mubr.f32.gmra.mrb[58].mxu0 %v4283_v37 }
  0xc4   : > { %738 = vmatprep.mubr.f32.mxu0 %v3852_v48  ;;  %v2418_v48 = vld [vmem:[%s4965_s1 + $0x410] sm:$0xff] }
  0xc5   : > { %1144 = vmatmul.mubr.f32.gmra.mrb[74].mxu1 %v4144_v31 }
  0xc6   : > { %1148 = vmatprep.mubr.f32.mxu1 %v3645_v29  ;;  %v2419_v29 = vld [vmem:[%s4965_s1 + $0x418] sm:$0xff] }
  0xc7   : > { %2291 = vmatmul.mubr.msk.f32.gmra.mrb[60].mxu0 %vm2496_vm3, %v4295_v62 }
  0xc8   : > { %743 = vmatprep.mubr.f32.mxu0 %v3855_v38  ;;  %v3094_v38 = vpack.c.bf16 %v2419_v29, %v2418_v48  ;;  %v5047_v48 = vld [vmem:[#allocation6_spill] sm:$0xff]  ;;  %v2430_v29 = vld [vmem:[%s4965_s1 + $0x470] sm:$0xff] }
  0xc9   : > { %2345 = vmatmul.mubr.msk.f32.gmra.mrb[76].mxu1 %vm2496_vm3, %v4163_v10 }
  0xca   : > { %1153 = vmatprep.mubr.f32.mxu1 %v3648_v33  ;;  %v2420_v33 = vld [vmem:[%s4965_s1 + $0x420] sm:$0xff] }
  0xcb   : > { %744 = vmatmul.mubr.f32.gmra.mrb[62].mxu0 %v4305_v0 }
  0xcc   : > { %2754 = vmatprep.mubr.f32.mxu0 %v3172_v14 }
  0xcd   : > { %1154 = vmatmul.mubr.f32.gmra.mrb[78].mxu1 %v4180_v44 }
  0xce   : > { %1158 = vmatprep.mubr.f32.mxu1 %v3688_v18  ;;  %v3098_v18 = vpack.c.bf16 %v2421_v32, %v2420_v33  ;;  %v5048_v33 = vld [vmem:[#allocation7_spill] sm:$0xff]  ;;  %v5049_v32 = vld [vmem:[#allocation8_spill] sm:$0xff] }
  0xcf   : > { %2755 = vmatmul.mubr.f32.vlgmr.msra.gmra.mrb[64].mxu0 %v3172_v14 }
  0xd0   : > { %2757 = vmatprep.mubr.f32.mxu0 %v3293_v36  ;;  %3093 = vmatpush3.bf16.msra.mxu0 %v3950_v11  ;;  %v3102_v36 = vpack.c.bf16 %v2423_v17, %v2422_v5  ;;  %v2425_v11 = vld [vmem:[%s4965_s1 + $0x448] sm:$0xff]  ;;  %v5051_v5 = vld [vmem:[#allocation10_spill] sm:$0xff] }
  0xd1   : > { %2347 = vmatmul.mubr.msk.f32.gmra.mrb[80].mxu1 %vm2496_vm3, %v4199_v46  ;;  %3095 = vmatprep.subr.bf16.mxu0 %v3094_v38  ;;  %v5052_v17 = vld [vmem:[#allocation11_spill] sm:$0xff] }
  0xd2   : > { %1163 = vmatprep.mubr.f32.mxu1 %v3691_v21  ;;  %v2424_v21 = vld [vmem:[%s4965_s1 + $0x440] sm:$0xff] }
  0xd3   : > { %2758 = vmatmul.mubr.msk.f32.gmra.mrb[66].mxu0 %vm2497_vm1, %v3377_v7  ;;  %v5043_v7 = vld [vmem:[#allocation2_spill] sm:$0xff] }
  0xd4   : > { %2760 = vmatprep.mubr.f32.mxu0 %v3382_v9  ;;  %3097 = vmatpush3.bf16.msra.mxu0 %v3094_v38  ;;  %v2431_v38 = vld [vmem:[%s4965_s1 + $0x478] sm:$0xff] }
  0xd5   : > { %1164 = vmatmul.mubr.f32.gmra.mrb[82].mxu1 %v4216_v58  ;;  %3099 = vmatprep.subr.bf16.mxu0 %v3098_v18 }
  0xd6   : > { %1168 = vmatprep.mubr.f32.mxu1 %v3727_v49  ;;  %v3106_v49 = vpack.c.bf16 %v2425_v11, %v2424_v21  ;;  %v5054_v21 = vld [vmem:[#allocation13_spill] sm:$0xff]  ;;  %v5055_v11 = vld [vmem:[#allocation14_spill] sm:$0xff] }
  0xd7   : > { %2761 = vmatmul.mubr.msk.f32.gmra.mrb[68].mxu0 %vm2497_vm1, %v3411_v20 }
  0xd8   : > { %2763 = vmatprep.mubr.f32.mxu0 %v5043_v7  ;;  %3101 = vmatpush3.bf16.msra.mxu0 %v3098_v18  ;;  %v5050_v18 = vld [vmem:[#allocation9_spill] sm:$0xff] }
  0xd9   : > { %2349 = vmatmul.mubr.msk.f32.gmra.mrb[84].mxu1 %vm2496_vm3, %v4229_v51  ;;  %3103 = vmatprep.subr.bf16.mxu0 %v3102_v36 }
  0xda   : > { %1173 = vmatprep.mubr.f32.mxu1 %v3730_v40  ;;  %v2428_v40 = vld [vmem:[%s4965_s1 + $0x460] sm:$0xff] }
  0xdb   : > { %2764 = vmatmul.mubr.msk.f32.gmra.mrb[70].mxu0 %vm2497_vm1, %v5044_v4 }
  0xdc   : > { %2766 = vmatprep.mubr.f32.mxu0 %v5045_v27  ;;  %3105 = vmatpush3.bf16.msra.mxu0 %v3102_v36  ;;  %v3133_v36 = vld [vmem:[%s3254_s20 + $0x10] sm:$0xff] }
  0xdd   : > { %1174 = vmatmul.mubr.f32.gmra.mrb[86].mxu1 %v4239_v59  ;;  %3107 = vmatprep.subr.bf16.mxu0 %v3106_v49 }
  0xde   : > { %1178 = vmatprep.mubr.f32.mxu1 %v3770_v41  ;;  %v3114_v41 = vpack.c.bf16 %v2429_v45, %v2428_v40  ;;  %v5059_v40 = vld [vmem:[#allocation18_spill] sm:$0xff]  ;;  %v5060_v45 = vld [vmem:[#allocation19_spill] sm:$0xff] }
  0xdf   : > { %2767 = vmatmul.mubr.msk.f32.gmra.mrb[72].mxu0 %vm2497_vm1, %v5046_v30 }
  0xe0   : > { %2769 = vmatprep.mubr.f32.mxu0 %v5047_v48  ;;  %3109 = vmatpush3.bf16.msra.mxu0 %v3106_v49  ;;  %v5056_v49 = vld [vmem:[#allocation15_spill] sm:$0xff] }
  0xe1   : > { %2351 = vmatmul.mubr.msk.f32.gmra.mrb[88].mxu1 %vm2496_vm3, %v4251_v12  ;;  %3111 = vmatprep.subr.bf16.mxu0 %v3110_v57 }
  0xe2   : > { %1183 = vmatprep.mubr.f32.mxu1 %v3773_v24  ;;  %v3118_v24 = vpack.c.bf16 %v2431_v38, %v2430_v29  ;;  %v5062_v29 = vld [vmem:[#allocation21_spill] sm:$0xff]  ;;  %v5063_v38 = vld [vmem:[#allocation22_spill] sm:$0xff] }
  0xe3   : > { %2770 = vmatmul.mubr.msk.f32.gmra.mrb[74].mxu0 %vm2497_vm1, %v5048_v33 }
  0xe4   : > { %2772 = vmatprep.mubr.f32.mxu0 %v5049_v32  ;;  %3113 = vmatpush3.bf16.msra.mxu0 %v3110_v57  ;;  %v5058_v57 = vld [vmem:[#allocation17_spill] sm:$0xff] }
  0xe5   : > { %1184 = vmatmul.mubr.f32.gmra.mrb[90].mxu1 %v4261_v13  ;;  %3115 = vmatprep.subr.bf16.mxu0 %v3114_v41 }
  0xe6   : > { %1188 = vmatprep.mubr.f32.mxu1 %v3809_v54  ;;  %v5053_v54 = vld [vmem:[#allocation12_spill] sm:$0xff] }
  0xe7   : > { %2773 = vmatmul.mubr.msk.f32.gmra.mrb[76].mxu0 %vm2497_vm1, %v5050_v18 }
  0xe8   : > { %2775 = vmatprep.mubr.f32.mxu0 %v5051_v5  ;;  %3117 = vmatpush3.bf16.msra.mxu0 %v3114_v41  ;;  %v3137_v41 = vld [vmem:[%s3254_s20 + $0x30] sm:$0xff] }
  0xe9   : > { %2353 = vmatmul.mubr.msk.f32.gmra.mrb[92].mxu1 %vm2496_vm3, %v4273_v34  ;;  %3119 = vmatprep.subr.bf16.mxu0 %v3118_v24 }
  0xea   : > { %1193 = vmatprep.mubr.f32.mxu1 %v3812_v3  ;;  %v3134_v3 = vld [vmem:[%s3254_s20 + $0x18] sm:$0xff] }
  0xeb   : > { %2776 = vmatmul.mubr.msk.f32.gmra.mrb[78].mxu0 %vm2497_vm1, %v5052_v17 }
  0xec   : > { %2778 = vmatprep.mubr.f32.mxu0 %v5053_v54  ;;  %3121 = vmatpush3.bf16.msra.mxu0 %v3118_v24  ;;  %v5064_v24 = vld [vmem:[#allocation23_spill] sm:$0xff] }
  0xed   : > { %1194 = vmatmul.mubr.f32.gmra.mrb[94].mxu1 %v4283_v37 }
  0xee   : > { %1537 = vmatprep.mubr.f32.mxu1 %v3133_v36  ;;  %v5065_v36 = vld [vmem:[#allocation24_spill] sm:$0xff] }
  0xef   : > { %2779 = vmatmul.mubr.msk.f32.gmra.mrb[80].mxu0 %vm2497_vm1, %v5054_v21 }
  0xf0   : > { %2781 = vmatprep.mubr.f32.mxu0 %v5055_v11 }
  0xf1   : > { %2433 = vmatmul.mubr.msk.f32.vlgmr.msra.gmra.mrb[96].mxu1 %vm2496_vm3, %v3724_v52  ;;  %v3136_v52 = vld [vmem:[%s3254_s20 + $0x28] sm:$0xff] }
  0xf2   : > { %1542 = vmatprep.mubr.f32.mxu1 %v3134_v3 }
  0xf3   : > { %2782 = vmatmul.mubr.msk.f32.gmra.mrb[82].mxu0 %vm2497_vm1, %v5056_v49 }
  0xf4   : > { %2784 = vmatprep.mubr.f32.mxu0 %v5057_v19 }
  0xf5   : > { %1543 = vmatmul.mubr.f32.gmra.mrb[98].mxu1 %v3765_v25  ;;  %v5061_v25 = vld [vmem:[#allocation20_spill] sm:$0xff] }
  0xf6   : > { %1547 = vmatprep.mubr.f32.mxu1 %v3135_v43  ;;  %v3139_v43 = vld [vmem:[%s3254_s20 + $0x40] sm:$0xff] }
  0xf7   : > { %2785 = vmatmul.mubr.msk.f32.gmra.mrb[84].mxu0 %vm2497_vm1, %v5058_v57 }
  0xf8   : > { %2787 = vmatprep.mubr.f32.mxu0 %v5059_v40 }
  0xf9   : > { %2435 = vmatmul.mubr.msk.f32.gmra.mrb[100].mxu1 %vm2496_vm3, %v3806_v53  ;;  %v3138_v53 = vld [vmem:[%s3254_s20 + $0x38] sm:$0xff] }
  0xfa   : > { %1552 = vmatprep.mubr.f32.mxu1 %v3136_v52 }
  0xfb   : > { %2788 = vmatmul.mubr.msk.f32.gmra.mrb[86].mxu0 %vm2497_vm1, %v5060_v45 }
  0xfc   : > { %2790 = vmatprep.mubr.f32.mxu0 %v5061_v25 }
  0xfd   : > { %1553 = vmatmul.mubr.f32.gmra.mrb[102].mxu1 %v3847_v55 }
  0xfe   : > { %1557 = vmatprep.mubr.f32.mxu1 %v3137_v41  ;;  %v3140_v41 = vld [vmem:[%s3254_s20 + $0x48] sm:$0xff] }
  0xff   : > { %2791 = vmatmul.mubr.msk.f32.gmra.mrb[88].mxu0 %vm2497_vm1, %v5062_v29 }
 0x100   : > { %2793 = vmatprep.mubr.f32.mxu0 %v5063_v38 }
 0x101   : > { %2437 = vmatmul.mubr.msk.f32.gmra.mrb[104].mxu1 %vm2496_vm3, %v3888_v61 }
 0x102   : > { %1562 = vmatprep.mubr.f32.mxu1 %v3138_v53 }
 0x103   : > { %2794 = vmatmul.mubr.msk.f32.gmra.mrb[90].mxu0 %vm2497_vm1, %v5064_v24 }
 0x104   : > { %v4451_v55 = vpop.f32.mrb[0].mxu1  ;;  %2796 = vmatprep.mubr.f32.mxu0 %v5065_v36 }
 0x105   : > { %v815_v3 = vpop.f32.mrb[1].mxu1  ;;  %1563 = vmatmul.mubr.f32.gmra.mrb[106].mxu1 %v3915_v15 }
 0x106   : > { %1567 = vmatprep.mubr.f32.mxu1 %v3139_v43  ;;  %v3141_v43 = vld [vmem:[%s3254_s20 + $0x50] sm:$0xff] }
 0x107   : > { %2797 = vmatmul.mubr.msk.f32.gmra.mrb[92].mxu0 %vm2497_vm1, %v3863_v42 }
 0x108   : > { %v4459_v61 = vpop.f32.mrb[2].mxu1  ;;  %2799 = vmatprep.mubr.f32.mxu0 %v3875_v50 }
 0x109   : > { %v4462_v52 = vpop.f32.mrb[3].mxu1  ;;  %2439 = vmatmul.mubr.msk.f32.gmra.mrb[108].mxu1 %vm2496_vm3, %v3938_v63 }
 0x10a   : > { %1572 = vmatprep.mubr.f32.mxu1 %v3140_v41 }
 0x10b   : > { %2800 = vmatmul.mubr.msk.f32.gmra.mrb[94].mxu0 %vm2497_vm1, %v3896_v6 }
 0x10c   : > { %v4471_v15 = vpop.f32.mrb[4].mxu1  ;;  %2834 = vmatprep.mubr.f32.mxu0 %v3382_v9  ;;  %v3142_v9 = vld [vmem:[%s3254_s20 + $0x58] sm:$0xff] }
 0x10d   : > { %v4474_v53 = vpop.f32.mrb[5].mxu1  ;;  %1573 = vmatmul.mubr.f32.gmra.mrb[110].mxu1 %v3965_v35 }
 0x10e   : > { %1577 = vmatprep.mubr.f32.mxu1 %v3141_v43  ;;  %v3146_v43 = vld [vmem:[%s3254_s20 + $0x78] sm:$0xff] }
 0x10f   : > { %2835 = vmatmul.mubr.msk.f32.vlgmr.msra.gmra.mrb[96].mxu0 %vm2497_vm1, %v3411_v20 }
 0x110   : > { %v4481_v63 = vpop.f32.mrb[6].mxu1  ;;  %2837 = vmatprep.mubr.f32.mxu0 %v5043_v7  ;;  %v3143_v7 = vld [vmem:[%s3254_s20 + $0x60] sm:$0xff] }
 0x111   : > { %v4484_v41 = vpop.f32.mrb[7].mxu1  ;;  %2441 = vmatmul.mubr.msk.f32.gmra.mrb[112].mxu1 %vm2496_vm3, %v3983_v23 }
 0x112   : > { %1582 = vmatprep.mubr.f32.mxu1 %v3142_v9 }
 0x113   : > { %2838 = vmatmul.mubr.msk.f32.gmra.mrb[98].mxu0 %vm2497_vm1, %v5044_v4 }
 0x114   : > { %v4493_v35 = vpop.f32.mrb[8].mxu1  ;;  %2840 = vmatprep.mubr.f32.mxu0 %v5045_v27  ;;  %v3144_v27 = vld [vmem:[%s3254_s20 + $0x68] sm:$0xff] }
 0x115   : > { %v4496_v20 = vpop.f32.mrb[9].mxu1  ;;  %1583 = vmatmul.mubr.f32.gmra.mrb[114].mxu1 %v4000_v26 }
 0x116   : > { %1587 = vmatprep.mubr.f32.mxu1 %v3143_v7  ;;  %v3147_v7 = vld [vmem:[%s3254_s20 + $0x80] sm:$0xff] }
 0x117   : > { %2841 = vmatmul.mubr.msk.f32.gmra.mrb[100].mxu0 %vm2497_vm1, %v5046_v30 }
 0x118   : > { %v4503_v23 = vpop.f32.mrb[10].mxu1  ;;  %2843 = vmatprep.mubr.f32.mxu0 %v5047_v48  ;;  %v3145_v48 = vld [vmem:[%s3254_s20 + $0x70] sm:$0xff] }
 0x119   : > { %v4506_v4 = vpop.f32.mrb[11].mxu1  ;;  %2443 = vmatmul.mubr.msk.f32.gmra.mrb[116].mxu1 %vm2496_vm3, %v4019_v28 }
 0x11a   : > { %1592 = vmatprep.mubr.f32.mxu1 %v3144_v27 }
 0x11b   : > { %2844 = vmatmul.mubr.msk.f32.gmra.mrb[102].mxu0 %vm2497_vm1, %v5048_v33 }
 0x11c   : > { %v4515_v26 = vpop.f32.mrb[12].mxu1  ;;  %2846 = vmatprep.mubr.f32.mxu0 %v5049_v32 }
 0x11d   : > { %v4518_v30 = vpop.f32.mrb[13].mxu1  ;;  %1593 = vmatmul.mubr.f32.gmra.mrb[118].mxu1 %v4036_v56 }
 0x11e   : > { %1597 = vmatprep.mubr.f32.mxu1 %v3145_v48  ;;  %v3148_v48 = vld [vmem:[%s3254_s20 + $0x88] sm:$0xff] }
 0x11f   : > { %2847 = vmatmul.mubr.msk.f32.gmra.mrb[104].mxu0 %vm2497_vm1, %v5050_v18 }
 0x120   : > { %v4525_v28 = vpop.f32.mrb[14].mxu1  ;;  %2849 = vmatprep.mubr.f32.mxu0 %v5051_v5 }
 0x121   : > { %v4528_v33 = vpop.f32.mrb[15].mxu1  ;;  %2445 = vmatmul.mubr.msk.f32.gmra.mrb[120].mxu1 %vm2496_vm3, %v4055_v47 }
 0x122   : > { %v590_v32 = vpop.f32.mrb[0].mxu0  ;;  %1602 = vmatprep.mubr.f32.mxu1 %v3146_v43  ;;  %v3149_v43 = vld [vmem:[%s3254_s20 + $0x90] sm:$0xff] }
 0x123   : > { %v4534_v56 = vadd.f32 %v815_v3, %v590_v32  ;;  %2850 = vmatmul.mubr.msk.f32.gmra.mrb[106].mxu0 %vm2497_vm1, %v5052_v17  ;;  %v592_v18 = vpop.f32.mrb[1].mxu0 }
 0x124   : > { %v4539_v9 = vpop.f32.mrb[16].mxu1  ;;  %2852 = vmatprep.mubr.f32.mxu0 %v5053_v54 }
 0x125   : > { %v4542_v5 = vpop.f32.mrb[17].mxu1  ;;  %1603 = vmatmul.mubr.f32.gmra.mrb[122].mxu1 %v4072_v2 }
 0x126   : > { %v595_v47 = vpop.f32.mrb[2].mxu0  ;;  %1607 = vmatprep.mubr.f32.mxu1 %v3147_v7 }
 0x127   : > { %v4547_v3 = vadd.f32 %v4451_v55, %v595_v47  ;;  %2853 = vmatmul.mubr.msk.f32.gmra.mrb[108].mxu0 %vm2497_vm1, %v5054_v21  ;;  %v597_v17 = vpop.f32.mrb[3].mxu0  ;;  %v3150_v47 = vld [vmem:[%s3254_s20 + $0x98] sm:$0xff] }
 0x128   : > { %v4552_v27 = vpop.f32.mrb[18].mxu1  ;;  %2855 = vmatprep.mubr.f32.mxu0 %v5055_v11  ;;  %v3151_v17 = vld [vmem:[%s3254_s20 + $0xa0] sm:$0xff] }
 0x129   : > { %v4555_v54 = vpop.f32.mrb[19].mxu1  ;;  %2447 = vmatmul.mubr.msk.f32.gmra.mrb[124].mxu1 %vm2496_vm3, %v4091_v39 }
 0x12a   : > { %v600_v2 = vpop.f32.mrb[4].mxu0  ;;  %1612 = vmatprep.mubr.f32.mxu1 %v3148_v48  ;;  %v3152_v48 = vld [vmem:[%s3254_s20 + $0xa8] sm:$0xff] }
 0x12b   : > { %v4562_v55 = vadd.f32 %v4462_v52, %v600_v2  ;;  %2856 = vmatmul.mubr.msk.f32.gmra.mrb[110].mxu0 %vm2497_vm1, %v5056_v49  ;;  %v602_v21 = vpop.f32.mrb[5].mxu0 }
 0x12c   : > { %v4567_v32 = vpop.f32.mrb[20].mxu1  ;;  %2858 = vmatprep.mubr.f32.mxu0 %v5057_v19 }
 0x12d   : > { %v4570_v11 = vpop.f32.mrb[21].mxu1  ;;  %1613 = vmatmul.mubr.f32.gmra.mrb[126].mxu1 %v4108_v16 }
 0x12e   : > { %v605_v39 = vpop.f32.mrb[6].mxu0  ;;  %1617 = vmatprep.mubr.f32.mxu1 %v3149_v43 }
 0x12f   : > { %v4575_v52 = vadd.f32 %v4459_v61, %v605_v39  ;;  %2859 = vmatmul.mubr.msk.f32.gmra.mrb[112].mxu0 %vm2497_vm1, %v5058_v57  ;;  %v607_v49 = vpop.f32.mrb[7].mxu0  ;;  %v3153_v39 = vld [vmem:[%s3254_s20 + $0xb0] sm:$0xff] }
 0x130   : > { %v4580_v18 = vpop.f32.mrb[22].mxu1  ;;  %2861 = vmatprep.mubr.f32.mxu0 %v5059_v40  ;;  %v3154_v49 = vld [vmem:[%s3254_s20 + $0xb8] sm:$0xff] }
 0x131   : > { %v4583_v19 = vpop.f32.mrb[23].mxu1  ;;  %2449 = vmatmul.mubr.msk.f32.gmra.mrb[128].mxu1 %vm2496_vm3, %v4127_v8 }
 0x132   : > { %v610_v16 = vpop.f32.mrb[8].mxu0  ;;  %1622 = vmatprep.mubr.f32.mxu1 %v3150_v47 }
 0x133   : > { %v4590_v61 = vadd.f32 %v4474_v53, %v610_v16  ;;  %v612_v7 = vpop.f32.mrb[9].mxu0  ;;  %2862 = vmatmul.mubr.msk.f32.gmra.mrb[114].mxu0 %vm2497_vm1, %v5060_v45 }
 0x134   : > { %v4595_v57 = vpop.f32.mrb[24].mxu1  ;;  %2864 = vmatprep.mubr.f32.mxu0 %v5061_v25  ;;  %v3155_v7 = vld [vmem:[%s3254_s20 + $0xc0] sm:$0xff] }
 0x135   : > { %v4598_v40 = vpop.f32.mrb[25].mxu1  ;;  %1623 = vmatmul.mubr.f32.gmra.mrb[130].mxu1 %v4144_v31 }
 0x136   : > { %v615_v8 = vpop.f32.mrb[10].mxu0  ;;  %1627 = vmatprep.mubr.f32.mxu1 %v3151_v17  ;;  %v5066_v17 = vld [vmem:[#allocation25_spill] sm:$0xff] }
 0x137   : > { %v4603_v53 = vadd.f32 %v4471_v15, %v615_v8  ;;  %v617_v2 = vpop.f32.mrb[11].mxu0  ;;  %2865 = vmatmul.mubr.msk.f32.gmra.mrb[116].mxu0 %vm2497_vm1, %v5062_v29 }
 0x138   : > { %v4608_v45 = vpop.f32.mrb[26].mxu1  ;;  %2867 = vmatprep.mubr.f32.mxu0 %v5063_v38 }
 0x139   : > { %v4611_v25 = vpop.f32.mrb[27].mxu1  ;;  %2451 = vmatmul.mubr.msk.f32.gmra.mrb[132].mxu1 %vm2496_vm3, %v4163_v10 }
 0x13a   : > { %v620_v31 = vpop.f32.mrb[12].mxu0  ;;  %1632 = vmatprep.mubr.f32.mxu1 %v3152_v48 }
 0x13b   : > { %v4618_v15 = vadd.f32 %v4484_v41, %v620_v31  ;;  %v622_v21 = vpop.f32.mrb[13].mxu0  ;;  %2868 = vmatmul.mubr.msk.f32.gmra.mrb[118].mxu0 %vm2497_vm1, %v5064_v24 }
 0x13c   : > { %v4623_v29 = vpop.f32.mrb[28].mxu1  ;;  %2870 = vmatprep.mubr.f32.mxu0 %v5065_v36 }
 0x13d   : > { %v4626_v38 = vpop.f32.mrb[29].mxu1  ;;  %1633 = vmatmul.mubr.f32.gmra.mrb[134].mxu1 %v4180_v44 }
 0x13e   : > { %v625_v10 = vpop.f32.mrb[14].mxu0  ;;  %1637 = vmatprep.mubr.f32.mxu1 %v3153_v39 }
 0x13f   : > { %v4631_v41 = vadd.f32 %v4481_v63, %v625_v10  ;;  %v627_v43 = vpop.f32.mrb[15].mxu0  ;;  %2871 = vmatmul.mubr.msk.f32.gmra.mrb[120].mxu0 %vm2497_vm1, %v3863_v42  ;;  %v3157_v10 = vld [vmem:[%s3254_s20 + $0xd0] sm:$0xff] }
 0x140   : > { %v4636_v24 = vpop.f32.mrb[30].mxu1  ;;  %2873 = vmatprep.mubr.f32.mxu0 %v3875_v50 }
 0x141   : > { %v4639_v36 = vpop.f32.mrb[31].mxu1  ;;  %2453 = vmatmul.mubr.msk.f32.gmra.mrb[136].mxu1 %vm2496_vm3, %v4199_v46 }
 0x142   : > { %v630_v44 = vpop.f32.mrb[16].mxu0  ;;  %1642 = vmatprep.mubr.f32.mxu1 %v3154_v49  ;;  %v3158_v49 = vld [vmem:[%s3254_s20 + $0xd8] sm:$0xff] }
 0x143   : > { %v4646_v63 = vadd.f32 %v4496_v20, %v630_v44  ;;  %v632_v16 = vpop.f32.mrb[17].mxu0  ;;  %2874 = vmatmul.mubr.msk.f32.gmra.mrb[122].mxu0 %vm2497_vm1, %v3896_v6 }
 0x144   : > { %v1040_v42 = vpop.f32.mrb[32].mxu1  ;;  %2876 = vmatprep.mubr.f32.mxu0 %v3904_v1 }
 0x145   : > { %v4653_v50 = vadd.f32 %v1040_v42, %v4534_v56  ;;  %v1042_v47 = vpop.f32.mrb[33].mxu1  ;;  %1643 = vmatmul.mubr.f32.gmra.mrb[138].mxu1 %v4216_v58 }
 0x146   : > { %v635_v46 = vpop.f32.mrb[18].mxu0  ;;  %1647 = vmatprep.mubr.f32.mxu1 %v3155_v7 }
 0x147   : > { %v4658_v20 = vadd.f32 %v4493_v35, %v635_v46  ;;  %v637_v8 = vpop.f32.mrb[19].mxu0  ;;  %2877 = vmatmul.mubr.msk.f32.gmra.mrb[124].mxu0 %vm2497_vm1, %v5066_v17  ;;  %v3156_v35 = vld [vmem:[%s3254_s20 + $0xc8] sm:$0xff]  ;;  %v3159_v46 = vld [vmem:[%s3254_s20 + $0xe0] sm:$0xff] }
 0x148   : > { %v1045_v6 = vpop.f32.mrb[34].mxu1  ;;  %2879 = vmatprep.mubr.f32.mxu0 %v3172_v14 }
 0x149   : > { %v4665_v1 = vadd.f32 %v1045_v6, %v4547_v3  ;;  %v1047_v56 = vpop.f32.mrb[35].mxu1  ;;  %2455 = vmatmul.mubr.msk.f32.gmra.mrb[140].mxu1 %vm2496_vm3, %v4229_v51  ;;  %v3160_v6 = vld [vmem:[%s3254_s20 + $0xe8] sm:$0xff] }
 0x14a   : > { %v640_v58 = vpop.f32.mrb[20].mxu0  ;;  %1652 = vmatprep.mubr.f32.mxu1 %v3156_v35 }
 0x14b   : > { %v4672_v2 = vadd.f32 %v4506_v4, %v640_v58  ;;  %v642_v60 = vpop.f32.mrb[21].mxu0  ;;  %2880 = vmatmul.mubr.f32.gmra.mrb[126].mxu0 %v3172_v14 }
 0x14c   : > { %v1050_v31 = vpop.f32.mrb[36].mxu1  ;;  %v3161_v60 = vld [vmem:[%s3254_s20 + $0xf0] sm:$0xff] }
 0x14d   : > { %v4676_v48 = vadd.f32 %v1050_v31, %v4562_v55  ;;  %v1052_v3 = vpop.f32.mrb[37].mxu1  ;;  %1653 = vmatmul.mubr.f32.gmra.mrb[142].mxu1 %v4239_v59 }
 0x14e   : > { %v645_v21 = vpop.f32.mrb[22].mxu0  ;;  %1657 = vmatprep.mubr.f32.mxu1 %v3157_v10  ;;  %v3162_v10 = vld [vmem:[%s3254_s20 + $0xf8] sm:$0xff] }
 0x14f   : > { %v4681_v51 = vadd.f32 %v4503_v23, %v645_v21  ;;  %v647_v4 = vpop.f32.mrb[23].mxu0 }
 0x150   : > { %v1055_v39 = vpop.f32.mrb[38].mxu1 }
 0x151   : > { %v4684_v43 = vadd.f32 %v1055_v39, %v4575_v52  ;;  %v1057_v44 = vpop.f32.mrb[39].mxu1  ;;  %2457 = vmatmul.mubr.msk.f32.gmra.mrb[144].mxu1 %vm2496_vm3, %v4251_v12 }
 0x152   : > { %v650_v55 = vpop.f32.mrb[24].mxu0  ;;  %1662 = vmatprep.mubr.f32.mxu1 %v3158_v49 }
 0x153   : > { %v4691_v59 = vadd.f32 %v4518_v30, %v650_v55  ;;  %v652_v23 = vpop.f32.mrb[25].mxu0 }
 0x154   : > { %v1060_v16 = vpop.f32.mrb[40].mxu1 }
 0x155   : > { %v4694_v42 = vadd.f32 %v1060_v16, %v4590_v61  ;;  %v1062_v47 = vpop.f32.mrb[41].mxu1  ;;  %1663 = vmatmul.mubr.f32.gmra.mrb[146].mxu1 %v4261_v13 }
 0x156   : > { %v655_v52 = vpop.f32.mrb[26].mxu0  ;;  %1667 = vmatprep.mubr.f32.mxu1 %v3159_v46 }
 0x157   : > { %v4699_v12 = vadd.f32 %v4515_v26, %v655_v52  ;;  %v657_v7 = vpop.f32.mrb[27].mxu0 }
 0x158   : > { %v1065_v8 = vpop.f32.mrb[42].mxu1 }
 0x159   : > { %v4702_v30 = vadd.f32 %v1065_v8, %v4603_v53  ;;  %v1067_v17 = vpop.f32.mrb[43].mxu1  ;;  %2459 = vmatmul.mubr.msk.f32.gmra.mrb[148].mxu1 %vm2496_vm3, %v4273_v34 }
 0x15a   : > { %v660_v61 = vpop.f32.mrb[28].mxu0  ;;  %1672 = vmatprep.mubr.f32.mxu1 %v3160_v6 }
 0x15b   : > { %v886_v13 = vadd.f32 %v4528_v33, %v660_v61  ;;  %v662_v56 = vpop.f32.mrb[29].mxu0 }
 0x15c   : > { %v1070_v26 = vpop.f32.mrb[44].mxu1 }
 0x15d   : > { %v4710_v58 = vadd.f32 %v1070_v26, %v4618_v15  ;;  %v1072_v35 = vpop.f32.mrb[45].mxu1  ;;  %1673 = vmatmul.mubr.f32.gmra.mrb[150].mxu1 %v4283_v37 }
 0x15e   : > { %v665_v53 = vpop.f32.mrb[30].mxu0  ;;  %1677 = vmatprep.mubr.f32.mxu1 %v3161_v60 }
 0x15f   : > { %v891_v31 = vadd.f32 %v4525_v28, %v665_v53  ;;  %v667_v34 = vpop.f32.mrb[31].mxu0 }
 0x160   : > { %v1075_v3 = vpop.f32.mrb[46].mxu1 }
 0x161   : > { %v4716_v21 = vadd.f32 %v1075_v3, %v4631_v41  ;;  %v1077_v33 = vpop.f32.mrb[47].mxu1  ;;  %2461 = vmatmul.mubr.msk.f32.gmra.mrb[152].mxu1 %vm2496_vm3, %v4295_v62 }
 0x162   : > { %v670_v15 = vpop.f32.mrb[32].mxu0  ;;  %1682 = vmatprep.mubr.f32.mxu1 %v3162_v10 }
 0x163   : > { %v896_v37 = vadd.f32 %v4542_v5, %v670_v15  ;;  %v672_v4 = vpop.f32.mrb[33].mxu0 }
 0x164   : > { %v1080_v39 = vpop.f32.mrb[48].mxu1 }
 0x165   : > { %v4724_v44 = vadd.f32 %v1080_v39, %v4646_v63  ;;  %v1082_v28 = vpop.f32.mrb[49].mxu1  ;;  %1683 = vmatmul.mubr.f32.gmra.mrb[154].mxu1 %v4305_v0 }
 0x166   : > { %v675_v41 = vpop.f32.mrb[34].mxu0  ;;  %1687 = vmatprep.mubr.f32.mxu1 %v3172_v14 }
 0x167   : > { %v901_v55 = vadd.f32 %v4539_v9, %v675_v41  ;;  %v677_v49 = vpop.f32.mrb[35].mxu0 }
 0x168   : > { %v1085_v62 = vpop.f32.mrb[50].mxu1 }
 0x169   : > { %v4730_v23 = vadd.f32 %v1085_v62, %v4658_v20  ;;  %v1087_v16 = vpop.f32.mrb[51].mxu1  ;;  %1688 = vmatmul.mubr.f32.gmra.mrb[156].mxu1 %v3172_v14 }
 0x16a   : > { %v680_v5 = vpop.f32.mrb[36].mxu0  ;;  %1692 = vmatprep.mubr.f32.mxu1 %v3172_v14 }
 0x16b   : > { %v906_v63 = vadd.f32 %v4555_v54, %v680_v5  ;;  %v682_v47 = vpop.f32.mrb[37].mxu0 }
 0x16c   : > { %v1090_v0 = vpop.f32.mrb[52].mxu1 }
 0x16d   : > { %v4736_v52 = vadd.f32 %v1090_v0, %v4672_v2  ;;  %v1092_v46 = vpop.f32.mrb[53].mxu1  ;;  %1693 = vmatmul.mubr.f32.gmra.mrb[158].mxu1 %v3172_v14 }
 0x16e   : > { %v685_v9 = vpop.f32.mrb[38].mxu0 }
 0x16f   : > { %v911_v20 = vadd.f32 %v4552_v27, %v685_v9  ;;  %v687_v7 = vpop.f32.mrb[39].mxu0 }
 0x170   : > { %v1095_v8 = vpop.f32.mrb[54].mxu1 }
 0x171   : > { %v4741_v17 = vadd.f32 %v1095_v8, %v4681_v51  ;;  %v1097_v61 = vpop.f32.mrb[55].mxu1 }
 0x172   : > { %v690_v6 = vpop.f32.mrb[40].mxu0 }
 0x173   : > { %v916_v54 = vadd.f32 %v4570_v11, %v690_v6  ;;  %v692_v56 = vpop.f32.mrb[41].mxu0 }
 0x174   : > { %v1100_v26 = vpop.f32.mrb[56].mxu1 }
 0x175   : > { %v4745_v2 = vadd.f32 %v1100_v26, %v4691_v59  ;;  %v1102_v35 = vpop.f32.mrb[57].mxu1 }
 0x176   : > { %v695_v53 = vpop.f32.mrb[42].mxu0 }
 0x177   : > { %v921_v14 = vadd.f32 %v4567_v32, %v695_v53  ;;  %v697_v60 = vpop.f32.mrb[43].mxu0 }
 0x178   : > { %v1105_v27 = vpop.f32.mrb[58].mxu1 }
 0x179   : > { %v4749_v34 = vadd.f32 %v1105_v27, %v4699_v12  ;;  %v1107_v51 = vpop.f32.mrb[59].mxu1 }
 0x17a   : > { %v700_v3 = vpop.f32.mrb[44].mxu0 }
 0x17b   : > { %v926_v33 = vadd.f32 %v4583_v19, %v700_v3  ;;  %v702_v15 = vpop.f32.mrb[45].mxu0 }
 0x17c   : > { %v1110_v11 = vpop.f32.mrb[60].mxu1 }
 0x17d   : > { %v4752_v10 = vadd.f32 %v1110_v11, %v886_v13  ;;  %v1112_v4 = vpop.f32.mrb[61].mxu1 }
 0x17e   : > { %v705_v59 = vpop.f32.mrb[46].mxu0 }
 0x17f   : > { %v931_v39 = vadd.f32 %v4580_v18, %v705_v59  ;;  %v707_v28 = vpop.f32.mrb[47].mxu0 }
 0x180   : > { %v1115_v41 = vpop.f32.mrb[62].mxu1 }
 0x181   : > { %v4755_v32 = vadd.f32 %v1115_v41, %v891_v31  ;;  %v1117_v49 = vpop.f32.mrb[63].mxu1 }
 0x182   : > { %v710_v62 = vpop.f32.mrb[48].mxu0 }
 0x183   : > { %v936_v12 = vadd.f32 %v4598_v40, %v710_v62  ;;  %v712_v16 = vpop.f32.mrb[49].mxu0 }
 0x184   : > { %v1120_v5 = vpop.f32.mrb[64].mxu1 }
 0x185   : > { %v4758_v47 = vadd.f32 %v1120_v5, %v896_v37  ;;  %v1122_v19 = vpop.f32.mrb[65].mxu1 }
 0x186   : > { %v715_v0 = vpop.f32.mrb[50].mxu0 }
 0x187   : > { %v941_v13 = vadd.f32 %v4595_v57, %v715_v0  ;;  %v717_v46 = vpop.f32.mrb[51].mxu0 }
 0x188   : > { %v1125_v9 = vpop.f32.mrb[66].mxu1 }
 0x189   : > { %v4761_v7 = vadd.f32 %v1125_v9, %v901_v55  ;;  %v1127_v18 = vpop.f32.mrb[67].mxu1 }
 0x18a   : > { %v720_v8 = vpop.f32.mrb[52].mxu0 }
 0x18b   : > { %v946_v31 = vadd.f32 %v4611_v25, %v720_v8  ;;  %v722_v61 = vpop.f32.mrb[53].mxu0 }
 0x18c   : > { %v1130_v6 = vpop.f32.mrb[68].mxu1 }
 0x18d   : > { %v4764_v56 = vadd.f32 %v1130_v6, %v906_v63  ;;  %v1132_v40 = vpop.f32.mrb[69].mxu1 }
 0x18e   : > { %v725_v26 = vpop.f32.mrb[54].mxu0 }
 0x18f   : > { %v951_v37 = vadd.f32 %v4608_v45, %v725_v26  ;;  %v727_v35 = vpop.f32.mrb[55].mxu0 }
 0x190   : > { %v1135_v53 = vpop.f32.mrb[70].mxu1 }
 0x191   : > { %v4767_v60 = vadd.f32 %v1135_v53, %v911_v20  ;;  %v1137_v57 = vpop.f32.mrb[71].mxu1 }
 0x192   : > { %v730_v27 = vpop.f32.mrb[56].mxu0 }
 0x193   : > { %v956_v55 = vadd.f32 %v4626_v38, %v730_v27  ;;  %v732_v51 = vpop.f32.mrb[57].mxu0 }
 0x194   : > { %v1140_v3 = vpop.f32.mrb[72].mxu1 }
 0x195   : > { %v4770_v15 = vadd.f32 %v1140_v3, %v916_v54  ;;  %v1142_v25 = vpop.f32.mrb[73].mxu1 }
 0x196   : > { %v735_v11 = vpop.f32.mrb[58].mxu0 }
 0x197   : > { %v961_v63 = vadd.f32 %v4623_v29, %v735_v11  ;;  %v737_v4 = vpop.f32.mrb[59].mxu0 }
 0x198   : > { %v1145_v59 = vpop.f32.mrb[74].mxu1 }
 0x199   : > { %v4773_v28 = vadd.f32 %v1145_v59, %v921_v14  ;;  %v1147_v45 = vpop.f32.mrb[75].mxu1 }
 0x19a   : > { %v740_v41 = vpop.f32.mrb[60].mxu0 }
 0x19b   : > { %v966_v20 = vadd.f32 %v4639_v36, %v740_v41  ;;  %v742_v49 = vpop.f32.mrb[61].mxu0 }
 0x19c   : > { %v1150_v62 = vpop.f32.mrb[76].mxu1 }
 0x19d   : > { %v4776_v16 = vadd.f32 %v1150_v62, %v926_v33  ;;  %v1152_v38 = vpop.f32.mrb[77].mxu1 }
 0x19e   : > { %v745_v5 = vpop.f32.mrb[62].mxu0 }
 0x19f   : > { %v971_v54 = vadd.f32 %v4636_v24, %v745_v5  ;;  %v747_v19 = vpop.f32.mrb[63].mxu0 }
 0x1a0   : > { %v1155_v0 = vpop.f32.mrb[78].mxu1 }
 0x1a1   : > { %v4779_v46 = vadd.f32 %v1155_v0, %v931_v39  ;;  %v1157_v29 = vpop.f32.mrb[79].mxu1 }
 0x1a2   : > { %v2756_v9 = vpop.f32.mrb[64].mxu0 }
 0x1a3   : > { %v4782_v14 = vadd.f32 %v2756_v9, %v4665_v1  ;;  %v1265_v18 = vpop.f32.mrb[65].mxu0 }
 0x1a4   : > { %v1160_v8 = vpop.f32.mrb[80].mxu1  ;;  %v4785_v36 = vadd.f32 %v1265_v18, %v4653_v50 }
 0x1a5   : > { %v4787_v33 = vadd.f32 %v1160_v8, %v936_v12  ;;  %v1162_v61 = vpop.f32.mrb[81].mxu1 }
 0x1a6   : > { %v2759_v6 = vpop.f32.mrb[66].mxu0 }
 0x1a7   : > { %v4790_v24 = vadd.f32 %v2759_v6, %v4684_v43  ;;  %v1275_v40 = vpop.f32.mrb[67].mxu0 }
 0x1a8   : > { %v1165_v39 = vpop.f32.mrb[82].mxu1  ;;  %v4793_v26 = vadd.f32 %v1275_v40, %v4676_v48 }
 0x1a9   : > { %v4795_v35 = vadd.f32 %v1165_v39, %v941_v13  ;;  %v1167_v1 = vpop.f32.mrb[83].mxu1 }
 0x1aa   : > { %v2762_v53 = vpop.f32.mrb[68].mxu0 }
 0x1ab   : > { %v4798_v57 = vadd.f32 %v2762_v53, %v4702_v30  ;;  %v1285_v50 = vpop.f32.mrb[69].mxu0 }
 0x1ac   : > { %v1170_v12 = vpop.f32.mrb[84].mxu1  ;;  %v4801_v27 = vadd.f32 %v1285_v50, %v4694_v42 }
 0x1ad   : > { %v4803_v51 = vadd.f32 %v1170_v12, %v946_v31  ;;  %v1172_v43 = vpop.f32.mrb[85].mxu1 }
 0x1ae   : > { %v2765_v3 = vpop.f32.mrb[70].mxu0 }
 0x1af   : > { %v4806_v25 = vadd.f32 %v2765_v3, %v4716_v21  ;;  %v1295_v48 = vpop.f32.mrb[71].mxu0 }
 0x1b0   : > { %v1175_v13 = vpop.f32.mrb[86].mxu1  ;;  %v4809_v11 = vadd.f32 %v1295_v48, %v4710_v58 }
 0x1b1   : > { %v1176_v4 = vadd.f32 %v1175_v13, %v951_v37  ;;  %v1177_v30 = vpop.f32.mrb[87].mxu1 }
 0x1b2   : > { %v2768_v59 = vpop.f32.mrb[72].mxu0 }
 0x1b3   : > { %v4812_v45 = vadd.f32 %v2768_v59, %v4730_v23  ;;  %v1305_v42 = vpop.f32.mrb[73].mxu0 }
 0x1b4   : > { %v1180_v41 = vpop.f32.mrb[88].mxu1  ;;  %v4815_v31 = vadd.f32 %v1305_v42, %v4724_v44 }
 0x1b5   : > { %v1181_v49 = vadd.f32 %v1180_v41, %v956_v55  ;;  %v1182_v62 = vpop.f32.mrb[89].mxu1 }
 0x1b6   : > { %v2771_v21 = vpop.f32.mrb[74].mxu0 }
 0x1b7   : > { %v4818_v38 = vadd.f32 %v2771_v21, %v4741_v17  ;;  %v1315_v5 = vpop.f32.mrb[75].mxu0 }
 0x1b8   : > { %v1185_v58 = vpop.f32.mrb[90].mxu1  ;;  %v4821_v37 = vadd.f32 %v1315_v5, %v4736_v52 }
 0x1b9   : > { %v1186_v19 = vadd.f32 %v1185_v58, %v961_v63  ;;  %v1187_v0 = vpop.f32.mrb[91].mxu1 }
 0x1ba   : > { %v2774_v23 = vpop.f32.mrb[76].mxu0 }
 0x1bb   : > { %v4824_v29 = vadd.f32 %v2774_v23, %v4749_v34  ;;  %v1325_v9 = vpop.f32.mrb[77].mxu0 }
 0x1bc   : > { %v1190_v44 = vpop.f32.mrb[92].mxu1  ;;  %v4827_v55 = vadd.f32 %v1325_v9, %v4745_v2 }
 0x1bd   : > { %v1191_v18 = vadd.f32 %v1190_v44, %v966_v20  ;;  %v1192_v8 = vpop.f32.mrb[93].mxu1 }
 0x1be   : > { %v2777_v17 = vpop.f32.mrb[78].mxu0 }
 0x1bf   : > { %v4830_v61 = vadd.f32 %v2777_v17, %v4755_v32  ;;  %v1335_v6 = vpop.f32.mrb[79].mxu0 }
 0x1c0   : > { %v1195_v52 = vpop.f32.mrb[94].mxu1  ;;  %v4833_v63 = vadd.f32 %v1335_v6, %v4752_v10 }
 0x1c1   : > { %v1196_v40 = vadd.f32 %v1195_v52, %v971_v54  ;;  %v1197_v39 = vpop.f32.mrb[95].mxu1 }
 0x1c2   : > { %v2780_v34 = vpop.f32.mrb[80].mxu0 }
 0x1c3   : > { %v4836_v1 = vadd.f32 %v2780_v34, %v4761_v7  ;;  %v1345_v53 = vpop.f32.mrb[81].mxu0 }
 0x1c4   : > { %v4839_v2 = vadd.f32 %v1345_v53, %v4758_v47  ;;  %v1539_v20 = vpop.f32.mrb[96].mxu1 }
 0x1c5   : > { %v1541_v50 = vpop.f32.mrb[97].mxu1 }
 0x1c6   : > { %v2783_v12 = vpop.f32.mrb[82].mxu0 }
 0x1c7   : > { %v4842_v32 = vadd.f32 %v2783_v12, %v4767_v60  ;;  %v1355_v43 = vpop.f32.mrb[83].mxu0 }
 0x1c8   : > { %v4845_v10 = vadd.f32 %v1355_v43, %v4764_v56  ;;  %v1544_v54 = vpop.f32.mrb[98].mxu1 }
 0x1c9   : > { %v1546_v3 = vpop.f32.mrb[99].mxu1 }
 0x1ca   : > { %v2786_v48 = vpop.f32.mrb[84].mxu0 }
 0x1cb   : > { %v4848_v7 = vadd.f32 %v2786_v48, %v4773_v28  ;;  %v1365_v13 = vpop.f32.mrb[85].mxu0 }
 0x1cc   : > { %v4851_v47 = vadd.f32 %v1365_v13, %v4770_v15  ;;  %v1549_v30 = vpop.f32.mrb[100].mxu1 }
 0x1cd   : > { %v1551_v59 = vpop.f32.mrb[101].mxu1 }
 0x1ce   : > { %v2789_v42 = vpop.f32.mrb[86].mxu0 }
 0x1cf   : > { %v4854_v60 = vadd.f32 %v2789_v42, %v4779_v46  ;;  %v1375_v41 = vpop.f32.mrb[87].mxu0 }
 0x1d0   : > { %v4857_v56 = vadd.f32 %v1375_v41, %v4776_v16  ;;  %v1554_v62 = vpop.f32.mrb[102].mxu1 }
 0x1d1   : > { %v1556_v21 = vpop.f32.mrb[103].mxu1 }
 0x1d2   : > { %v2792_v5 = vpop.f32.mrb[88].mxu0 }
 0x1d3   : > { %v4860_v28 = vadd.f32 %v2792_v5, %v4795_v35  ;;  %v1385_v58 = vpop.f32.mrb[89].mxu0 }
 0x1d4   : > { %v4863_v15 = vadd.f32 %v1385_v58, %v4787_v33  ;;  %v1559_v0 = vpop.f32.mrb[104].mxu1 }
 0x1d5   : > { %v1561_v23 = vpop.f32.mrb[105].mxu1 }
 0x1d6   : > { %v2795_v9 = vpop.f32.mrb[90].mxu0 }
 0x1d7   : > { %v4865_v44 = vadd.f32 %v2795_v9, %v1176_v4  ;;  %v1395_v46 = vpop.f32.mrb[91].mxu0 }
 0x1d8   : > { %v4868_v8 = vadd.f32 %v1395_v46, %v4803_v51  ;;  %v1564_v16 = vpop.f32.mrb[106].mxu1 }
 0x1d9   : > { %v1566_v17 = vpop.f32.mrb[107].mxu1 }
 0x1da   : > { %v2798_v6 = vpop.f32.mrb[92].mxu0 }
 0x1db   : > { %v4870_v52 = vadd.f32 %v2798_v6, %v1186_v19  ;;  %v1405_v35 = vpop.f32.mrb[93].mxu0 }
 0x1dc   : > { %v4872_v39 = vadd.f32 %v1405_v35, %v1181_v49  ;;  %v1569_v33 = vpop.f32.mrb[108].mxu1 }
 0x1dd   : > { %v1571_v34 = vpop.f32.mrb[109].mxu1 }
 0x1de   : > { %v2801_v53 = vpop.f32.mrb[94].mxu0 }
 0x1df   : > { %v4874_v50 = vadd.f32 %v2801_v53, %v1196_v40  ;;  %v1415_v4 = vpop.f32.mrb[95].mxu0 }
 0x1e0   : > { %v4876_v12 = vadd.f32 %v1415_v4, %v1191_v18  ;;  %v1574_v43 = vpop.f32.mrb[110].mxu1 }
 0x1e1   : > { %v1576_v51 = vpop.f32.mrb[111].mxu1 }
 0x1e2   : > { %v2836_v3 = vpop.f32.mrb[96].mxu0 }
 0x1e3   : > { %v1770_v48 = vadd.f32 %v2836_v3, %v1544_v54  ;;  %v1764_v13 = vpop.f32.mrb[97].mxu0 }
 0x1e4   : > { %v1579_v49 = vpop.f32.mrb[112].mxu1  ;;  %v1765_v19 = vadd.f32 %v1764_v13, %v1539_v20 }
 0x1e5   : > { %v1924_v40 = vadd.f32 %v1770_v48, %v4782_v14  ;;  %v1581_v59 = vpop.f32.mrb[113].mxu1 }
 0x1e6   : > { %v1923_v18 = vadd.f32 %v1765_v19, %v4785_v36  ;;  %v2839_v42 = vpop.f32.mrb[98].mxu0 }
 0x1e7   : > { %1956 = vst [vmem:[%s4883_s29 + $0x8] sm:$0xff] %v1924_v40  ;;  %v2025_v54 = vmul.f32 %v1924_v40, %v1924_v40  ;;  %v1780_v41 = vadd.f32 %v2839_v42, %v1554_v62  ;;  %v1774_v21 = vpop.f32.mrb[99].mxu0 }
 0x1e8   : > { %1955 = vst [vmem:[%s4883_s29] sm:$0xff] %v1923_v18  ;;  %v1987_v5 = vadd.f32 %v1924_v40, %v1923_v18  ;;  %v2024_v58 = vmul.f32 %v1923_v18, %v1923_v18  ;;  %v1584_v23 = vpop.f32.mrb[114].mxu1  ;;  %v1775_v9 = vadd.f32 %v1774_v21, %v1549_v30 }
 0x1e9   : > { %v1926_v46 = vadd.f32 %v1780_v41, %v4790_v24  ;;  %v1586_v20 = vpop.f32.mrb[115].mxu1 }
 0x1ea   : > { %v2056_v17 = vadd.f32 %v2025_v54, %v2024_v58  ;;  %v1925_v14 = vadd.f32 %v1775_v9, %v4793_v26  ;;  %v2842_v6 = vpop.f32.mrb[100].mxu0 }
 0x1eb   : > { %1958 = vst [vmem:[%s4883_s29 + $0x18] sm:$0xff] %v1926_v46  ;;  %v1790_v36 = vadd.f32 %v2842_v6, %v1564_v16  ;;  %v1784_v35 = vpop.f32.mrb[101].mxu0  ;;  %v2027_v3 = vmul.f32 %v1926_v46, %v1926_v46 }
 0x1ec   : > { %1957 = vst [vmem:[%s4883_s29 + $0x10] sm:$0xff] %v1925_v14  ;;  %v1988_v62 = vadd.f32 %v1987_v5, %v1925_v14  ;;  %v2026_v34 = vmul.f32 %v1925_v14, %v1925_v14  ;;  %v1589_v53 = vpop.f32.mrb[116].mxu1  ;;  %v1785_v4 = vadd.f32 %v1784_v35, %v1559_v0 }
 0x1ed   : > { %v1928_v51 = vadd.f32 %v1790_v36, %v4798_v57  ;;  %v1591_v30 = vpop.f32.mrb[117].mxu1 }
 0x1ee   : > { %v2057_v24 = vadd.f32 %v2056_v17, %v2026_v34  ;;  %v1927_v48 = vadd.f32 %v1785_v4, %v4801_v27  ;;  %v1989_v13 = vadd.f32 %v1988_v62, %v1926_v46  ;;  %v2845_v26 = vpop.f32.mrb[102].mxu0 }
 0x1ef   : > { %1960 = vst [vmem:[%s4883_s29 + $0x28] sm:$0xff] %v1928_v51  ;;  %v1800_v19 = vadd.f32 %v2845_v26, %v1574_v43  ;;  %v1794_v16 = vpop.f32.mrb[103].mxu0  ;;  %v2029_v41 = vmul.f32 %v1928_v51, %v1928_v51 }
 0x1f0   : > { %1959 = vst [vmem:[%s4883_s29 + $0x20] sm:$0xff] %v1927_v48  ;;  %v1990_v40 = vadd.f32 %v1989_v13, %v1927_v48  ;;  %v2028_v59 = vmul.f32 %v1927_v48, %v1927_v48  ;;  %v2058_v18 = vadd.f32 %v2057_v24, %v2027_v3  ;;  %v1594_v42 = vpop.f32.mrb[118].mxu1  ;;  %v1795_v0 = vadd.f32 %v1794_v16, %v1569_v33 }
 0x1f1   : > { %v1930_v57 = vadd.f32 %v1800_v19, %v4806_v25  ;;  %v1596_v54 = vpop.f32.mrb[119].mxu1 }
 0x1f2   : > { %v2059_v21 = vadd.f32 %v2058_v18, %v2028_v59  ;;  %v1929_v27 = vadd.f32 %v1795_v0, %v4809_v11  ;;  %v1991_v5 = vadd.f32 %v1990_v40, %v1928_v51  ;;  %v2848_v58 = vpop.f32.mrb[104].mxu0 }
 0x1f3   : > { %1962 = vst [vmem:[%s4883_s29 + $0x38] sm:$0xff] %v1930_v57  ;;  %v1810_v43 = vadd.f32 %v2848_v58, %v1584_v23  ;;  %v1804_v9 = vpop.f32.mrb[105].mxu0  ;;  %v2031_v36 = vmul.f32 %v1930_v57, %v1930_v57 }
 0x1f4   : > { %1961 = vst [vmem:[%s4883_s29 + $0x30] sm:$0xff] %v1929_v27  ;;  %v1992_v46 = vadd.f32 %v1991_v5, %v1929_v27  ;;  %v2030_v20 = vmul.f32 %v1929_v27, %v1929_v27  ;;  %v2060_v17 = vadd.f32 %v2059_v21, %v2029_v41  ;;  %v1599_v14 = vpop.f32.mrb[120].mxu1  ;;  %v1805_v33 = vadd.f32 %v1804_v9, %v1579_v49 }
 0x1f5   : > { %v1932_v25 = vadd.f32 %v1810_v43, %v4812_v45  ;;  %v1601_v6 = vpop.f32.mrb[121].mxu1 }
 0x1f6   : > { %v2061_v35 = vadd.f32 %v2060_v17, %v2030_v20  ;;  %v1931_v11 = vadd.f32 %v1805_v33, %v4815_v31  ;;  %v1993_v62 = vadd.f32 %v1992_v46, %v1930_v57  ;;  %v2851_v34 = vpop.f32.mrb[106].mxu0 }
 0x1f7   : > { %1964 = vst [vmem:[%s4883_s29 + $0x48] sm:$0xff] %v1932_v25  ;;  %v1820_v23 = vadd.f32 %v2851_v34, %v1594_v42  ;;  %v1814_v4 = vpop.f32.mrb[107].mxu0  ;;  %v2033_v13 = vmul.f32 %v1932_v25, %v1932_v25 }
 0x1f8   : > { %1963 = vst [vmem:[%s4883_s29 + $0x40] sm:$0xff] %v1931_v11  ;;  %v1994_v51 = vadd.f32 %v1993_v62, %v1931_v11  ;;  %v2032_v30 = vmul.f32 %v1931_v11, %v1931_v11  ;;  %v2062_v3 = vadd.f32 %v2061_v35, %v2031_v36  ;;  %v1604_v24 = vpop.f32.mrb[122].mxu1  ;;  %v1815_v49 = vadd.f32 %v1814_v4, %v1589_v53 }
 0x1f9   : > { %v1934_v45 = vadd.f32 %v1820_v23, %v4818_v38  ;;  %v1606_v48 = vpop.f32.mrb[123].mxu1 }
 0x1fa   : > { %v2063_v26 = vadd.f32 %v2062_v3, %v2032_v30  ;;  %v1933_v31 = vadd.f32 %v1815_v49, %v4821_v37  ;;  %v1995_v19 = vadd.f32 %v1994_v51, %v1932_v25  ;;  %v2854_v16 = vpop.f32.mrb[108].mxu0 }
 0x1fb   : > { %1966 = vst [vmem:[%s4883_s29 + $0x58] sm:$0xff] %v1934_v45  ;;  %v1830_v40 = vadd.f32 %v2854_v16, %v1604_v24  ;;  %v1824_v59 = vpop.f32.mrb[109].mxu0  ;;  %v2035_v41 = vmul.f32 %v1934_v45, %v1934_v45 }
 0x1fc   : > { %1965 = vst [vmem:[%s4883_s29 + $0x50] sm:$0xff] %v1933_v31  ;;  %v1996_v18 = vadd.f32 %v1995_v19, %v1933_v31  ;;  %v2034_v42 = vmul.f32 %v1933_v31, %v1933_v31  ;;  %v2064_v0 = vadd.f32 %v2063_v26, %v2033_v13  ;;  %v1609_v57 = vpop.f32.mrb[124].mxu1  ;;  %v1825_v53 = vadd.f32 %v1824_v59, %v1599_v14 }
 0x1fd   : > { %v1936_v38 = vadd.f32 %v1830_v40, %v4824_v29  ;;  %v1611_v54 = vpop.f32.mrb[125].mxu1 }
 0x1fe   : > { %v2065_v21 = vadd.f32 %v2064_v0, %v2034_v42  ;;  %v1935_v37 = vadd.f32 %v1825_v53, %v4827_v55  ;;  %v1997_v27 = vadd.f32 %v1996_v18, %v1934_v45  ;;  %v2857_v5 = vpop.f32.mrb[110].mxu0 }
 0x1ff   : > { %1968 = vst [vmem:[%s4883_s29 + $0x68] sm:$0xff] %v1936_v38  ;;  %v1834_v58 = vpop.f32.mrb[111].mxu0  ;;  %v2037_v29 = vmul.f32 %v1936_v38, %v1936_v38 }
 0x200   : > { %1967 = vst [vmem:[%s4883_s29 + $0x60] sm:$0xff] %v1935_v37  ;;  %v1998_v43 = vadd.f32 %v1997_v27, %v1935_v37  ;;  %v2036_v9 = vmul.f32 %v1935_v37, %v1935_v37  ;;  %v2066_v46 = vadd.f32 %v2065_v21, %v2035_v41  ;;  %v1614_v20 = vpop.f32.mrb[126].mxu1  ;;  %v1835_v17 = vadd.f32 %v1834_v58, %v1609_v57 }
 0x201   : > { %v1840_v14 = vadd.f32 %v2857_v5, %v1614_v20  ;;  %v1616_v33 = vpop.f32.mrb[127].mxu1 }
 0x202   : > { %v2067_v25 = vadd.f32 %v2066_v46, %v2036_v9  ;;  %v1937_v6 = vadd.f32 %v1835_v17, %v4833_v63  ;;  %v1999_v36 = vadd.f32 %v1998_v43, %v1936_v38  ;;  %v2860_v55 = vpop.f32.mrb[112].mxu0 }
 0x203   : > { %v1938_v35 = vadd.f32 %v1840_v14, %v4830_v61  ;;  %v1844_v11 = vpop.f32.mrb[113].mxu0 }
 0x204   : > { %1969 = vst [vmem:[%s4883_s29 + $0x70] sm:$0xff] %v1937_v6  ;;  %v2000_v62 = vadd.f32 %v1999_v36, %v1937_v6  ;;  %v2038_v34 = vmul.f32 %v1937_v6, %v1937_v6  ;;  %v2068_v23 = vadd.f32 %v2067_v25, %v2037_v29  ;;  %v1619_v4 = vpop.f32.mrb[128].mxu1 }
 0x205   : > { %1970 = vst [vmem:[%s4883_s29 + $0x78] sm:$0xff] %v1938_v35  ;;  %v1845_v51 = vadd.f32 %v1844_v11, %v1619_v4  ;;  %v1621_v30 = vpop.f32.mrb[129].mxu1  ;;  %v2039_v3 = vmul.f32 %v1938_v35, %v1938_v35 }
 0x206   : > { %v2069_v24 = vadd.f32 %v2068_v23, %v2038_v34  ;;  %v2001_v49 = vadd.f32 %v2000_v62, %v1938_v35  ;;  %v2863_v45 = vpop.f32.mrb[114].mxu0 }
 0x207   : > { %v1939_v63 = vadd.f32 %v1845_v51, %v4839_v2  ;;  %v1854_v48 = vpop.f32.mrb[115].mxu0 }
 0x208   : > { %v2070_v13 = vadd.f32 %v2069_v24, %v2039_v3  ;;  %v1624_v61 = vpop.f32.mrb[130].mxu1 }
 0x209   : > { %1971 = vst [vmem:[%s4883_s29 + $0x80] sm:$0xff] %v1939_v63  ;;  %v2002_v26 = vadd.f32 %v2001_v49, %v1939_v63  ;;  %v2040_v31 = vmul.f32 %v1939_v63, %v1939_v63  ;;  %v1850_v19 = vadd.f32 %v2860_v55, %v1624_v61  ;;  %v1626_v16 = vpop.f32.mrb[131].mxu1 }
 0x20a   : > { %v2866_v40 = vpop.f32.mrb[116].mxu0 }
 0x20b   : > { %v2071_v59 = vadd.f32 %v2070_v13, %v2040_v31  ;;  %v1940_v18 = vadd.f32 %v1850_v19, %v4836_v1  ;;  %v1864_v42 = vpop.f32.mrb[117].mxu0 }
 0x20c   : > { %v1629_v0 = vpop.f32.mrb[132].mxu1 }
 0x20d   : > { %1972 = vst [vmem:[%s4883_s29 + $0x88] sm:$0xff] %v1940_v18  ;;  %v2003_v57 = vadd.f32 %v2002_v26, %v1940_v18  ;;  %v2041_v53 = vmul.f32 %v1940_v18, %v1940_v18  ;;  %v1855_v38 = vadd.f32 %v1854_v48, %v1629_v0  ;;  %v1631_v2 = vpop.f32.mrb[133].mxu1 }
 0x20e   : > { %v2869_v54 = vpop.f32.mrb[118].mxu0 }
 0x20f   : > { %v2072_v41 = vadd.f32 %v2071_v59, %v2041_v53  ;;  %v1941_v21 = vadd.f32 %v1855_v38, %v4845_v10  ;;  %v1874_v37 = vpop.f32.mrb[119].mxu0 }
 0x210   : > { %v1634_v27 = vpop.f32.mrb[134].mxu1 }
 0x211   : > { %1973 = vst [vmem:[%s4883_s29 + $0x90] sm:$0xff] %v1941_v21  ;;  %v2004_v5 = vadd.f32 %v2003_v57, %v1941_v21  ;;  %v2042_v58 = vmul.f32 %v1941_v21, %v1941_v21  ;;  %v1860_v43 = vadd.f32 %v2863_v45, %v1634_v27  ;;  %v1636_v9 = vpop.f32.mrb[135].mxu1 }
 0x212   : > { %v2872_v1 = vpop.f32.mrb[120].mxu0 }
 0x213   : > { %v2073_v46 = vadd.f32 %v2072_v41, %v2042_v58  ;;  %v1942_v20 = vadd.f32 %v1860_v43, %v4842_v32  ;;  %v1884_v17 = vpop.f32.mrb[121].mxu0 }
 0x214   : > { %v1639_v14 = vpop.f32.mrb[136].mxu1 }
 0x215   : > { %1974 = vst [vmem:[%s4883_s29 + $0x98] sm:$0xff] %v1942_v20  ;;  %v2005_v33 = vadd.f32 %v2004_v5, %v1942_v20  ;;  %v2043_v29 = vmul.f32 %v1942_v20, %v1942_v20  ;;  %v1865_v25 = vadd.f32 %v1864_v42, %v1639_v14  ;;  %v1641_v6 = vpop.f32.mrb[137].mxu1 }
 0x216   : > { %v2875_v10 = vpop.f32.mrb[122].mxu0 }
 0x217   : > { %v2074_v36 = vadd.f32 %v2073_v46, %v2043_v29  ;;  %v1943_v55 = vadd.f32 %v1865_v25, %v4851_v47  ;;  %v1894_v35 = vpop.f32.mrb[123].mxu0 }
 0x218   : > { %v1644_v11 = vpop.f32.mrb[138].mxu1 }
 0x219   : > { %1975 = vst [vmem:[%s4883_s29 + $0xa0] sm:$0xff] %v1943_v55  ;;  %v2006_v62 = vadd.f32 %v2005_v33, %v1943_v55  ;;  %v2044_v34 = vmul.f32 %v1943_v55, %v1943_v55  ;;  %v1870_v23 = vadd.f32 %v2866_v40, %v1644_v11  ;;  %v1646_v4 = vpop.f32.mrb[139].mxu1 }
 0x21a   : > { %v4927_v32 = vpop.f32.mrb[124].mxu0 }
 0x21b   : > { %v2075_v51 = vadd.f32 %v2074_v36, %v2044_v34  ;;  %v1944_v30 = vadd.f32 %v1870_v23, %v4848_v7  ;;  %v1904_v3 = vpop.f32.mrb[125].mxu0 }
 0x21c   : > { %v1649_v24 = vpop.f32.mrb[140].mxu1 }
 0x21d   : > { %1976 = vst [vmem:[%s4883_s29 + $0xa8] sm:$0xff] %v1944_v30  ;;  %v2007_v49 = vadd.f32 %v2006_v62, %v1944_v30  ;;  %v2045_v45 = vmul.f32 %v1944_v30, %v1944_v30  ;;  %v1875_v47 = vadd.f32 %v1874_v37, %v1649_v24  ;;  %v1651_v63 = vpop.f32.mrb[141].mxu1 }
 0x21e   : > { %v4931_v48 = vpop.f32.mrb[126].mxu0 }
 0x21f   : > { %v2076_v13 = vadd.f32 %v2075_v51, %v2045_v45  ;;  %v1945_v61 = vadd.f32 %v1875_v47, %v4857_v56  ;;  %v1914_v26 = vpop.f32.mrb[127].mxu0 }
 0x220   : > { %v1654_v31 = vpop.f32.mrb[142].mxu1 }
 0x221   : > { %1977 = vst [vmem:[%s4883_s29 + $0xb0] sm:$0xff] %v1945_v61  ;;  %v2008_v19 = vadd.f32 %v2007_v49, %v1945_v61  ;;  %v2046_v16 = vmul.f32 %v1945_v61, %v1945_v61  ;;  %v1880_v7 = vadd.f32 %v2869_v54, %v1654_v31  ;;  %v1656_v40 = vpop.f32.mrb[143].mxu1 }
 0x223   : > { %v2077_v59 = vadd.f32 %v2076_v13, %v2046_v16  ;;  %v1946_v18 = vadd.f32 %v1880_v7, %v4854_v60 }
 0x224   : > { %v1659_v42 = vpop.f32.mrb[144].mxu1 }
 0x225   : > { %1978 = vst [vmem:[%s4883_s29 + $0xb8] sm:$0xff] %v1946_v18  ;;  %v2009_v0 = vadd.f32 %v2008_v19, %v1946_v18  ;;  %v2047_v57 = vmul.f32 %v1946_v18, %v1946_v18  ;;  %v1885_v53 = vadd.f32 %v1884_v17, %v1659_v42  ;;  %v1661_v38 = vpop.f32.mrb[145].mxu1 }
 0x227   : > { %v2078_v2 = vadd.f32 %v2077_v59, %v2047_v57  ;;  %v1947_v56 = vadd.f32 %v1885_v53, %v4863_v15  ;;  %v3173_v53 = vmov 1966171168  }
 0x228   : > { %v1664_v41 = vpop.f32.mrb[146].mxu1  ;;  %v2097_v38 = vunpack.c.l.s4 %v3173_v53 }
 0x229   : > { %1979 = vst [vmem:[%s4883_s29 + $0xc0] sm:$0xff] %v1947_v56  ;;  %v2010_v21 = vadd.f32 %v2009_v0, %v1947_v56  ;;  %v2048_v37 = vmul.f32 %v1947_v56, %v1947_v56  ;;  %v1890_v54 = vadd.f32 %v2872_v1, %v1664_v41  ;;  %v1666_v27 = vpop.f32.mrb[147].mxu1 }
 0x22b   : > { %v2079_v5 = vadd.f32 %v2078_v2, %v2048_v37  ;;  %v1948_v60 = vadd.f32 %v1890_v54, %v4860_v28 }
 0x22c   : > { %v1669_v58 = vpop.f32.mrb[148].mxu1 }
 0x22d   : > { %1980 = vst [vmem:[%s4883_s29 + $0xc8] sm:$0xff] %v1948_v60  ;;  %v2011_v43 = vadd.f32 %v2010_v21, %v1948_v60  ;;  %v2049_v9 = vmul.f32 %v1948_v60, %v1948_v60  ;;  %v1895_v46 = vadd.f32 %v1894_v35, %v1669_v58  ;;  %v1671_v20 = vpop.f32.mrb[149].mxu1  ;;  %v2098_v21 = vunpack.c.0.s8 %v2097_v38 }
 0x22e   : > { %v5067_v58 = vlaneseq }
 0x22f   : > { %v2080_v17 = vadd.f32 %v2079_v5, %v2049_v9  ;;  %v1949_v15 = vadd.f32 %v1895_v46, %v4868_v8  ;;  %v2101_v27 = vsub.s32 %v2098_v21, %v3257_v22 }
 0x230   : > { %v1674_v14 = vpop.f32.mrb[150].mxu1  ;;  %vm2113_vm4 = vcmp.lt.s32.totalorder %v5067_v58, 256 }
 0x231   : > { %1981 = vst [vmem:[%s4883_s29 + $0xd0] sm:$0xff] %v1949_v15  ;;  %v2012_v33 = vadd.f32 %v2011_v43, %v1949_v15  ;;  %v2050_v29 = vmul.f32 %v1949_v15, %v1949_v15  ;;  %v1900_v1 = vadd.f32 %v2875_v10, %v1674_v14  ;;  %v1676_v25 = vpop.f32.mrb[151].mxu1 }
 0x233   : > { %v2081_v6 = vadd.f32 %v2080_v17, %v2050_v29  ;;  %v1950_v28 = vadd.f32 %v1900_v1, %v4865_v44 }
 0x234   : > { %v1679_v36 = vpop.f32.mrb[152].mxu1 }
 0x235   : > { %1982 = vst [vmem:[%s4883_s29 + $0xd8] sm:$0xff] %v1950_v28  ;;  %v2013_v55 = vadd.f32 %v2012_v33, %v1950_v28  ;;  %v2051_v11 = vmul.f32 %v1950_v28, %v1950_v28  ;;  %v1905_v35 = vadd.f32 %v1904_v3, %v1679_v36  ;;  %v1681_v62 = vpop.f32.mrb[153].mxu1 }
 0x237   : > { %v2082_v34 = vadd.f32 %v2081_v6, %v2051_v11  ;;  %v1951_v8 = vadd.f32 %v1905_v35, %v4872_v39 }
 0x238   : > { %v1684_v23 = vpop.f32.mrb[154].mxu1 }
 0x239   : > { %1983 = vst [vmem:[%s4883_s29 + $0xe0] sm:$0xff] %v1951_v8  ;;  %v2014_v4 = vadd.f32 %v2013_v55, %v1951_v8  ;;  %v2052_v51 = vmul.f32 %v1951_v8, %v1951_v8  ;;  %v1910_v10 = vadd.f32 %v4927_v32, %v1684_v23  ;;  %v1686_v30 = vpop.f32.mrb[155].mxu1 }
 0x23b   : > { %v2083_v24 = vadd.f32 %v2082_v34, %v2052_v51  ;;  %v1952_v44 = vadd.f32 %v1910_v10, %v4870_v52 }
 0x23c   : > { %v1689_v49 = vpop.f32.mrb[156].mxu1 }
 0x23d   : > { %1984 = vst [vmem:[%s4883_s29 + $0xe8] sm:$0xff] %v1952_v44  ;;  %v2015_v45 = vadd.f32 %v2014_v4, %v1952_v44  ;;  %v2053_v3 = vmul.f32 %v1952_v44, %v1952_v44  ;;  %v1915_v47 = vadd.f32 %v1914_v26, %v1689_v49  ;;  %v1691_v63 = vpop.f32.mrb[157].mxu1 }
 0x23f   : > { %v2084_v13 = vadd.f32 %v2083_v24, %v2053_v3  ;;  %v1953_v39 = vadd.f32 %v1915_v47, %v4876_v12 }
 0x240   : > { %v1694_v61 = vpop.f32.mrb[158].mxu1 }
 0x241   : > { %1985 = vst [vmem:[%s4883_s29 + $0xf0] sm:$0xff] %v1953_v39  ;;  %v2016_v31 = vadd.f32 %v2015_v45, %v1953_v39  ;;  %v2054_v19 = vmul.f32 %v1953_v39, %v1953_v39  ;;  %v1920_v32 = vadd.f32 %v4931_v48, %v1694_v61  ;;  %v1696_v16 = vpop.f32.mrb[159].mxu1 }
 0x243   : > { %v2085_v7 = vadd.f32 %v2084_v13, %v2054_v19  ;;  %v1954_v52 = vadd.f32 %v1920_v32, %v4874_v50 }
 0x245   : > { %1986 = vst [vmem:[%s4883_s29 + $0xf8] sm:$0xff] %v1954_v52  ;;  %v2017_v40 = vadd.f32 %v2016_v31, %v1954_v52  ;;  %v2055_v59 = vmul.f32 %v1954_v52, %v1954_v52 }
 0x247   : > { %v2018_v18 = vrot.slane %v2017_v40, 4  ;;  %v2086_v42 = vadd.f32 %v2085_v7, %v2055_v59 }
 0x249   : > { %v2019_v26 = vadd.f32 %v2018_v18, %v2017_v40  ;;  %v2087_v0 = vrot.slane %v2086_v42, 4 }
 0x24b   : > { %v2020_v57 = vrot.slane %v2019_v26, 2  ;;  %v2088_v12 = vadd.f32 %v2087_v0, %v2086_v42 }
 0x24d   : > { %v2021_v2 = vadd.f32 %v2020_v57, %v2019_v26  ;;  %v2089_v56 = vrot.slane %v2088_v12, 2 }
 0x24f   : > { %v2022_v41 = vrot.slane %v2021_v2, 1  ;;  %v2090_v48 = vadd.f32 %v2089_v56, %v2088_v12 }
 0x251   : > { %v2091_v37 = vrot.slane %v2090_v48, 1  ;;  %v2023_v54 = vadd.f32 %v2022_v41, %v2021_v2 }
 0x253   : > { %v2092_v50 = vadd.f32 %v2091_v37, %v2090_v48 }
 0x255   : > { %v2095_v5 = vcombine.low %v2023_v54, %v2092_v50 }
 0x257   : > { %v2102_v60 = vrot.slane %v2095_v5, %v2101_v27 }
 0x259   : > { %v2109_v43 = vrot.slane %v2102_v60, %v2101_v27 }
 0x25b   : > { %2115 = vst.msk [vmem:[%s181_s5] sm:$0x3] %vm2113_vm4, %v2109_v43 }
 0x25c PF: > { %s14_s12 = sadd.s32 1, %s3169_s12  }
 0x25d   : > { %p11_p4 = scmp.ge.s32.totalorder %s14_s12, 4  }
 0x25f   :  { %13 = sbr.rel (!%p11_p4) target bundleno = 1 (0x1), region = 72 }

// kernel: conv_block_pallas.4
= control target key start
LH: loop header
LB: loop body
LE: loop exit
PB: predicated region body
PF: predicated region fallthrough
CT: control target
= control target key end

     0   :  { %s3340_s18 = smov 0   ;;  %s5251_s0 = inlined_call_operand.vmem [shape: f32[2,16,16,128], index: 0, kind: input, shape index: {}]   ;;  %s5252_s1 = inlined_call_operand.vmem [shape: f32[1,128], index: 1, kind: input, shape index: {}]   ;;  %s5253_s2 = inlined_call_operand.vmem [shape: f32[1,128], index: 2, kind: input, shape index: {}]   ;;  %s5254_s3 = inlined_call_operand.vmem [shape: f32[3,384,128], index: 3, kind: input, shape index: {}]   ;;  %s5255_s4 = inlined_call_operand.vmem [shape: f32[2,16,16,128], index: 4, kind: output, shape index: {0}]   ;;  %s5256_s5 = inlined_call_operand.vmem [shape: f32[2,1,256], index: 5, kind: output, shape index: {1}]  }
   0x1 LB: > { %s2366_s19 = sadd.s32 4294967295, %s3305_s18   ;;  %p2370_p0 = scmp.ge.s32.totalorder %s3305_s18, 1  ;;  %s3305_s18 = sphi %s3340_s18, %s16_s18  }
   0x2   : > { %p190_p1 = scmp.lt.s32.totalorder %s3305_s18, 3 }
   0x4   : > { %p191_p2 = pnand %p2370_p0, %p190_p1 }
   0x6   : > { %194 = sbr.rel (%p191_p2) target bundleno = 604 (0x25c), region = 36 }
   0xd   : > { %v2378_v0 = vld [vmem:[%s5254_s3 + $0x180] sm:$0xff]  ;;  %v2379_v1 = vld [vmem:[%s5254_s3 + $0x188] sm:$0xff]  ;;  %p222_p3 = scmp.lt.s32.totalorder %s2366_s19, 1  ;;  %v5258_v3 = vmov 0.0|0.0   ;;  %v2380_v6 = vld [vmem:[%s5254_s3 + $0x190] sm:$0xff]  ;;  %v5257_v23 = vlaneseq }
   0xe   : > { %v2410_v2 = vld [vmem:[%s5254_s3 + $0x280] sm:$0xff]  ;;  %3048 = vmatprep.subr.bf16.mxu0 %v5258_v3  ;;  %v3049_v4 = vpack.c.bf16 %v2379_v1, %v2378_v0  ;;  %v2411_v5 = vld [vmem:[%s5254_s3 + $0x288] sm:$0xff]  ;;  %v2381_v7 = vld [vmem:[%s5254_s3 + $0x198] sm:$0xff] }
   0xf   : > { %v3096_v8 = vpack.c.bf16 %v2411_v5, %v2410_v2  ;;  %v2412_v9 = vld [vmem:[%s5254_s3 + $0x290] sm:$0xff]  ;;  %v2413_v10 = vld [vmem:[%s5254_s3 + $0x298] sm:$0xff]  ;;  %s5447_s19 = smov (!%p222_p3, %s2366_s19), 1  ;;  %v3052_v11 = vpack.c.bf16 %v2381_v7, %v2380_v6  ;;  %v2414_v13 = vld [vmem:[%s5254_s3 + $0x2a0] sm:$0xff]  ;;  %v3437_v36 = vshrl.u32 %v5257_v23, 7 }
  0x10   : > { %3050 = vmatpush1.bf16.msra.mxu0 %v3049_v4  ;;  %v3100_v12 = vpack.c.bf16 %v2413_v10, %v2412_v9  ;;  %v2415_v14 = vld [vmem:[%s5254_s3 + $0x2a8] sm:$0xff]  ;;  %v2382_v15 = vld [vmem:[%s5254_s3 + $0x1a0] sm:$0xff]  ;;  %s2660_s21 = sshll.u32 %s5447_s19, 8  ;;  %v2416_v19 = vld [vmem:[%s5254_s3 + $0x2b0] sm:$0xff] }
  0x11   : > { %3097 = vmatprep.subr.bf16.mxu1 %v3096_v8  ;;  %3051 = vmatprep.subr.bf16.mxu0 %v5258_v3  ;;  %v2383_v16 = vld [vmem:[%s5254_s3 + $0x1a8] sm:$0xff]  ;;  %v3104_v17 = vpack.c.bf16 %v2415_v14, %v2414_v13  ;;  %v2417_v20 = vld [vmem:[%s5254_s3 + $0x2b8] sm:$0xff]  ;;  %s3400_s28 = scalar_lea.vmem %s5251_s0, %s2660_s21  ;;  %v2384_v21 = vld [vmem:[%s5254_s3 + $0x1b0] sm:$0xff]  ;;  %vm520_vm0 = vcmp.lt.s32.totalorder %v3437_v36, 7  ;;  %vm415_vm2 = vcmp.lt.s32.totalorder %v3437_v36, 1  ;;  %vm2662_vm3 = vcmp.ne.s32.totalorder %v3437_v36, 0  ;;  %s5170_s10 = scalar_lea.vmem %s5255_s4, %s2660_s21 }
  0x12   : > { %3099 = vmatpush3.bf16.msra.mxu1 %v3096_v8  ;;  %v3055_v18 = vpack.c.bf16 %v2383_v16, %v2382_v15  ;;  %v2385_v22 = vld [vmem:[%s5254_s3 + $0x1b8] sm:$0xff]  ;;  %v3108_v24 = vpack.c.bf16 %v2417_v20, %v2416_v19  ;;  %v2418_v25 = vld [vmem:[%s5254_s3 + $0x2c0] sm:$0xff]  ;;  %v2419_v26 = vld [vmem:[%s5254_s3 + $0x2c8] sm:$0xff]  ;;  %s2375_s21 = sshll.u32 %s5447_s19, 1 }
  0x13   : > { %3101 = vmatprep.subr.bf16.mxu1 %v3100_v12  ;;  %v236_v27 = vld [vmem:[%s3400_s28] sm:$0xff]  ;;  %v3058_v28 = vpack.c.bf16 %v2385_v22, %v2384_v21  ;;  %v237_v29 = vld [vmem:[%s3400_s28 + $0x8] sm:$0xff]  ;;  %v3112_v37 = vpack.c.bf16 %v2419_v26, %v2418_v25  ;;  %v2420_v38 = vld [vmem:[%s5254_s3 + $0x2d0] sm:$0xff]  ;;  %v3521_v21 = vadd.s32 8, %v3437_v36  ;;  %s235_s13 = scalar_lea.vmem %s5256_s5, %s2375_s21 }
  0x14   : > { %3053 = vmatpush1.bf16.msra.mxu0 %v3052_v11  ;;  %v3420_v30 = vld [vmem:[%s5252_s1] ss:$0 sm:$0xff]  ;;  %v2387_v33 = vld [vmem:[%s5254_s3 + $0x1c8] sm:$0xff]  ;;  %v2421_v39 = vld [vmem:[%s5254_s3 + $0x2d8] sm:$0xff] }
  0x15   : > { %3054 = vmatprep.subr.bf16.mxu0 %v5258_v3  ;;  %v3425_v31 = vld [vmem:[%s5253_s2] ss:$0 sm:$0xff]  ;;  %v275_v34 = vmul.f32 %v3420_v30, %v236_v27  ;;  %v276_v35 = vmul.f32 %v3420_v30, %v237_v29  ;;  %v238_v43 = vld [vmem:[%s3400_s28 + $0x10] sm:$0xff]  ;;  %v239_v44 = vld [vmem:[%s3400_s28 + $0x18] sm:$0xff]  ;;  %v3116_v49 = vpack.c.bf16 %v2421_v39, %v2420_v38  ;;  %vm2663_vm1 = vcmp.ne.s32.totalorder %v3521_v21, 15 }
  0x16   : > { %3103 = vmatpush3.bf16.msra.mxu1 %v3100_v12  ;;  %v2386_v32 = vld [vmem:[%s5254_s3 + $0x1c0] sm:$0xff]  ;;  %v2388_v45 = vld [vmem:[%s5254_s3 + $0x1d0] sm:$0xff]  ;;  %v2389_v46 = vld [vmem:[%s5254_s3 + $0x1d8] sm:$0xff]  ;;  %v277_v54 = vmul.f32 %v3420_v30, %v238_v43  ;;  %v278_v55 = vmul.f32 %v3420_v30, %v239_v44 }
  0x17   : > { %3105 = vmatprep.subr.bf16.mxu1 %v3104_v17  ;;  %v314_v40 = vadd.f32 %v3425_v31, %v275_v34  ;;  %v315_v41 = vadd.f32 %v3425_v31, %v276_v35  ;;  %v3061_v42 = vpack.c.bf16 %v2387_v33, %v2386_v32  ;;  %v2422_v50 = vld [vmem:[%s5254_s3 + $0x2e0] sm:$0xff]  ;;  %v2423_v51 = vld [vmem:[%s5254_s3 + $0x2e8] sm:$0xff]  ;;  %v3064_v56 = vpack.c.bf16 %v2389_v46, %v2388_v45  ;;  %v242_v63 = vld [vmem:[%s3400_s28 + $0x30] sm:$0xff] }
  0x18   : > { %3056 = vmatpush1.bf16.msra.mxu0 %v3055_v18  ;;  %v240_v57 = vld [vmem:[%s3400_s28 + $0x20] sm:$0xff]  ;;  %v241_v58 = vld [vmem:[%s3400_s28 + $0x28] sm:$0xff]  ;;  %v3120_v62 = vpack.c.bf16 %v2423_v51, %v2422_v50  ;;  %v243_v0 = vld [vmem:[%s3400_s28 + $0x38] sm:$0xff]  ;;  %v316_v4 = vadd.f32 %v3425_v31, %v277_v54  ;;  %v317_v5 = vadd.f32 %v3425_v31, %v278_v55  ;;  %v281_v11 = vmul.f32 %v3420_v30, %v242_v63 }
  0x19   : > { %3057 = vmatprep.subr.bf16.mxu0 %v5258_v3  ;;  %v3456_v47 = vmax.f32 %v314_v40, 0.0  ;;  %v3458_v48 = vmax.f32 %v315_v41, 0.0  ;;  %v2390_v59 = vld [vmem:[%s5254_s3 + $0x1e0] sm:$0xff]  ;;  %v2391_v60 = vld [vmem:[%s5254_s3 + $0x1e8] sm:$0xff]  ;;  %v2424_v1 = vld [vmem:[%s5254_s3 + $0x2f0] sm:$0xff]  ;;  %v279_v6 = vmul.f32 %v3420_v30, %v240_v57  ;;  %v280_v7 = vmul.f32 %v3420_v30, %v241_v58 }
  0x1a   : > { %3107 = vmatpush3.bf16.msra.mxu1 %v3104_v17  ;;  %v2425_v2 = vld [vmem:[%s5254_s3 + $0x2f8] sm:$0xff]  ;;  %v3067_v8 = vpack.c.bf16 %v2391_v60, %v2390_v59  ;;  %v2392_v9 = vld [vmem:[%s5254_s3 + $0x1f0] sm:$0xff]  ;;  %v282_v12 = vmul.f32 %v3420_v30, %v243_v0  ;;  %v3511_v14 = vmax.f32 %v316_v4, 0.0  ;;  %v3513_v15 = vmax.f32 %v317_v5, 0.0  ;;  %v244_v18 = vld [vmem:[%s3400_s28 + $0x40] sm:$0xff] }
  0x1b   : > { %3109 = vmatprep.subr.bf16.mxu1 %v3108_v24  ;;  %v488_v52 = vrot.slane %v3456_v47, 1  ;;  %v504_v53 = vrot.slane %v3458_v48, 1  ;;  %752 = vmatprep.mubr.f32.mxu0 %v3456_v47  ;;  %v2393_v10 = vld [vmem:[%s5254_s3 + $0x1f8] sm:$0xff]  ;;  %v3124_v13 = vpack.c.bf16 %v2425_v2, %v2424_v1  ;;  %v318_v16 = vadd.f32 %v3425_v31, %v279_v6  ;;  %v245_v19 = vld [vmem:[%s3400_s28 + $0x48] sm:$0xff]  ;;  %v2394_v22 = vld [vmem:[%s5254_s3 + $0x200] sm:$0xff] }
  0x1c   : > { %3059 = vmatpush1.bf16.msra.mxu0 %v3058_v28  ;;  %v319_v17 = vadd.f32 %v3425_v31, %v280_v7  ;;  %v3070_v20 = vpack.c.bf16 %v2393_v10, %v2392_v9  ;;  %v320_v25 = vadd.f32 %v3425_v31, %v281_v11  ;;  %v321_v26 = vadd.f32 %v3425_v31, %v282_v12  ;;  %v591_v27 = vld [vmem:[%s5254_s3] sm:$0xff]  ;;  %v592_v28 = vld [vmem:[%s5254_s3 + $0x8] sm:$0xff]  ;;  %v246_v38 = vld [vmem:[%s3400_s28 + $0x50] sm:$0xff] }
  0x1d   : > { %3060 = vmatprep.subr.bf16.mxu0 %v5258_v3  ;;  %v3487_v61 = vsel %vm520_vm0, %v488_v52, %v504_v53  ;;  %v283_v29 = vmul.f32 %v3420_v30, %v244_v18  ;;  %v284_v32 = vmul.f32 %v3420_v30, %v245_v19  ;;  %v489_v33 = vrot.slane %v3511_v14, 1  ;;  %v247_v40 = vld [vmem:[%s3400_s28 + $0x58] sm:$0xff]  ;;  %v248_v59 = vld [vmem:[%s3400_s28 + $0x60] sm:$0xff]  ;;  %v249_v60 = vld [vmem:[%s3400_s28 + $0x68] sm:$0xff] }
  0x1e   : > { %3111 = vmatpush3.bf16.msra.mxu1 %v3108_v24  ;;  %2840 = vmatprep.mubr.f32.mxu1 %v3487_v61  ;;  %v2395_v24 = vld [vmem:[%s5254_s3 + $0x208] sm:$0xff]  ;;  %v505_v34 = vrot.slane %v3513_v15, 1  ;;  %v3541_v35 = vmax.f32 %v318_v16, 0.0  ;;  %v3129_v41 = vpack.c.bf16 %v592_v28, %v591_v27  ;;  %v2397_v43 = vld [vmem:[%s5254_s3 + $0x218] sm:$0xff]  ;;  %v3555_v44 = vmax.f32 %v320_v25, 0.0  ;;  %v2398_v63 = vld [vmem:[%s5254_s3 + $0x220] sm:$0xff] }
  0x1f   : > { %3113 = vmatprep.subr.bf16.mxu1 %v3112_v37  ;;  %v3073_v39 = vpack.c.bf16 %v2395_v24, %v2394_v22  ;;  %v3557_v45 = vmax.f32 %v321_v26, 0.0  ;;  %v3565_v46 = vsel %vm520_vm0, %v504_v53, %v488_v52  ;;  %v594_v50 = vld [vmem:[%s5254_s3 + $0x18] sm:$0xff]  ;;  %v322_v51 = vadd.f32 %v3425_v31, %v283_v29  ;;  %v2399_v0 = vld [vmem:[%s5254_s3 + $0x228] sm:$0xff]  ;;  %v595_v5 = vld [vmem:[%s5254_s3 + $0x20] sm:$0xff] }
  0x20   : > { %3062 = vmatpush1.bf16.msra.mxu0 %v3061_v42  ;;  %v2396_v42 = vld [vmem:[%s5254_s3 + $0x210] sm:$0xff]  ;;  %v323_v54 = vadd.f32 %v3425_v31, %v284_v32  ;;  %v285_v55 = vmul.f32 %v3420_v30, %v246_v38  ;;  %v3579_v52 = vsel %vm520_vm0, %v489_v33, %v505_v34  ;;  %v490_v53 = vrot.slane %v3541_v35, 1  ;;  %v596_v6 = vld [vmem:[%s5254_s3 + $0x28] sm:$0xff]  ;;  %v251_v19 = vld [vmem:[%s3400_s28 + $0x78] sm:$0xff] }
  0x21   : > { %3063 = vmatprep.subr.bf16.mxu0 %v5258_v3  ;;  %v286_v57 = vmul.f32 %v3420_v30, %v247_v40  ;;  %v3076_v58 = vpack.c.bf16 %v2397_v43, %v2396_v42  ;;  %v491_v1 = vrot.slane %v3555_v44, 1  ;;  %v507_v2 = vrot.slane %v3557_v45, 1  ;;  %v250_v16 = vld [vmem:[%s3400_s28 + $0x70] sm:$0xff]  ;;  %v2401_v25 = vld [vmem:[%s5254_s3 + $0x238] sm:$0xff]  ;;  %v252_v27 = vld [vmem:[%s3400_s28 + $0x80] sm:$0xff] }
  0x22   : > { %3115 = vmatpush3.bf16.msra.mxu1 %v3112_v37  ;;  %v3543_v37 = vmax.f32 %v319_v17, 0.0  ;;  %v3601_v4 = vsel %vm520_vm0, %v505_v34, %v489_v33  ;;  %v3609_v7 = vmax.f32 %v322_v51, 0.0  ;;  %v324_v9 = vadd.f32 %v3425_v31, %v285_v55  ;;  %v2400_v18 = vld [vmem:[%s5254_s3 + $0x230] sm:$0xff]  ;;  %v598_v28 = vld [vmem:[%s5254_s3 + $0x38] sm:$0xff]  ;;  %v3655_v33 = vld [vmem:[%s5254_s3 + $0x240] sm:$0xff] }
  0x23   : > { %3117 = vmatprep.subr.bf16.mxu1 %v3116_v49  ;;  %v325_v11 = vadd.f32 %v3425_v31, %v286_v57  ;;  %v287_v12 = vmul.f32 %v3420_v30, %v248_v59  ;;  %v3079_v17 = vpack.c.bf16 %v2399_v0, %v2398_v63  ;;  %v3135_v22 = vpack.c.bf16 %v596_v6, %v595_v5  ;;  %v597_v26 = vld [vmem:[%s5254_s3 + $0x30] sm:$0xff]  ;;  %v3660_v34 = vld [vmem:[%s5254_s3 + $0x248] sm:$0xff]  ;;  %v3669_v40 = vld [vmem:[%s5254_s3 + $0x40] sm:$0xff] }
  0x24   : > { %3065 = vmatpush1.bf16.msra.mxu0 %v3064_v56  ;;  %v506_v56 = vrot.slane %v3543_v37, 1  ;;  %v3637_v24 = vsel %vm520_vm0, %v491_v1, %v507_v2  ;;  %v492_v29 = vrot.slane %v3609_v7, 1  ;;  %v3662_v38 = vmax.f32 %v324_v9, 0.0  ;;  %v3685_v55 = vld [vmem:[%s5254_s3 + $0x250] sm:$0xff]  ;;  %v255_v63 = vld [vmem:[%s3400_s28 + $0x98] sm:$0xff]  ;;  %v3724_v5 = vld [vmem:[%s5254_s3 + $0x260] sm:$0xff] }
  0x25   : > { %3066 = vmatprep.subr.bf16.mxu0 %v5258_v3  ;;  %5341 = vst [vmem:[#allocation4_spill] sm:$0xff] %v3637_v24  ;;  %v326_v42 = vadd.f32 %v3425_v31, %v287_v12  ;;  %v3082_v51 = vpack.c.bf16 %v2401_v25, %v2400_v18  ;;  %v3699_v57 = vsel %vm520_vm0, %v507_v2, %v491_v1  ;;  %v3719_v2 = vld [vmem:[%s5254_s3 + $0x58] sm:$0xff]  ;;  %v3729_v6 = vld [vmem:[%s5254_s3 + $0x268] sm:$0xff] }
  0x26   : > { %3119 = vmatpush3.bf16.msra.mxu1 %v3116_v49  ;;  %v593_v49 = vld [vmem:[%s5254_s3 + $0x10] sm:$0xff]  ;;  %v3617_v10 = vsel %vm520_vm0, %v490_v53, %v506_v56  ;;  %5342 = vst [vmem:[#allocation5_spill] sm:$0xff] %v3662_v38  ;;  %5343 = vst [vmem:[#allocation6_spill] sm:$0xff] %v3699_v57  ;;  %v3085_v59 = vpack.c.bf16 %v3660_v34, %v3655_v33  ;;  %v493_v1 = vrot.slane %v3662_v38, 1  ;;  %v3747_v18 = vld [vmem:[%s5254_s3 + $0x68] sm:$0xff] }
  0x27   : > { %3121 = vmatprep.subr.bf16.mxu1 %v3120_v62  ;;  %5339 = vst [vmem:[#allocation2_spill] sm:$0xff] %v3617_v10 }
  0x28   : > { %3068 = vmatpush1.bf16.msra.mxu0 %v3067_v8  ;;  %v3611_v8 = vmax.f32 %v323_v54, 0.0  ;;  %v3680_v54 = vld [vmem:[%s5254_s3 + $0x48] sm:$0xff] }
  0x29   : > { %3069 = vmatprep.subr.bf16.mxu0 %v5258_v3 }
  0x2a   : > { %3123 = vmatpush3.bf16.msra.mxu1 %v3120_v62  ;;  %v3132_v62 = vpack.c.bf16 %v594_v50, %v593_v49  ;;  %v508_v32 = vrot.slane %v3611_v8, 1  ;;  %v290_v49 = vmul.f32 %v3420_v30, %v251_v19  ;;  %v253_v50 = vld [vmem:[%s3400_s28 + $0x88] sm:$0xff] }
  0x2b   : > { %3125 = vmatprep.subr.bf16.mxu1 %v3124_v13 }
  0x2c   : > { %3071 = vmatpush1.bf16.msra.mxu0 %v3070_v20  ;;  %v3633_v20 = vsel %vm520_vm0, %v506_v56, %v490_v53  ;;  %v3690_v53 = vld [vmem:[%s5254_s3 + $0x258] sm:$0xff]  ;;  %v291_v56 = vmul.f32 %v3420_v30, %v252_v27  ;;  %v3713_v0 = vsel %vm520_vm0, %v492_v29, %v508_v32  ;;  %v329_v19 = vadd.f32 %v3425_v31, %v290_v49 }
  0x2d   : > { %3072 = vmatprep.subr.bf16.mxu0 %v5258_v3  ;;  %5340 = vst [vmem:[#allocation3_spill] sm:$0xff] %v3633_v20  ;;  %5344 = vst [vmem:[#allocation7_spill] sm:$0xff] %v3713_v0  ;;  %v294_v27 = vmul.f32 %v3420_v30, %v255_v63 }
  0x2e   : > { %3127 = vmatpush3.bf16.msra.mxu1 %v3124_v13  ;;  %v288_v13 = vmul.f32 %v3420_v30, %v249_v60  ;;  %v3706_v60 = vld [vmem:[%s5254_s3 + $0x50] sm:$0xff]  ;;  %v330_v25 = vadd.f32 %v3425_v31, %v291_v56  ;;  %v3795_v56 = vmax.f32 %v329_v19, 0.0  ;;  %v264_v19 = vld [vmem:[%s3400_s28 + $0xe0] sm:$0xff] }
  0x2f   : > { %3128 = vmatprep.subr.bf16.mxu1 %v5258_v3  ;;  %v3144_v33 = vpack.c.bf16 %v3719_v2, %v3706_v60  ;;  %v333_v2 = vadd.f32 %v3425_v31, %v294_v27 }
  0x30   : > { %3074 = vmatpush1.bf16.msra.mxu0 %v3073_v39  ;;  %v289_v39 = vmul.f32 %v3420_v30, %v250_v16  ;;  %v327_v43 = vadd.f32 %v3425_v31, %v288_v13  ;;  %v3735_v13 = vmax.f32 %v326_v42, 0.0  ;;  %v3778_v42 = vsel %vm520_vm0, %v508_v32, %v492_v29 }
  0x31   : > { %2841 = vmatmul.mubr.msk.f32.vlgmr.msra.gmra.mrb[0].mxu1 %vm2663_vm1, %v3565_v46  ;;  %3075 = vmatprep.subr.bf16.mxu0 %v5258_v3  ;;  %5346 = vst [vmem:[#allocation9_spill] sm:$0xff] %v3778_v42 }
  0x32   : > { %3130 = vmatpush1.bf16.msra.mxu1 %v3129_v41  ;;  %2843 = vmatprep.mubr.f32.mxu1 %v3579_v52  ;;  %v3671_v41 = vmax.f32 %v325_v11, 0.0  ;;  %v328_v9 = vadd.f32 %v3425_v31, %v289_v39  ;;  %v292_v11 = vmul.f32 %v3420_v30, %v253_v50  ;;  %5345 = vst [vmem:[#allocation8_spill] sm:$0xff] %v3735_v13  ;;  %v3737_v16 = vmax.f32 %v327_v43, 0.0  ;;  %v3768_v39 = vld [vmem:[%s5254_s3 + $0x270] sm:$0xff] }
  0x33   : > { %3131 = vmatprep.subr.bf16.mxu1 %v5258_v3  ;;  %v494_v29 = vrot.slane %v3735_v13, 1  ;;  %v303_v43 = vmul.f32 %v3420_v30, %v264_v19 }
  0x34   : > { %3077 = vmatpush1.bf16.msra.mxu0 %v3076_v58  ;;  %v3138_v58 = vpack.c.bf16 %v598_v28, %v597_v26  ;;  %v509_v12 = vrot.slane %v3671_v41, 1  ;;  %v3088_v28 = vpack.c.bf16 %v3690_v53, %v3685_v55  ;;  %v3782_v49 = vmax.f32 %v328_v9, 0.0  ;;  %v262_v55 = vld [vmem:[%s3400_s28 + $0xd0] sm:$0xff] }
  0x35   : > { %2844 = vmatmul.mubr.msk.f32.gmra.mrb[2].mxu1 %vm2663_vm1, %v3601_v4  ;;  %3078 = vmatprep.subr.bf16.mxu0 %v5258_v3  ;;  %v331_v50 = vadd.f32 %v3425_v31, %v292_v11  ;;  %v510_v32 = vrot.slane %v3737_v16, 1  ;;  %v301_v11 = vmul.f32 %v3420_v30, %v262_v55 }
  0x36   : > { %3133 = vmatpush1.bf16.msra.mxu1 %v3132_v62  ;;  %2846 = vmatprep.mubr.f32.mxu1 %v3617_v10  ;;  %v254_v62 = vld [vmem:[%s3400_s28 + $0x90] sm:$0xff]  ;;  %v3791_v53 = vsel %vm520_vm0, %v493_v1, %v509_v12  ;;  %v495_v27 = vrot.slane %v3782_v49, 1  ;;  %v261_v10 = vld [vmem:[%s3400_s28 + $0xc8] sm:$0xff] }
  0x37   : > { %3134 = vmatprep.subr.bf16.mxu1 %v5258_v3  ;;  %v293_v26 = vmul.f32 %v3420_v30, %v254_v62  ;;  %5347 = vst [vmem:[#allocation10_spill] sm:$0xff] %v3791_v53  ;;  %v3800_v62 = vmax.f32 %v330_v25, 0.0  ;;  %v265_v25 = vld [vmem:[%s3400_s28 + $0xe8] sm:$0xff]  ;;  %v3820_v23 = vmax.f32 %v331_v50, 0.0  ;;  %v258_v50 = vld [vmem:[%s3400_s28 + $0xb0] sm:$0xff]  ;;  %v3840_v55 = vadd.f32 %v3425_v31, %v301_v11 }
  0x38   : > { %3080 = vmatpush1.bf16.msra.mxu0 %v3079_v17  ;;  %v3742_v17 = vld [vmem:[%s5254_s3 + $0x60] sm:$0xff]  ;;  %v304_v34 = vmul.f32 %v3420_v30, %v265_v25  ;;  %v297_v25 = vmul.f32 %v3420_v30, %v258_v50  ;;  %v5355_v50 = vpack.c.bf16 %v3729_v6, %v3724_v5 }
  0x39   : > { %2847 = vmatmul.mubr.msk.f32.gmra.mrb[4].mxu1 %vm2663_vm1, %v3633_v20  ;;  %3081 = vmatprep.subr.bf16.mxu0 %v5258_v3  ;;  %v332_v63 = vadd.f32 %v3425_v31, %v293_v26  ;;  %v3817_v26 = vsel %vm520_vm0, %v509_v12, %v493_v1  ;;  %5349 = vst [vmem:[#allocation12_spill] sm:$0xff] %v3820_v23  ;;  %v511_v1 = vrot.slane %v3795_v56, 1  ;;  %v3836_v12 = vld [vmem:[%s5254_s3 + $0x70] sm:$0xff]  ;;  %v512_v19 = vrot.slane %v3820_v23, 1  ;;  %v260_v20 = vld [vmem:[%s3400_s28 + $0xc0] sm:$0xff] }
  0x3a   : > { %3136 = vmatpush1.bf16.msra.mxu1 %v3135_v22  ;;  %2849 = vmatprep.mubr.f32.mxu1 %v3637_v24  ;;  %v3141_v22 = vpack.c.bf16 %v3680_v54, %v3669_v40  ;;  %v3773_v40 = vld [vmem:[%s5254_s3 + $0x278] sm:$0xff]  ;;  %v257_v54 = vld [vmem:[%s3400_s28 + $0xa8] sm:$0xff]  ;;  %5348 = vst [vmem:[#allocation11_spill] sm:$0xff] %v3817_v26  ;;  %v399_v24 = vrot.slane %v3458_v48, 7 }
  0x3b   : > { %3137 = vmatprep.subr.bf16.mxu1 %v5258_v3  ;;  %v3857_v11 = vmax.f32 %v332_v63, 0.0  ;;  %v3871_v63 = vadd.f32 %v3425_v31, %v304_v34 }
  0x3c   : > { %3083 = vmatpush1.bf16.msra.mxu0 %v3082_v51  ;;  %v256_v51 = vld [vmem:[%s3400_s28 + $0xa0] sm:$0xff] }
  0x3d   : > { %2850 = vmatmul.mubr.msk.f32.gmra.mrb[6].mxu1 %vm2663_vm1, %v3699_v57  ;;  %3084 = vmatprep.subr.bf16.mxu0 %v5258_v3  ;;  %v295_v9 = vmul.f32 %v3420_v30, %v256_v51  ;;  %5353 = vst [vmem:[#allocation15_spill] sm:$0xff] %v3857_v11  ;;  %v383_v57 = vrot.slane %v3456_v47, 7 }
  0x3e   : > { %3139 = vmatpush1.bf16.msra.mxu1 %v3138_v58  ;;  %2852 = vmatprep.mubr.f32.mxu1 %v3713_v0  ;;  %v263_v58 = vld [vmem:[%s3400_s28 + $0xd8] sm:$0xff] }
  0x3f   : > { %3140 = vmatprep.subr.bf16.mxu1 %v5258_v3  ;;  %v302_v51 = vmul.f32 %v3420_v30, %v263_v58  ;;  %v606_v58 = vld [vmem:[%s5254_s3 + $0x78] sm:$0xff] }
  0x40   : > { %3086 = vmatpush1.bf16.msra.mxu0 %v3085_v59  ;;  %v296_v59 = vmul.f32 %v3420_v30, %v257_v54  ;;  %v3826_v54 = vsel %vm520_vm0, %v494_v29, %v510_v32  ;;  %v267_v0 = vld [vmem:[%s3400_s28 + $0xf8] sm:$0xff] }
  0x41   : > { %2853 = vmatmul.mubr.msk.f32.gmra.mrb[8].mxu1 %vm2663_vm1, %v3778_v42  ;;  %3087 = vmatprep.subr.bf16.mxu0 %v5258_v3  ;;  %5350 = vst [vmem:[#allocation13_spill] sm:$0xff] %v3826_v54  ;;  %v3848_v60 = vadd.f32 %v3425_v31, %v302_v51  ;;  %v334_v42 = vadd.f32 %v3425_v31, %v295_v9 }
  0x42   : > { %3142 = vmatpush1.bf16.msra.mxu1 %v3141_v22  ;;  %2855 = vmatprep.mubr.f32.mxu1 %v3791_v53  ;;  %v3830_v22 = vsel %vm520_vm0, %v510_v32, %v494_v29  ;;  %v496_v29 = vrot.slane %v3800_v62, 1  ;;  %v259_v32 = vld [vmem:[%s3400_s28 + $0xb8] sm:$0xff]  ;;  %v3859_v53 = vmax.f32 %v333_v2, 0.0  ;;  %v335_v51 = vadd.f32 %v3425_v31, %v296_v59  ;;  %v623_v2 = vld [vmem:[%s5254_s3 + $0x100] sm:$0xff] }
  0x43   : > { %3143 = vmatprep.subr.bf16.mxu1 %v5258_v3  ;;  %5351 = vst [vmem:[#allocation14_spill] sm:$0xff] %v3830_v22  ;;  %v266_v3 = vld [vmem:[%s3400_s28 + $0xf0] sm:$0xff]  ;;  %v3882_v9 = vsel %vm520_vm0, %v495_v27, %v511_v1  ;;  %v298_v59 = vmul.f32 %v3420_v30, %v259_v32  ;;  %v608_v32 = vld [vmem:[%s5254_s3 + $0x88] sm:$0xff] }
  0x44   : > { %3089 = vmatpush1.bf16.msra.mxu0 %v3088_v28  ;;  %v5352_v28 = vmov 0.0|0.0   ;;  %5354 = vst [vmem:[#allocation16_spill] sm:$0xff] %v3882_v9  ;;  %v305_v34 = vmul.f32 %v3420_v30, %v266_v3  ;;  %v497_v3 = vrot.slane %v3857_v11, 1  ;;  %v513_v5 = vrot.slane %v3859_v53, 1 }
  0x45   : > { %2856 = vmatmul.mubr.msk.f32.gmra.mrb[10].mxu1 %vm2663_vm1, %v3817_v26  ;;  %3090 = vmatprep.subr.bf16.mxu0 %v5352_v28  ;;  %v3868_v26 = vadd.f32 %v3425_v31, %v303_v43  ;;  %v3150_v43 = vpack.c.bf16 %v606_v58, %v3836_v12  ;;  %v306_v12 = vmul.f32 %v3420_v30, %v267_v0  ;;  %v607_v58 = vld [vmem:[%s5254_s3 + $0x80] sm:$0xff] }
  0x46   : > { %3145 = vmatpush1.bf16.msra.mxu1 %v3144_v33  ;;  %2858 = vmatprep.mubr.f32.mxu1 %v3826_v54  ;;  %v624_v33 = vld [vmem:[%s5254_s3 + $0x108] sm:$0xff]  ;;  %v3892_v54 = vsel %vm520_vm0, %v511_v1, %v495_v27  ;;  %v3906_v6 = vadd.f32 %v3425_v31, %v305_v34  ;;  %v5357_v1 = vpack.c.bf16 %v3747_v18, %v3742_v17  ;;  %v3922_v34 = vmax.f32 %v334_v42, 0.0 }
  0x47   : > { %3146 = vmatprep.subr.bf16.mxu1 %v5352_v28  ;;  %5356 = vst [vmem:[#allocation17_spill] sm:$0xff] %v3892_v54  ;;  %v3176_v27 = vpack.c.bf16 %v624_v33, %v623_v2  ;;  %v3914_v0 = vsel %vm520_vm0, %v496_v29, %v512_v19  ;;  %v3924_v2 = vmax.f32 %v335_v51, 0.0  ;;  %v336_v17 = vadd.f32 %v3425_v31, %v297_v25  ;;  %v625_v25 = vld [vmem:[%s5254_s3 + $0x110] sm:$0xff] }
  0x48   : > { %3092 = vmatpush1.bf16.msra.mxu0 %v5355_v50  ;;  %5358 = vst [vmem:[#allocation18_spill] sm:$0xff] %v3914_v0  ;;  %v337_v18 = vadd.f32 %v3425_v31, %v298_v59  ;;  %v299_v33 = vmul.f32 %v3420_v30, %v260_v20  ;;  %v300_v50 = vmul.f32 %v3420_v30, %v261_v10  ;;  %v626_v30 = vld [vmem:[%s5254_s3 + $0x118] sm:$0xff] }
  0x49   : > { %2859 = vmatmul.mubr.msk.f32.gmra.mrb[12].mxu1 %vm2663_vm1, %v3830_v22  ;;  %3093 = vmatprep.subr.bf16.mxu0 %v5352_v28  ;;  %v5359_v42 = vpack.c.bf16 %v3773_v40, %v3768_v39  ;;  %v3940_v51 = vsel %vm415_vm2, %v399_v24, %v383_v57  ;;  %v3953_v10 = vsel %vm520_vm0, %v512_v19, %v496_v29  ;;  %v498_v40 = vrot.slane %v3922_v34, 1  ;;  %v627_v29 = vld [vmem:[%s5254_s3 + $0x120] sm:$0xff]  ;;  %v628_v19 = vld [vmem:[%s5254_s3 + $0x128] sm:$0xff] }
  0x4a   : > { %3148 = vmatpush1.bf16.msra.mxu1 %v5357_v1  ;;  %2861 = vmatprep.mubr.f32.mxu1 %v3882_v9  ;;  %v3932_v1 = vadd.f32 %v3425_v31, %v306_v12  ;;  %5360 = vst [vmem:[#allocation19_spill] sm:$0xff] %v3953_v10  ;;  %v3153_v20 = vpack.c.bf16 %v608_v32, %v607_v58  ;;  %v514_v59 = vrot.slane %v3924_v2, 1  ;;  %v3962_v12 = vmax.f32 %v336_v17, 0.0  ;;  %v610_v58 = vld [vmem:[%s5254_s3 + $0x98] sm:$0xff] }
  0x4b   : > { %3149 = vmatprep.subr.bf16.mxu1 %v5352_v28  ;;  %v3958_v39 = vsel %vm520_vm0, %v497_v3, %v513_v5  ;;  %v3980_v32 = vmax.f32 %v337_v18, 0.0  ;;  %v338_v17 = vadd.f32 %v3425_v31, %v299_v33  ;;  %v384_v9 = vrot.slane %v3511_v14, 7  ;;  %v630_v33 = vld [vmem:[%s5254_s3 + $0x138] sm:$0xff] }
  0x4c   : > { %3095 = vmatpush1.bf16.msra.mxu0 %v5359_v42  ;;  %5361 = vst [vmem:[#allocation20_spill] sm:$0xff] %v3958_v39  ;;  %v339_v42 = vadd.f32 %v3425_v31, %v300_v50  ;;  %v400_v22 = vrot.slane %v3513_v15, 7  ;;  %v3184_v18 = vpack.c.bf16 %v628_v19, %v627_v29  ;;  %v3997_v31 = vsel %vm520_vm0, %v513_v5, %v497_v3  ;;  %v611_v3 = vld [vmem:[%s5254_s3 + $0xa0] sm:$0xff]  ;;  %v612_v5 = vld [vmem:[%s5254_s3 + $0xa8] sm:$0xff] }
  0x4d   : > { %2862 = vmatmul.mubr.msk.f32.gmra.mrb[14].mxu1 %vm2663_vm1, %v3892_v54  ;;  %3177 = vmatprep.subr.bf16.mxu0 %v3176_v27  ;;  %v3987_v54 = vsel %vm415_vm2, %v383_v57, %v399_v24  ;;  %5362 = vst [vmem:[#allocation21_spill] sm:$0xff] %v3997_v31  ;;  %v4001_v57 = vsel %vm520_vm0, %v498_v40, %v514_v59  ;;  %v499_v50 = vrot.slane %v3962_v12, 1 }
  0x4e   : > { %3151 = vmatpush1.bf16.msra.mxu1 %v3150_v43  ;;  %2864 = vmatprep.mubr.f32.mxu1 %v3914_v0  ;;  %v609_v43 = vld [vmem:[%s5254_s3 + $0x90] sm:$0xff]  ;;  %v3180_v0 = vpack.c.bf16 %v626_v30, %v625_v25  ;;  %5363 = vst [vmem:[#allocation22_spill] sm:$0xff] %v4001_v57  ;;  %v515_v25 = vrot.slane %v3980_v32, 1  ;;  %v4019_v30 = vmax.f32 %v338_v17, 0.0  ;;  %v4026_v29 = vsel %vm415_vm2, %v400_v22, %v384_v9 }
  0x4f   : > { %2427 = vmatmul.mubr.msk.f32.vlgmr.msra.gmra.mrb[0].mxu0 %vm2662_vm3, %v3940_v51  ;;  %3152 = vmatprep.subr.bf16.mxu1 %v5352_v28  ;;  %v3156_v24 = vpack.c.bf16 %v610_v58, %v609_v43  ;;  %v4034_v43 = vsel %vm520_vm0, %v514_v59, %v498_v40  ;;  %v3159_v58 = vpack.c.bf16 %v612_v5, %v611_v3  ;;  %v4037_v17 = vmax.f32 %v3840_v55, 0.0  ;;  %v614_v40 = vld [vmem:[%s5254_s3 + $0xb8] sm:$0xff] }
  0x50   : > { %757 = vmatprep.mubr.f32.mxu0 %v3458_v48  ;;  %3179 = vmatpush3.bf16.msra.mxu0 %v3176_v27  ;;  %v629_v27 = vld [vmem:[%s5254_s3 + $0x130] sm:$0xff]  ;;  %5364 = vst [vmem:[#allocation23_spill] sm:$0xff] %v4019_v30  ;;  %5366 = vst [vmem:[#allocation25_spill] sm:$0xff] %v4034_v43  ;;  %v4054_v55 = vsel %vm520_vm0, %v499_v50, %v515_v25  ;;  %v500_v59 = vrot.slane %v4019_v30, 1  ;;  %v385_v3 = vrot.slane %v3541_v35, 7  ;;  %v401_v5 = vrot.slane %v3543_v37, 7 }
  0x51   : > { %2865 = vmatmul.mubr.msk.f32.gmra.mrb[16].mxu1 %vm2663_vm1, %v3953_v10  ;;  %3181 = vmatprep.subr.bf16.mxu0 %v3180_v0  ;;  %v3188_v19 = vpack.c.bf16 %v630_v33, %v629_v27  ;;  %5367 = vst [vmem:[#allocation26_spill] sm:$0xff] %v4037_v17  ;;  %5369 = vst [vmem:[#allocation28_spill] sm:$0xff] %v4054_v55  ;;  %v4067_v33 = vsel %vm415_vm2, %v384_v9, %v400_v22  ;;  %v501_v9 = vrot.slane %v4037_v17, 1 }
  0x52   : > { %3154 = vmatpush1.bf16.msra.mxu1 %v3153_v20  ;;  %2867 = vmatprep.mubr.f32.mxu1 %v3958_v39  ;;  %v4021_v20 = vmax.f32 %v339_v42, 0.0  ;;  %v4040_v42 = vmax.f32 %v3848_v60, 0.0  ;;  %v613_v60 = vld [vmem:[%s5254_s3 + $0xb0] sm:$0xff]  ;;  %v402_v10 = vrot.slane %v3557_v45, 7 }
  0x53   : > { %758 = vmatmul.mubr.f32.gmra.mrb[2].mxu0 %v3987_v54  ;;  %3155 = vmatprep.subr.bf16.mxu1 %v5352_v28  ;;  %v3162_v22 = vpack.c.bf16 %v614_v40, %v613_v60  ;;  %v4103_v60 = vmax.f32 %v3871_v63, 0.0  ;;  %v4108_v40 = vsel %vm415_vm2, %v401_v5, %v385_v3 }
  0x54   : > { %5365 = vst [vmem:[#allocation24_spill] sm:$0xff] %v4021_v20  ;;  %762 = vmatprep.mubr.f32.mxu0 %v3511_v14  ;;  %3183 = vmatpush3.bf16.msra.mxu0 %v3180_v0  ;;  %5368 = vst [vmem:[#allocation27_spill] sm:$0xff] %v4040_v42  ;;  %v631_v0 = vld [vmem:[%s5254_s3 + $0x140] sm:$0xff]  ;;  %v516_v27 = vrot.slane %v4021_v20, 1  ;;  %v517_v39 = vrot.slane %v4040_v42, 1 }
  0x55   : > { %2868 = vmatmul.mubr.msk.f32.gmra.mrb[18].mxu1 %vm2663_vm1, %v3997_v31  ;;  %3185 = vmatprep.subr.bf16.mxu0 %v3184_v18  ;;  %v4077_v31 = vsel %vm520_vm0, %v515_v25, %v499_v50  ;;  %v615_v25 = vld [vmem:[%s5254_s3 + $0xc0] sm:$0xff]  ;;  %5373 = vst [vmem:[#allocation32_spill] sm:$0xff] %v4103_v60 }
  0x56   : > { %3157 = vmatpush1.bf16.msra.mxu1 %v3156_v24  ;;  %2870 = vmatprep.mubr.f32.mxu1 %v4001_v57  ;;  %v632_v24 = vld [vmem:[%s5254_s3 + $0x148] sm:$0xff]  ;;  %5370 = vst [vmem:[#allocation29_spill] sm:$0xff] %v4077_v31  ;;  %v4091_v50 = vsel %vm520_vm0, %v500_v59, %v516_v27 }
  0x57   : > { %2429 = vmatmul.mubr.msk.f32.gmra.mrb[4].mxu0 %vm2662_vm3, %v4026_v29  ;;  %3158 = vmatprep.subr.bf16.mxu1 %v5352_v28  ;;  %v3192_v57 = vpack.c.bf16 %v632_v24, %v631_v0  ;;  %v634_v0 = vld [vmem:[%s5254_s3 + $0x158] sm:$0xff]  ;;  %5371 = vst [vmem:[#allocation30_spill] sm:$0xff] %v4091_v50  ;;  %v4100_v24 = vmax.f32 %v3868_v26, 0.0  ;;  %v4116_v26 = vsel %vm520_vm0, %v516_v27, %v500_v59  ;;  %v617_v59 = vld [vmem:[%s5254_s3 + $0xd0] sm:$0xff] }
  0x58   : > { %767 = vmatprep.mubr.f32.mxu0 %v3513_v15  ;;  %3187 = vmatpush3.bf16.msra.mxu0 %v3184_v18  ;;  %v633_v18 = vld [vmem:[%s5254_s3 + $0x150] sm:$0xff]  ;;  %5374 = vst [vmem:[#allocation33_spill] sm:$0xff] %v4116_v26  ;;  %v618_v27 = vld [vmem:[%s5254_s3 + $0xd8] sm:$0xff] }
  0x59   : > { %2871 = vmatmul.mubr.msk.f32.gmra.mrb[20].mxu1 %vm2663_vm1, %v4034_v43  ;;  %3189 = vmatprep.subr.bf16.mxu0 %v3188_v19  ;;  %5372 = vst [vmem:[#allocation31_spill] sm:$0xff] %v4100_v24  ;;  %v4120_v43 = vsel %vm520_vm0, %v501_v9, %v517_v39 }
  0x5a   : > { %3160 = vmatpush1.bf16.msra.mxu1 %v3159_v58  ;;  %2873 = vmatprep.mubr.f32.mxu1 %v4054_v55  ;;  %v616_v58 = vld [vmem:[%s5254_s3 + $0xc8] sm:$0xff]  ;;  %v3196_v55 = vpack.c.bf16 %v634_v0, %v633_v18  ;;  %5375 = vst [vmem:[#allocation34_spill] sm:$0xff] %v4120_v43  ;;  %v518_v0 = vrot.slane %v4103_v60, 1 }
  0x5b   : > { %768 = vmatmul.mubr.f32.gmra.mrb[6].mxu0 %v4067_v33  ;;  %3161 = vmatprep.subr.bf16.mxu1 %v5352_v28  ;;  %v3165_v63 = vpack.c.bf16 %v616_v58, %v615_v25  ;;  %v636_v18 = vld [vmem:[%s5254_s3 + $0x168] sm:$0xff]  ;;  %v4141_v25 = vmax.f32 %v3906_v6, 0.0  ;;  %v4144_v58 = vmax.f32 %v3932_v1, 0.0  ;;  %v4159_v1 = vsel %vm520_vm0, %v517_v39, %v501_v9  ;;  %v619_v39 = vld [vmem:[%s5254_s3 + $0xe0] sm:$0xff] }
  0x5c   : > { %772 = vmatprep.mubr.f32.mxu0 %v3541_v35  ;;  %3191 = vmatpush3.bf16.msra.mxu0 %v3188_v19  ;;  %v635_v19 = vld [vmem:[%s5254_s3 + $0x160] sm:$0xff]  ;;  %5378 = vst [vmem:[#allocation37_spill] sm:$0xff] %v4159_v1  ;;  %v620_v9 = vld [vmem:[%s5254_s3 + $0xe8] sm:$0xff] }
  0x5d   : > { %2874 = vmatmul.mubr.msk.f32.gmra.mrb[22].mxu1 %vm2663_vm1, %v4077_v31  ;;  %3193 = vmatprep.subr.bf16.mxu0 %v3192_v57  ;;  %5376 = vst [vmem:[#allocation35_spill] sm:$0xff] %v4141_v25  ;;  %5377 = vst [vmem:[#allocation36_spill] sm:$0xff] %v4144_v58  ;;  %v386_v31 = vrot.slane %v3555_v44, 7  ;;  %v3200_v6 = vpack.c.bf16 %v636_v18, %v635_v19  ;;  %v503_v19 = vrot.slane %v4141_v25, 1  ;;  %v519_v18 = vrot.slane %v4144_v58, 1 }
  0x5e   : > { %3163 = vmatpush1.bf16.msra.mxu1 %v3162_v22  ;;  %2876 = vmatprep.mubr.f32.mxu1 %v4091_v50  ;;  %v502_v22 = vrot.slane %v4100_v24, 1  ;;  %v4149_v50 = vsel %vm415_vm2, %v385_v3, %v401_v5  ;;  %v3168_v3 = vpack.c.bf16 %v618_v27, %v617_v59  ;;  %v637_v5 = vld [vmem:[%s5254_s3 + $0x170] sm:$0xff] }
  0x5f   : > { %2431 = vmatmul.mubr.msk.f32.gmra.mrb[8].mxu0 %vm2662_vm3, %v4108_v40  ;;  %3164 = vmatprep.subr.bf16.mxu1 %v5352_v28  ;;  %v4184_v59 = vsel %vm415_vm2, %v402_v10, %v386_v31 }
  0x60   : > { %777 = vmatprep.mubr.f32.mxu0 %v3543_v37  ;;  %3195 = vmatpush3.bf16.msra.mxu0 %v3192_v57  ;;  %v638_v57 = vld [vmem:[%s5254_s3 + $0x178] sm:$0xff] }
  0x61   : > { %2877 = vmatmul.mubr.msk.f32.gmra.mrb[24].mxu1 %vm2663_vm1, %v4116_v26  ;;  %3197 = vmatprep.subr.bf16.mxu0 %v3196_v55  ;;  %v3204_v27 = vpack.c.bf16 %v638_v57, %v637_v5  ;;  %v3171_v26 = vpack.c.bf16 %v620_v9, %v619_v39  ;;  %v387_v5 = vrot.slane %v3609_v7, 7  ;;  %v403_v57 = vrot.slane %v3611_v8, 7 }
  0x62   : > { %3166 = vmatpush1.bf16.msra.mxu1 %v3165_v63  ;;  %2879 = vmatprep.mubr.f32.mxu1 %v4120_v43  ;;  %v4171_v63 = vsel %vm520_vm0, %v502_v22, %v518_v0  ;;  %v4192_v43 = vsel %vm520_vm0, %v518_v0, %v502_v22  ;;  %v622_v22 = vld [vmem:[%s5254_s3 + $0xf8] sm:$0xff]  ;;  %v4211_v0 = vsel %vm415_vm2, %v386_v31, %v402_v10  ;;  %v2550_v10 = vld [vmem:[%s5254_s3 + $0x300] sm:$0xff]  ;;  %v2551_v31 = vld [vmem:[%s5254_s3 + $0x308] sm:$0xff] }
  0x63   : > { %778 = vmatmul.mubr.f32.gmra.mrb[10].mxu0 %v4149_v50  ;;  %3167 = vmatprep.subr.bf16.mxu1 %v5352_v28  ;;  %5379 = vst [vmem:[#allocation38_spill] sm:$0xff] %v4171_v63  ;;  %5380 = vst [vmem:[#allocation39_spill] sm:$0xff] %v4192_v43  ;;  %v4221_v39 = vsel %vm520_vm0, %v519_v18, %v503_v19 }
  0x64   : > { %782 = vmatprep.mubr.f32.mxu0 %v3555_v44  ;;  %3199 = vmatpush3.bf16.msra.mxu0 %v3196_v55  ;;  %v4200_v55 = vsel %vm520_vm0, %v503_v19, %v519_v18  ;;  %5382 = vst [vmem:[#allocation41_spill] sm:$0xff] %v4221_v39  ;;  %v2583_v19 = vld [vmem:[%s5254_s3 + $0x408] sm:$0xff]  ;;  %v5307_v18 = vmov 0.0  }
  0x65   : > { %2880 = vmatmul.mubr.msk.f32.gmra.mrb[26].mxu1 %vm2663_vm1, %v4159_v1  ;;  %3201 = vmatprep.subr.bf16.mxu0 %v3200_v6  ;;  %5381 = vst [vmem:[#allocation40_spill] sm:$0xff] %v4200_v55 }
  0x66   : > { %3169 = vmatpush1.bf16.msra.mxu1 %v3168_v3  ;;  %2882 = vmatprep.mubr.f32.mxu1 %v4171_v63  ;;  %v621_v3 = vld [vmem:[%s5254_s3 + $0xf0] sm:$0xff] }
  0x67   : > { %2433 = vmatmul.mubr.msk.f32.gmra.mrb[12].mxu0 %vm2662_vm3, %v4184_v59  ;;  %3170 = vmatprep.subr.bf16.mxu1 %v5352_v28  ;;  %v3174_v9 = vpack.c.bf16 %v622_v22, %v621_v3  ;;  %v3209_v3 = vpack.c.bf16 %v2551_v31, %v2550_v10  ;;  %v4261_v10 = vsel %vm415_vm2, %v387_v5, %v403_v57  ;;  %v388_v31 = vrot.slane %v3662_v38, 7 }
  0x68   : > { %787 = vmatprep.mubr.f32.mxu0 %v3557_v45  ;;  %3203 = vmatpush3.bf16.msra.mxu0 %v3200_v6  ;;  %v2582_v6 = vld [vmem:[%s5254_s3 + $0x400] sm:$0xff] }
  0x69   : > { %2883 = vmatmul.mubr.msk.f32.gmra.mrb[28].mxu1 %vm2663_vm1, %v4192_v43  ;;  %3205 = vmatprep.subr.bf16.mxu0 %v3204_v27  ;;  %v4246_v22 = vpack.c.bf16 %v2583_v19, %v2582_v6  ;;  %v404_v6 = vrot.slane %v3671_v41, 7 }
  0x6a   : > { %3172 = vmatpush1.bf16.msra.mxu1 %v3171_v26  ;;  %2885 = vmatprep.mubr.f32.mxu1 %v4200_v55  ;;  %v4234_v26 = vsel %vm415_vm2, %v403_v57, %v387_v5  ;;  %v2554_v5 = vld [vmem:[%s5254_s3 + $0x320] sm:$0xff]  ;;  %v2555_v57 = vld [vmem:[%s5254_s3 + $0x328] sm:$0xff] }
  0x6b   : > { %788 = vmatmul.mubr.f32.gmra.mrb[14].mxu0 %v4211_v0  ;;  %3173 = vmatprep.subr.bf16.mxu1 %v5352_v28  ;;  %5383 = vst [vmem:[#allocation42_spill] sm:$0xff] %v4234_v26 }
  0x6c   : > { %792 = vmatprep.mubr.f32.mxu0 %v3609_v7  ;;  %3207 = vmatpush3.bf16.msra.mxu0 %v3204_v27  ;;  %v2552_v27 = vld [vmem:[%s5254_s3 + $0x310] sm:$0xff] }
  0x6d   : > { %2886 = vmatmul.mubr.msk.f32.gmra.mrb[30].mxu1 %vm2663_vm1, %v4221_v39  ;;  %3257 = vmatprep.subr.bf16.mxu0 %v4246_v22  ;;  %v2557_v39 = vld [vmem:[%s5254_s3 + $0x338] sm:$0xff] }
  0x6e   : > { %3175 = vmatpush1.bf16.msra.mxu1 %v3174_v9  ;;  %1202 = vmatprep.mubr.f32.mxu1 %v5307_v18  ;;  %v2553_v9 = vld [vmem:[%s5254_s3 + $0x318] sm:$0xff] }
  0x6f   : > { %2435 = vmatmul.mubr.msk.f32.gmra.mrb[16].mxu0 %vm2662_vm3, %v4234_v26  ;;  %3208 = vmatprep.subr.bf16.mxu1 %v5352_v28  ;;  %v3212_v19 = vpack.c.bf16 %v2553_v9, %v2552_v27  ;;  %v3215_v27 = vpack.c.bf16 %v2555_v57, %v2554_v5  ;;  %v2556_v9 = vld [vmem:[%s5254_s3 + $0x330] sm:$0xff]  ;;  %v405_v5 = vrot.slane %v3737_v16, 7 }
  0x70   : > { %797 = vmatprep.mubr.f32.mxu0 %v3611_v8  ;;  %v3218_v57 = vpack.c.bf16 %v2557_v39, %v2556_v9  ;;  %v2560_v39 = vld [vmem:[%s5254_s3 + $0x350] sm:$0xff]  ;;  %v390_v9 = vrot.slane %v3782_v49, 7 }
  0x71   : > { %1203 = vmatmul.mubr.f32.vlgmr.msra.gmra.mrb[32].mxu1 %v5307_v18 }
  0x72   : > { %3210 = vmatpush1.bf16.msra.mxu1 %v3209_v3  ;;  %1207 = vmatprep.mubr.f32.mxu1 %v5307_v18  ;;  %v4279_v3 = vsel %vm415_vm2, %v404_v6, %v388_v31 }
  0x73   : > { %798 = vmatmul.mubr.f32.gmra.mrb[18].mxu0 %v4261_v10  ;;  %3211 = vmatprep.subr.bf16.mxu1 %v5352_v28  ;;  %5384 = vst [vmem:[#allocation43_spill] sm:$0xff] %v4279_v3 }
  0x74   : > { %802 = vmatprep.mubr.f32.mxu0 %v3662_v38 }
  0x75   : > { %1208 = vmatmul.mubr.f32.gmra.mrb[34].mxu1 %v5307_v18 }
  0x76   : > { %1212 = vmatprep.mubr.f32.mxu1 %v3456_v47  ;;  %3213 = vmatpush1.bf16.msra.mxu1 %v3212_v19  ;;  %v4296_v47 = vsel %vm415_vm2, %v388_v31, %v404_v6  ;;  %v389_v19 = vrot.slane %v3735_v13, 7  ;;  %v2558_v31 = vld [vmem:[%s5254_s3 + $0x340] sm:$0xff]  ;;  %v2559_v6 = vld [vmem:[%s5254_s3 + $0x348] sm:$0xff] }
  0x77   : > { %2437 = vmatmul.mubr.msk.f32.gmra.mrb[20].mxu0 %vm2662_vm3, %v4279_v3  ;;  %3214 = vmatprep.subr.bf16.mxu1 %v5352_v28 }
  0x78   : > { %807 = vmatprep.mubr.f32.mxu0 %v3671_v41 }
  0x79   : > { %2491 = vmatmul.mubr.msk.f32.gmra.mrb[36].mxu1 %vm2662_vm3, %v3940_v51  ;;  %v4315_v51 = vsel %vm415_vm2, %v405_v5, %v389_v19 }
  0x7a   : > { %1217 = vmatprep.mubr.f32.mxu1 %v3458_v48  ;;  %3216 = vmatpush1.bf16.msra.mxu1 %v3215_v27  ;;  %v3221_v48 = vpack.c.bf16 %v2559_v6, %v2558_v31  ;;  %v2561_v27 = vld [vmem:[%s5254_s3 + $0x358] sm:$0xff] }
  0x7b   : > { %808 = vmatmul.mubr.f32.gmra.mrb[22].mxu0 %v4296_v47  ;;  %3217 = vmatprep.subr.bf16.mxu1 %v5352_v28  ;;  %v3224_v31 = vpack.c.bf16 %v2561_v27, %v2560_v39  ;;  %v2564_v39 = vld [vmem:[%s5254_s3 + $0x370] sm:$0xff]  ;;  %v2565_v27 = vld [vmem:[%s5254_s3 + $0x378] sm:$0xff] }
  0x7c   : > { %812 = vmatprep.mubr.f32.mxu0 %v3735_v13  ;;  %v3230_v18 = vpack.c.bf16 %v2565_v27, %v2564_v39  ;;  %v2568_v39 = vld [vmem:[%s5254_s3 + $0x390] sm:$0xff]  ;;  %v2569_v27 = vld [vmem:[%s5254_s3 + $0x398] sm:$0xff] }
  0x7d   : > { %1218 = vmatmul.mubr.f32.gmra.mrb[38].mxu1 %v3987_v54  ;;  %v4332_v54 = vsel %vm415_vm2, %v389_v19, %v405_v5  ;;  %v2562_v19 = vld [vmem:[%s5254_s3 + $0x360] sm:$0xff]  ;;  %v2563_v5 = vld [vmem:[%s5254_s3 + $0x368] sm:$0xff]  ;;  %v3236_v43 = vpack.c.bf16 %v2569_v27, %v2568_v39  ;;  %v2572_v39 = vld [vmem:[%s5254_s3 + $0x3b0] sm:$0xff] }
  0x7e   : > { %1222 = vmatprep.mubr.f32.mxu1 %v3511_v14  ;;  %3219 = vmatpush1.bf16.msra.mxu1 %v3218_v57  ;;  %v406_v57 = vrot.slane %v3795_v56, 7  ;;  %v2573_v27 = vld [vmem:[%s5254_s3 + $0x3b8] sm:$0xff] }
  0x7f   : > { %2439 = vmatmul.mubr.msk.f32.gmra.mrb[24].mxu0 %vm2662_vm3, %v4315_v51  ;;  %3220 = vmatprep.subr.bf16.mxu1 %v5352_v28  ;;  %v3242_v1 = vpack.c.bf16 %v2573_v27, %v2572_v39  ;;  %v2576_v39 = vld [vmem:[%s5254_s3 + $0x3d0] sm:$0xff]  ;;  %v2577_v27 = vld [vmem:[%s5254_s3 + $0x3d8] sm:$0xff] }
  0x80   : > { %817 = vmatprep.mubr.f32.mxu0 %v3737_v16  ;;  %v4351_v6 = vsel %vm415_vm2, %v406_v57, %v390_v9 }
  0x81   : > { %2493 = vmatmul.mubr.msk.f32.gmra.mrb[40].mxu1 %vm2662_vm3, %v4026_v29 }
  0x82   : > { %1227 = vmatprep.mubr.f32.mxu1 %v3513_v15  ;;  %3222 = vmatpush1.bf16.msra.mxu1 %v3221_v48  ;;  %v3227_v48 = vpack.c.bf16 %v2563_v5, %v2562_v19  ;;  %v391_v19 = vrot.slane %v3800_v62, 7  ;;  %v407_v5 = vrot.slane %v3820_v23, 7 }
  0x83   : > { %818 = vmatmul.mubr.f32.gmra.mrb[26].mxu0 %v4332_v54  ;;  %3223 = vmatprep.subr.bf16.mxu1 %v5352_v28 }
  0x84   : > { %822 = vmatprep.mubr.f32.mxu0 %v3782_v49  ;;  %v4387_v55 = vsel %vm415_vm2, %v407_v5, %v391_v19 }
  0x85   : > { %1228 = vmatmul.mubr.f32.gmra.mrb[42].mxu1 %v4067_v33 }
  0x86   : > { %1232 = vmatprep.mubr.f32.mxu1 %v3541_v35  ;;  %3225 = vmatpush1.bf16.msra.mxu1 %v3224_v31  ;;  %v4368_v31 = vsel %vm415_vm2, %v390_v9, %v406_v57  ;;  %v2566_v9 = vld [vmem:[%s5254_s3 + $0x380] sm:$0xff]  ;;  %v2567_v57 = vld [vmem:[%s5254_s3 + $0x388] sm:$0xff] }
  0x87   : > { %2441 = vmatmul.mubr.msk.f32.gmra.mrb[28].mxu0 %vm2662_vm3, %v4351_v6  ;;  %3226 = vmatprep.subr.bf16.mxu1 %v5352_v28 }
  0x88   : > { %827 = vmatprep.mubr.f32.mxu0 %v3795_v56 }
  0x89   : > { %2495 = vmatmul.mubr.msk.f32.gmra.mrb[44].mxu1 %vm2662_vm3, %v4108_v40 }
  0x8a   : > { %1237 = vmatprep.mubr.f32.mxu1 %v3543_v37  ;;  %3228 = vmatpush1.bf16.msra.mxu1 %v3227_v48  ;;  %v3233_v48 = vpack.c.bf16 %v2567_v57, %v2566_v9  ;;  %v392_v9 = vrot.slane %v3857_v11, 7  ;;  %v408_v57 = vrot.slane %v3859_v53, 7 }
  0x8b   : > { %828 = vmatmul.mubr.f32.gmra.mrb[30].mxu0 %v4368_v31  ;;  %3229 = vmatprep.subr.bf16.mxu1 %v5352_v28 }
  0x8c   : > { %832 = vmatprep.mubr.f32.mxu0 %v3800_v62  ;;  %v4423_v63 = vsel %vm415_vm2, %v408_v57, %v392_v9 }
  0x8d   : > { %1238 = vmatmul.mubr.f32.gmra.mrb[46].mxu1 %v4149_v50 }
  0x8e   : > { %1242 = vmatprep.mubr.f32.mxu1 %v3555_v44  ;;  %3231 = vmatpush1.bf16.msra.mxu1 %v3230_v18  ;;  %v4404_v18 = vsel %vm415_vm2, %v391_v19, %v407_v5  ;;  %v2570_v19 = vld [vmem:[%s5254_s3 + $0x3a0] sm:$0xff]  ;;  %v2571_v5 = vld [vmem:[%s5254_s3 + $0x3a8] sm:$0xff] }
  0x8f   : > { %2443 = vmatmul.mubr.msk.f32.gmra.mrb[32].mxu0 %vm2662_vm3, %v4387_v55  ;;  %3232 = vmatprep.subr.bf16.mxu1 %v5352_v28 }
  0x90   : > { %837 = vmatprep.mubr.f32.mxu0 %v3820_v23 }
  0x91   : > { %2497 = vmatmul.mubr.msk.f32.gmra.mrb[48].mxu1 %vm2662_vm3, %v4184_v59 }
  0x92   : > { %1247 = vmatprep.mubr.f32.mxu1 %v3557_v45  ;;  %3234 = vmatpush1.bf16.msra.mxu1 %v3233_v48  ;;  %v3239_v48 = vpack.c.bf16 %v2571_v5, %v2570_v19  ;;  %v393_v19 = vrot.slane %v3922_v34, 7  ;;  %v409_v5 = vrot.slane %v3924_v2, 7 }
  0x93   : > { %838 = vmatmul.mubr.f32.gmra.mrb[34].mxu0 %v4404_v18  ;;  %3235 = vmatprep.subr.bf16.mxu1 %v5352_v28 }
  0x94   : > { %842 = vmatprep.mubr.f32.mxu0 %v3857_v11 }
  0x95   : > { %1248 = vmatmul.mubr.f32.gmra.mrb[50].mxu1 %v4211_v0 }
  0x96   : > { %1252 = vmatprep.mubr.f32.mxu1 %v3609_v7  ;;  %3237 = vmatpush1.bf16.msra.mxu1 %v3236_v43  ;;  %v4440_v43 = vsel %vm415_vm2, %v392_v9, %v408_v57  ;;  %v2574_v9 = vld [vmem:[%s5254_s3 + $0x3c0] sm:$0xff]  ;;  %v2575_v57 = vld [vmem:[%s5254_s3 + $0x3c8] sm:$0xff] }
  0x97   : > { %2445 = vmatmul.mubr.msk.f32.gmra.mrb[36].mxu0 %vm2662_vm3, %v4423_v63  ;;  %3238 = vmatprep.subr.bf16.mxu1 %v5352_v28 }
  0x98   : > { %847 = vmatprep.mubr.f32.mxu0 %v3859_v53 }
  0x99   : > { %2499 = vmatmul.mubr.msk.f32.gmra.mrb[52].mxu1 %vm2662_vm3, %v4234_v26  ;;  %v4459_v26 = vsel %vm415_vm2, %v409_v5, %v393_v19 }
  0x9a   : > { %1257 = vmatprep.mubr.f32.mxu1 %v3611_v8  ;;  %3240 = vmatpush1.bf16.msra.mxu1 %v3239_v48  ;;  %v3245_v48 = vpack.c.bf16 %v2575_v57, %v2574_v9  ;;  %v394_v9 = vrot.slane %v3962_v12, 7  ;;  %v410_v57 = vrot.slane %v3980_v32, 7 }
  0x9b   : > { %848 = vmatmul.mubr.f32.gmra.mrb[38].mxu0 %v4440_v43  ;;  %3241 = vmatprep.subr.bf16.mxu1 %v5352_v28 }
  0x9c   : > { %852 = vmatprep.mubr.f32.mxu0 %v3922_v34 }
  0x9d   : > { %1258 = vmatmul.mubr.f32.gmra.mrb[54].mxu1 %v4261_v10 }
  0x9e   : > { %1262 = vmatprep.mubr.f32.mxu1 %v3662_v38  ;;  %3243 = vmatpush1.bf16.msra.mxu1 %v3242_v1  ;;  %v4476_v1 = vsel %vm415_vm2, %v393_v19, %v409_v5  ;;  %v3248_v38 = vpack.c.bf16 %v2577_v27, %v2576_v39  ;;  %v2578_v19 = vld [vmem:[%s5254_s3 + $0x3e0] sm:$0xff]  ;;  %v2579_v5 = vld [vmem:[%s5254_s3 + $0x3e8] sm:$0xff]  ;;  %v2580_v39 = vld [vmem:[%s5254_s3 + $0x3f0] sm:$0xff] }
  0x9f   : > { %2447 = vmatmul.mubr.msk.f32.gmra.mrb[40].mxu0 %vm2662_vm3, %v4459_v26  ;;  %3244 = vmatprep.subr.bf16.mxu1 %v5352_v28  ;;  %v2581_v27 = vld [vmem:[%s5254_s3 + $0x3f8] sm:$0xff] }
  0xa0   : > { %857 = vmatprep.mubr.f32.mxu0 %v3924_v2 }
  0xa1   : > { %2501 = vmatmul.mubr.msk.f32.gmra.mrb[56].mxu1 %vm2662_vm3, %v4279_v3  ;;  %v4495_v3 = vsel %vm415_vm2, %v410_v57, %v394_v9 }
  0xa2   : > { %1267 = vmatprep.mubr.f32.mxu1 %v3671_v41  ;;  %3246 = vmatpush1.bf16.msra.mxu1 %v3245_v48  ;;  %v3251_v48 = vpack.c.bf16 %v2579_v5, %v2578_v19  ;;  %v395_v19 = vrot.slane %v4019_v30, 7  ;;  %v411_v5 = vrot.slane %v4021_v20, 7 }
  0xa3   : > { %858 = vmatmul.mubr.f32.gmra.mrb[42].mxu0 %v4476_v1  ;;  %3247 = vmatprep.subr.bf16.mxu1 %v5352_v28 }
  0xa4   : > { %862 = vmatprep.mubr.f32.mxu0 %v3962_v12 }
  0xa5   : > { %1268 = vmatmul.mubr.f32.gmra.mrb[58].mxu1 %v4296_v47 }
  0xa6   : > { %1272 = vmatprep.mubr.f32.mxu1 %v3735_v13  ;;  %3249 = vmatpush1.bf16.msra.mxu1 %v3248_v38  ;;  %v4512_v38 = vsel %vm415_vm2, %v394_v9, %v410_v57  ;;  %v3254_v13 = vpack.c.bf16 %v2581_v27, %v2580_v39  ;;  %v4525_v9 = vsel %vm415_vm2, %v411_v5, %v395_v19  ;;  %v396_v57 = vrot.slane %v4037_v17, 7 }
  0xa7   : > { %2449 = vmatmul.mubr.msk.f32.gmra.mrb[44].mxu0 %vm2662_vm3, %v4495_v3  ;;  %3250 = vmatprep.subr.bf16.mxu1 %v5352_v28  ;;  %5385 = vst [vmem:[#allocation44_spill] sm:$0xff] %v4525_v9  ;;  %v397_v27 = vrot.slane %v4100_v24, 7 }
  0xa8   : > { %867 = vmatprep.mubr.f32.mxu0 %v3980_v32 }
  0xa9   : > { %2503 = vmatmul.mubr.msk.f32.gmra.mrb[60].mxu1 %vm2662_vm3, %v4315_v51 }
  0xaa   : > { %1277 = vmatprep.mubr.f32.mxu1 %v3737_v16  ;;  %3252 = vmatpush1.bf16.msra.mxu1 %v3251_v48  ;;  %v412_v48 = vrot.slane %v4040_v42, 7 }
  0xab   : > { %868 = vmatmul.mubr.f32.gmra.mrb[46].mxu0 %v4512_v38  ;;  %3253 = vmatprep.subr.bf16.mxu1 %v5352_v28  ;;  %v4535_v28 = vsel %vm415_vm2, %v395_v19, %v411_v5  ;;  %v413_v19 = vrot.slane %v4103_v60, 7 }
  0xac   : > { %872 = vmatprep.mubr.f32.mxu0 %v4019_v30  ;;  %5386 = vst [vmem:[#allocation45_spill] sm:$0xff] %v4535_v28  ;;  %v4557_v39 = vsel %vm415_vm2, %v396_v57, %v412_v48 }
  0xad   : > { %1278 = vmatmul.mubr.f32.gmra.mrb[62].mxu1 %v4332_v54  ;;  %5388 = vst [vmem:[#allocation47_spill] sm:$0xff] %v4557_v39  ;;  %v4569_v5 = vsel %vm415_vm2, %v413_v19, %v397_v27 }
  0xae   : > { %1282 = vmatprep.mubr.f32.mxu1 %v3782_v49  ;;  %3255 = vmatpush1.bf16.msra.mxu1 %v3254_v13  ;;  %v4547_v13 = vsel %vm415_vm2, %v412_v48, %v396_v57  ;;  %5389 = vst [vmem:[#allocation48_spill] sm:$0xff] %v4569_v5  ;;  %v4579_v57 = vsel %vm415_vm2, %v397_v27, %v413_v19  ;;  %v398_v48 = vrot.slane %v4141_v25, 7  ;;  %v2584_v19 = vld [vmem:[%s5254_s3 + $0x410] sm:$0xff] }
  0xaf   : > { %2451 = vmatmul.mubr.msk.f32.gmra.mrb[48].mxu0 %vm2662_vm3, %v4525_v9  ;;  %5387 = vst [vmem:[#allocation46_spill] sm:$0xff] %v4547_v13  ;;  %5390 = vst [vmem:[#allocation49_spill] sm:$0xff] %v4579_v57 }
  0xb0   : > { %877 = vmatprep.mubr.f32.mxu0 %v4021_v20 }
  0xb1   : > { %2505 = vmatmul.mubr.msk.f32.gmra.mrb[64].mxu1 %vm2662_vm3, %v4351_v6 }
  0xb2   : > { %1287 = vmatprep.mubr.f32.mxu1 %v3795_v56 }
  0xb3   : > { %878 = vmatmul.mubr.f32.gmra.mrb[50].mxu0 %v4535_v28 }
  0xb4   : > { %882 = vmatprep.mubr.f32.mxu0 %v4037_v17 }
  0xb5   : > { %1288 = vmatmul.mubr.f32.gmra.mrb[66].mxu1 %v4368_v31 }
  0xb6   : > { %1292 = vmatprep.mubr.f32.mxu1 %v3800_v62 }
  0xb7   : > { %2453 = vmatmul.mubr.msk.f32.gmra.mrb[52].mxu0 %vm2662_vm3, %v4547_v13 }
  0xb8   : > { %887 = vmatprep.mubr.f32.mxu0 %v4040_v42 }
  0xb9   : > { %2507 = vmatmul.mubr.msk.f32.gmra.mrb[68].mxu1 %vm2662_vm3, %v4387_v55 }
  0xba   : > { %1297 = vmatprep.mubr.f32.mxu1 %v3820_v23  ;;  %v414_v23 = vrot.slane %v4144_v58, 7 }
  0xbb   : > { %888 = vmatmul.mubr.f32.gmra.mrb[54].mxu0 %v4557_v39 }
  0xbc   : > { %892 = vmatprep.mubr.f32.mxu0 %v4100_v24  ;;  %v4601_v27 = vsel %vm415_vm2, %v398_v48, %v414_v23 }
  0xbd   : > { %1298 = vmatmul.mubr.f32.gmra.mrb[70].mxu1 %v4404_v18  ;;  %5392 = vst [vmem:[#allocation51_spill] sm:$0xff] %v4601_v27 }
  0xbe   : > { %1302 = vmatprep.mubr.f32.mxu1 %v3857_v11  ;;  %v4591_v11 = vsel %vm415_vm2, %v414_v23, %v398_v48  ;;  %v2586_v48 = vld [vmem:[%s5254_s3 + $0x420] sm:$0xff] }
  0xbf   : > { %2455 = vmatmul.mubr.msk.f32.gmra.mrb[56].mxu0 %vm2662_vm3, %v4569_v5  ;;  %5391 = vst [vmem:[#allocation50_spill] sm:$0xff] %v4591_v11 }
  0xc0   : > { %897 = vmatprep.mubr.f32.mxu0 %v4103_v60 }
  0xc1   : > { %2509 = vmatmul.mubr.msk.f32.gmra.mrb[72].mxu1 %vm2662_vm3, %v4423_v63 }
  0xc2   : > { %1307 = vmatprep.mubr.f32.mxu1 %v3859_v53 }
  0xc3   : > { %898 = vmatmul.mubr.f32.gmra.mrb[58].mxu0 %v4579_v57 }
  0xc4   : > { %902 = vmatprep.mubr.f32.mxu0 %v4141_v25  ;;  %v2587_v25 = vld [vmem:[%s5254_s3 + $0x428] sm:$0xff] }
  0xc5   : > { %1308 = vmatmul.mubr.f32.gmra.mrb[74].mxu1 %v4440_v43 }
  0xc6   : > { %1312 = vmatprep.mubr.f32.mxu1 %v3922_v34 }
  0xc7   : > { %2457 = vmatmul.mubr.msk.f32.gmra.mrb[60].mxu0 %vm2662_vm3, %v4591_v11  ;;  %v2585_v11 = vld [vmem:[%s5254_s3 + $0x418] sm:$0xff] }
  0xc8   : > { %907 = vmatprep.mubr.f32.mxu0 %v4144_v58  ;;  %v5393_v58 = vmov 0.0   ;;  %v3260_v23 = vpack.c.bf16 %v2585_v11, %v2584_v19  ;;  %v3264_v11 = vpack.c.bf16 %v2587_v25, %v2586_v48  ;;  %v2588_v19 = vld [vmem:[%s5254_s3 + $0x430] sm:$0xff]  ;;  %v2590_v25 = vld [vmem:[%s5254_s3 + $0x440] sm:$0xff]  ;;  %v2593_v48 = vld [vmem:[%s5254_s3 + $0x458] sm:$0xff] }
  0xc9   : > { %2511 = vmatmul.mubr.msk.f32.gmra.mrb[76].mxu1 %vm2662_vm3, %v4459_v26 }
  0xca   : > { %1317 = vmatprep.mubr.f32.mxu1 %v3924_v2 }
  0xcb   : > { %908 = vmatmul.mubr.f32.gmra.mrb[62].mxu0 %v4601_v27  ;;  %v2589_v27 = vld [vmem:[%s5254_s3 + $0x438] sm:$0xff] }
  0xcc   : > { %2920 = vmatprep.mubr.f32.mxu0 %v5393_v58 }
  0xcd   : > { %1318 = vmatmul.mubr.f32.gmra.mrb[78].mxu1 %v4476_v1 }
  0xce   : > { %1322 = vmatprep.mubr.f32.mxu1 %v3962_v12 }
  0xcf   : > { %2921 = vmatmul.mubr.f32.vlgmr.msra.gmra.mrb[64].mxu0 %v5393_v58  ;;  %v5398_v58 = vld [vmem:[#allocation7_spill] sm:$0xff] }
  0xd0   : > { %2923 = vmatprep.mubr.f32.mxu0 %v3487_v61  ;;  %3259 = vmatpush3.bf16.msra.mxu0 %v4246_v22  ;;  %v3268_v61 = vpack.c.bf16 %v2589_v27, %v2588_v19  ;;  %v2591_v22 = vld [vmem:[%s5254_s3 + $0x448] sm:$0xff] }
  0xd1   : > { %2513 = vmatmul.mubr.msk.f32.gmra.mrb[80].mxu1 %vm2662_vm3, %v4495_v3  ;;  %3261 = vmatprep.subr.bf16.mxu0 %v3260_v23  ;;  %v3272_v27 = vpack.c.bf16 %v2591_v22, %v2590_v25  ;;  %v5395_v19 = vld [vmem:[#allocation3_spill] sm:$0xff]  ;;  %v2594_v22 = vld [vmem:[%s5254_s3 + $0x460] sm:$0xff] }
  0xd2   : > { %1327 = vmatprep.mubr.f32.mxu1 %v3980_v32 }
  0xd3   : > { %2924 = vmatmul.mubr.msk.f32.gmra.mrb[66].mxu0 %vm2663_vm1, %v3565_v46  ;;  %v5394_v46 = vld [vmem:[#allocation2_spill] sm:$0xff] }
  0xd4   : > { %2926 = vmatprep.mubr.f32.mxu0 %v3579_v52  ;;  %3263 = vmatpush3.bf16.msra.mxu0 %v3260_v23  ;;  %v2592_v23 = vld [vmem:[%s5254_s3 + $0x450] sm:$0xff] }
  0xd5   : > { %1328 = vmatmul.mubr.f32.gmra.mrb[82].mxu1 %v4512_v38  ;;  %3265 = vmatprep.subr.bf16.mxu0 %v3264_v11  ;;  %v3276_v25 = vpack.c.bf16 %v2593_v48, %v2592_v23  ;;  %v2596_v23 = vld [vmem:[%s5254_s3 + $0x470] sm:$0xff]  ;;  %v2597_v48 = vld [vmem:[%s5254_s3 + $0x478] sm:$0xff] }
  0xd6   : > { %1332 = vmatprep.mubr.f32.mxu1 %v4019_v30  ;;  %v5422_v30 = vld [vmem:[#allocation43_spill] sm:$0xff] }
  0xd7   : > { %2927 = vmatmul.mubr.msk.f32.gmra.mrb[68].mxu0 %vm2663_vm1, %v3601_v4 }
  0xd8   : > { %2929 = vmatprep.mubr.f32.mxu0 %v5394_v46  ;;  %3267 = vmatpush3.bf16.msra.mxu0 %v3264_v11  ;;  %v5396_v11 = vld [vmem:[#allocation4_spill] sm:$0xff] }
  0xd9   : > { %2515 = vmatmul.mubr.msk.f32.gmra.mrb[84].mxu1 %vm2662_vm3, %v4525_v9  ;;  %3269 = vmatprep.subr.bf16.mxu0 %v3268_v61  ;;  %v5397_v9 = vld [vmem:[#allocation6_spill] sm:$0xff] }
  0xda   : > { %1337 = vmatprep.mubr.f32.mxu1 %v4021_v20  ;;  %v2595_v20 = vld [vmem:[%s5254_s3 + $0x468] sm:$0xff] }
  0xdb   : > { %2930 = vmatmul.mubr.msk.f32.gmra.mrb[70].mxu0 %vm2663_vm1, %v5395_v19 }
  0xdc   : > { %2932 = vmatprep.mubr.f32.mxu0 %v5396_v11  ;;  %3271 = vmatpush3.bf16.msra.mxu0 %v3268_v61  ;;  %v3280_v61 = vpack.c.bf16 %v2595_v20, %v2594_v22  ;;  %v3284_v20 = vpack.c.bf16 %v2597_v48, %v2596_v23  ;;  %v5401_v22 = vld [vmem:[#allocation11_spill] sm:$0xff]  ;;  %v5404_v23 = vld [vmem:[#allocation16_spill] sm:$0xff]  ;;  %v5405_v48 = vld [vmem:[#allocation17_spill] sm:$0xff] }
  0xdd   : > { %1338 = vmatmul.mubr.f32.gmra.mrb[86].mxu1 %v4535_v28  ;;  %3273 = vmatprep.subr.bf16.mxu0 %v3272_v27  ;;  %v5421_v28 = vld [vmem:[#allocation5_spill] sm:$0xff] }
  0xde   : > { %1342 = vmatprep.mubr.f32.mxu1 %v4037_v17  ;;  %v5399_v17 = vld [vmem:[#allocation9_spill] sm:$0xff] }
  0xdf   : > { %2933 = vmatmul.mubr.msk.f32.gmra.mrb[72].mxu0 %vm2663_vm1, %v5397_v9 }
  0xe0   : > { %2935 = vmatprep.mubr.f32.mxu0 %v5398_v58  ;;  %3275 = vmatpush3.bf16.msra.mxu0 %v3272_v27  ;;  %v5400_v27 = vld [vmem:[#allocation10_spill] sm:$0xff] }
  0xe1   : > { %2517 = vmatmul.mubr.msk.f32.gmra.mrb[88].mxu1 %vm2662_vm3, %v4547_v13  ;;  %3277 = vmatprep.subr.bf16.mxu0 %v3276_v25  ;;  %v5420_v13 = vld [vmem:[#allocation39_spill] sm:$0xff] }
  0xe2   : > { %1347 = vmatprep.mubr.f32.mxu1 %v4040_v42  ;;  %v5402_v42 = vld [vmem:[#allocation13_spill] sm:$0xff] }
  0xe3   : > { %2936 = vmatmul.mubr.msk.f32.gmra.mrb[74].mxu0 %vm2663_vm1, %v5399_v17 }
  0xe4   : > { %2938 = vmatprep.mubr.f32.mxu0 %v5400_v27  ;;  %3279 = vmatpush3.bf16.msra.mxu0 %v3276_v25  ;;  %v5403_v25 = vld [vmem:[#allocation14_spill] sm:$0xff] }
  0xe5   : > { %1348 = vmatmul.mubr.f32.gmra.mrb[90].mxu1 %v4557_v39  ;;  %3281 = vmatprep.subr.bf16.mxu0 %v3280_v61  ;;  %v5419_v39 = vld [vmem:[#allocation42_spill] sm:$0xff] }
  0xe6   : > { %1352 = vmatprep.mubr.f32.mxu1 %v4100_v24 }
  0xe7   : > { %2939 = vmatmul.mubr.msk.f32.gmra.mrb[76].mxu0 %vm2663_vm1, %v5401_v22 }
  0xe8   : > { %2941 = vmatprep.mubr.f32.mxu0 %v5402_v42  ;;  %3283 = vmatpush3.bf16.msra.mxu0 %v3280_v61  ;;  %v5406_v61 = vld [vmem:[#allocation18_spill] sm:$0xff] }
  0xe9   : > { %2519 = vmatmul.mubr.msk.f32.gmra.mrb[92].mxu1 %vm2662_vm3, %v4569_v5  ;;  %3285 = vmatprep.subr.bf16.mxu0 %v3284_v20  ;;  %v5417_v5 = vld [vmem:[#allocation37_spill] sm:$0xff] }
  0xea   : > { %1357 = vmatprep.mubr.f32.mxu1 %v4103_v60  ;;  %v5407_v60 = vld [vmem:[#allocation19_spill] sm:$0xff] }
  0xeb   : > { %2942 = vmatmul.mubr.msk.f32.gmra.mrb[78].mxu0 %vm2663_vm1, %v5403_v25 }
  0xec   : > { %2944 = vmatprep.mubr.f32.mxu0 %v5404_v23  ;;  %3287 = vmatpush3.bf16.msra.mxu0 %v3284_v20  ;;  %v5408_v20 = vld [vmem:[#allocation20_spill] sm:$0xff] }
  0xed   : > { %1358 = vmatmul.mubr.f32.gmra.mrb[94].mxu1 %v4579_v57  ;;  %v5410_v57 = vld [vmem:[#allocation22_spill] sm:$0xff] }
  0xee   : > { %1701 = vmatprep.mubr.f32.mxu1 %v3511_v14  ;;  %v5409_v14 = vld [vmem:[#allocation21_spill] sm:$0xff] }
  0xef   : > { %2945 = vmatmul.mubr.msk.f32.gmra.mrb[80].mxu0 %vm2663_vm1, %v5405_v48 }
  0xf0   : > { %2947 = vmatprep.mubr.f32.mxu0 %v5406_v61 }
  0xf1   : > { %2599 = vmatmul.mubr.msk.f32.vlgmr.msra.gmra.mrb[96].mxu1 %vm2662_vm3, %v4026_v29  ;;  %v5412_v29 = vld [vmem:[#allocation28_spill] sm:$0xff] }
  0xf2   : > { %1706 = vmatprep.mubr.f32.mxu1 %v3513_v15  ;;  %v5411_v15 = vld [vmem:[#allocation25_spill] sm:$0xff] }
  0xf3   : > { %2948 = vmatmul.mubr.msk.f32.gmra.mrb[82].mxu0 %vm2663_vm1, %v5407_v60 }
  0xf4   : > { %2950 = vmatprep.mubr.f32.mxu0 %v5408_v20 }
  0xf5   : > { %1707 = vmatmul.mubr.f32.gmra.mrb[98].mxu1 %v4067_v33  ;;  %v5414_v33 = vld [vmem:[#allocation30_spill] sm:$0xff] }
  0xf6   : > { %1711 = vmatprep.mubr.f32.mxu1 %v3541_v35  ;;  %v5413_v35 = vld [vmem:[#allocation29_spill] sm:$0xff] }
  0xf7   : > { %2951 = vmatmul.mubr.msk.f32.gmra.mrb[84].mxu0 %vm2663_vm1, %v5409_v14 }
  0xf8   : > { %2953 = vmatprep.mubr.f32.mxu0 %v5410_v57 }
  0xf9   : > { %2601 = vmatmul.mubr.msk.f32.gmra.mrb[100].mxu1 %vm2662_vm3, %v4108_v40 }
  0xfa   : > { %1716 = vmatprep.mubr.f32.mxu1 %v3543_v37  ;;  %v5415_v37 = vld [vmem:[#allocation33_spill] sm:$0xff] }
  0xfb   : > { %2954 = vmatmul.mubr.msk.f32.gmra.mrb[86].mxu0 %vm2663_vm1, %v5411_v15 }
  0xfc   : > { %2956 = vmatprep.mubr.f32.mxu0 %v5412_v29 }
  0xfd   : > { %1717 = vmatmul.mubr.f32.gmra.mrb[102].mxu1 %v4149_v50  ;;  %v5416_v50 = vld [vmem:[#allocation34_spill] sm:$0xff] }
  0xfe   : > { %1721 = vmatprep.mubr.f32.mxu1 %v3555_v44 }
  0xff   : > { %2957 = vmatmul.mubr.msk.f32.gmra.mrb[88].mxu0 %vm2663_vm1, %v5413_v35 }
 0x100   : > { %2959 = vmatprep.mubr.f32.mxu0 %v5414_v33 }
 0x101   : > { %2603 = vmatmul.mubr.msk.f32.gmra.mrb[104].mxu1 %vm2662_vm3, %v4184_v59  ;;  %v5418_v59 = vld [vmem:[#allocation38_spill] sm:$0xff] }
 0x102   : > { %1726 = vmatprep.mubr.f32.mxu1 %v3557_v45 }
 0x103   : > { %2960 = vmatmul.mubr.msk.f32.gmra.mrb[90].mxu0 %vm2663_vm1, %v5415_v37 }
 0x104   : > { %v2842_v40 = vpop.f32.mrb[0].mxu1  ;;  %2962 = vmatprep.mubr.f32.mxu0 %v5416_v50 }
 0x105   : > { %v979_v44 = vpop.f32.mrb[1].mxu1  ;;  %1727 = vmatmul.mubr.f32.gmra.mrb[106].mxu1 %v4211_v0 }
 0x106   : > { %1731 = vmatprep.mubr.f32.mxu1 %v3609_v7 }
 0x107   : > { %2963 = vmatmul.mubr.msk.f32.gmra.mrb[92].mxu0 %vm2663_vm1, %v5417_v5 }
 0x108   : > { %v4753_v24 = vpop.f32.mrb[2].mxu1  ;;  %2965 = vmatprep.mubr.f32.mxu0 %v5418_v59 }
 0x109   : > { %v989_v45 = vpop.f32.mrb[3].mxu1  ;;  %2605 = vmatmul.mubr.msk.f32.gmra.mrb[108].mxu1 %vm2662_vm3, %v5419_v39 }
 0x10a   : > { %1736 = vmatprep.mubr.f32.mxu1 %v3611_v8 }
 0x10b   : > { %2966 = vmatmul.mubr.msk.f32.gmra.mrb[94].mxu0 %vm2663_vm1, %v5420_v13 }
 0x10c   : > { %v4763_v7 = vpop.f32.mrb[4].mxu1  ;;  %3000 = vmatprep.mubr.f32.mxu0 %v3579_v52 }
 0x10d   : > { %v4766_v0 = vpop.f32.mrb[5].mxu1  ;;  %1737 = vmatmul.mubr.f32.gmra.mrb[110].mxu1 %v4261_v10  ;;  %v5423_v10 = vld [vmem:[#allocation8_spill] sm:$0xff] }
 0x10e   : > { %1741 = vmatprep.mubr.f32.mxu1 %v5421_v28 }
 0x10f   : > { %3001 = vmatmul.mubr.msk.f32.vlgmr.msra.gmra.mrb[96].mxu0 %vm2663_vm1, %v3601_v4 }
 0x110   : > { %v4773_v39 = vpop.f32.mrb[6].mxu1  ;;  %3003 = vmatprep.mubr.f32.mxu0 %v5394_v46 }
 0x111   : > { %v4776_v8 = vpop.f32.mrb[7].mxu1  ;;  %2607 = vmatmul.mubr.msk.f32.gmra.mrb[112].mxu1 %vm2662_vm3, %v5422_v30 }
 0x112   : > { %1746 = vmatprep.mubr.f32.mxu1 %v3671_v41 }
 0x113   : > { %3004 = vmatmul.mubr.msk.f32.gmra.mrb[98].mxu0 %vm2663_vm1, %v5395_v19 }
 0x114   : > { %v4785_v52 = vpop.f32.mrb[8].mxu1  ;;  %3006 = vmatprep.mubr.f32.mxu0 %v5396_v11  ;;  %v5424_v11 = vld [vmem:[#allocation12_spill] sm:$0xff] }
 0x115   : > { %v4788_v4 = vpop.f32.mrb[9].mxu1  ;;  %1747 = vmatmul.mubr.f32.gmra.mrb[114].mxu1 %v4296_v47 }
 0x116   : > { %1751 = vmatprep.mubr.f32.mxu1 %v5423_v10  ;;  %v5427_v10 = vld [vmem:[#allocation23_spill] sm:$0xff] }
 0x117   : > { %3007 = vmatmul.mubr.msk.f32.gmra.mrb[100].mxu0 %vm2663_vm1, %v5397_v9 }
 0x118   : > { %v4795_v30 = vpop.f32.mrb[10].mxu1  ;;  %3009 = vmatprep.mubr.f32.mxu0 %v5398_v58 }
 0x119   : > { %v4798_v41 = vpop.f32.mrb[11].mxu1  ;;  %2609 = vmatmul.mubr.msk.f32.gmra.mrb[116].mxu1 %vm2662_vm3, %v4315_v51 }
 0x11a   : > { %1756 = vmatprep.mubr.f32.mxu1 %v3737_v16 }
 0x11b   : > { %3010 = vmatmul.mubr.msk.f32.gmra.mrb[102].mxu0 %vm2663_vm1, %v5399_v17 }
 0x11c   : > { %v4807_v47 = vpop.f32.mrb[12].mxu1  ;;  %3012 = vmatprep.mubr.f32.mxu0 %v5400_v27 }
 0x11d   : > { %v4810_v9 = vpop.f32.mrb[13].mxu1  ;;  %1757 = vmatmul.mubr.f32.gmra.mrb[118].mxu1 %v4332_v54 }
 0x11e   : > { %1761 = vmatprep.mubr.f32.mxu1 %v3782_v49 }
 0x11f   : > { %3013 = vmatmul.mubr.msk.f32.gmra.mrb[104].mxu0 %vm2663_vm1, %v5401_v22 }
 0x120   : > { %v4817_v58 = vpop.f32.mrb[14].mxu1  ;;  %3015 = vmatprep.mubr.f32.mxu0 %v5402_v42 }
 0x121   : > { %v4820_v16 = vpop.f32.mrb[15].mxu1  ;;  %2611 = vmatmul.mubr.msk.f32.gmra.mrb[120].mxu1 %vm2662_vm3, %v4351_v6 }
 0x122   : > { %v754_v17 = vpop.f32.mrb[0].mxu0  ;;  %1766 = vmatprep.mubr.f32.mxu1 %v3795_v56 }
 0x123   : > { %v4826_v51 = vadd.f32 %v979_v44, %v754_v17  ;;  %3016 = vmatmul.mubr.msk.f32.gmra.mrb[106].mxu0 %vm2663_vm1, %v5403_v25  ;;  %v756_v49 = vpop.f32.mrb[1].mxu0  ;;  %v5428_v17 = vld [vmem:[#allocation41_spill] sm:$0xff] }
 0x124   : > { %v4831_v54 = vpop.f32.mrb[16].mxu1  ;;  %3018 = vmatprep.mubr.f32.mxu0 %v5404_v23  ;;  %v5429_v49 = vmov 0.0  }
 0x125   : > { %v4834_v42 = vpop.f32.mrb[17].mxu1  ;;  %1767 = vmatmul.mubr.f32.gmra.mrb[122].mxu1 %v4368_v31 }
 0x126   : > { %v759_v28 = vpop.f32.mrb[2].mxu0  ;;  %1771 = vmatprep.mubr.f32.mxu1 %v3800_v62 }
 0x127   : > { %v4838_v6 = vadd.f32 %v2842_v40, %v759_v28  ;;  %3019 = vmatmul.mubr.msk.f32.gmra.mrb[108].mxu0 %vm2663_vm1, %v5405_v48  ;;  %v761_v56 = vpop.f32.mrb[3].mxu0 }
 0x128   : > { %v4843_v46 = vpop.f32.mrb[18].mxu1  ;;  %3021 = vmatprep.mubr.f32.mxu0 %v5406_v61  ;;  %v5430_v56 = vld [vmem:[#allocation44_spill] sm:$0xff] }
 0x129   : > { %v4846_v19 = vpop.f32.mrb[19].mxu1  ;;  %2613 = vmatmul.mubr.msk.f32.gmra.mrb[124].mxu1 %vm2662_vm3, %v4387_v55  ;;  %v5425_v55 = vld [vmem:[#allocation15_spill] sm:$0xff] }
 0x12a   : > { %v764_v31 = vpop.f32.mrb[4].mxu0  ;;  %1776 = vmatprep.mubr.f32.mxu1 %v5424_v11 }
 0x12b   : > { %v4852_v62 = vadd.f32 %v989_v45, %v764_v31  ;;  %3022 = vmatmul.mubr.msk.f32.gmra.mrb[110].mxu0 %vm2663_vm1, %v5407_v60  ;;  %v766_v27 = vpop.f32.mrb[5].mxu0  ;;  %v5431_v31 = vld [vmem:[#allocation24_spill] sm:$0xff] }
 0x12c   : > { %v4857_v22 = vpop.f32.mrb[20].mxu1  ;;  %3024 = vmatprep.mubr.f32.mxu0 %v5408_v20 }
 0x12d   : > { %v4860_v25 = vpop.f32.mrb[21].mxu1  ;;  %1777 = vmatmul.mubr.f32.gmra.mrb[126].mxu1 %v4404_v18 }
 0x12e   : > { %v769_v23 = vpop.f32.mrb[6].mxu0  ;;  %1781 = vmatprep.mubr.f32.mxu1 %v5425_v55 }
 0x12f   : > { %v4865_v48 = vadd.f32 %v4753_v24, %v769_v23  ;;  %3025 = vmatmul.mubr.msk.f32.gmra.mrb[112].mxu0 %vm2663_vm1, %v5409_v14  ;;  %v771_v60 = vpop.f32.mrb[7].mxu0  ;;  %v5432_v23 = vld [vmem:[#allocation45_spill] sm:$0xff] }
 0x130   : > { %v4870_v61 = vpop.f32.mrb[22].mxu1  ;;  %3027 = vmatprep.mubr.f32.mxu0 %v5410_v57  ;;  %v5433_v60 = vld [vmem:[#allocation26_spill] sm:$0xff] }
 0x131   : > { %v4873_v20 = vpop.f32.mrb[23].mxu1  ;;  %2615 = vmatmul.mubr.msk.f32.gmra.mrb[128].mxu1 %vm2662_vm3, %v4423_v63 }
 0x132   : > { %v774_v18 = vpop.f32.mrb[8].mxu0  ;;  %1786 = vmatprep.mubr.f32.mxu1 %v3859_v53 }
 0x133   : > { %v4880_v24 = vadd.f32 %v4766_v0, %v774_v18  ;;  %v776_v40 = vpop.f32.mrb[9].mxu0  ;;  %3028 = vmatmul.mubr.msk.f32.gmra.mrb[114].mxu0 %vm2663_vm1, %v5411_v15 }
 0x134   : > { %v4885_v14 = vpop.f32.mrb[24].mxu1  ;;  %3030 = vmatprep.mubr.f32.mxu0 %v5412_v29 }
 0x135   : > { %v4888_v57 = vpop.f32.mrb[25].mxu1  ;;  %1787 = vmatmul.mubr.f32.gmra.mrb[130].mxu1 %v4440_v43 }
 0x136   : > { %v779_v63 = vpop.f32.mrb[10].mxu0  ;;  %1791 = vmatprep.mubr.f32.mxu1 %v3922_v34 }
 0x137   : > { %v4893_v53 = vadd.f32 %v4763_v7, %v779_v63  ;;  %v781_v44 = vpop.f32.mrb[11].mxu0  ;;  %3031 = vmatmul.mubr.msk.f32.gmra.mrb[116].mxu0 %vm2663_vm1, %v5413_v35 }
 0x138   : > { %v4898_v15 = vpop.f32.mrb[26].mxu1  ;;  %3033 = vmatprep.mubr.f32.mxu0 %v5414_v33 }
 0x139   : > { %v4901_v29 = vpop.f32.mrb[27].mxu1  ;;  %2617 = vmatmul.mubr.msk.f32.gmra.mrb[132].mxu1 %vm2662_vm3, %v4459_v26 }
 0x13a   : > { %v784_v43 = vpop.f32.mrb[12].mxu0  ;;  %1796 = vmatprep.mubr.f32.mxu1 %v3924_v2 }
 0x13b   : > { %v4908_v34 = vadd.f32 %v4776_v8, %v784_v43  ;;  %v786_v45 = vpop.f32.mrb[13].mxu0  ;;  %3034 = vmatmul.mubr.msk.f32.gmra.mrb[118].mxu0 %vm2663_vm1, %v5415_v37  ;;  %v5434_v43 = vld [vmem:[#allocation46_spill] sm:$0xff] }
 0x13c   : > { %v4913_v35 = vpop.f32.mrb[28].mxu1  ;;  %3036 = vmatprep.mubr.f32.mxu0 %v5416_v50  ;;  %v5435_v45 = vld [vmem:[#allocation27_spill] sm:$0xff] }
 0x13d   : > { %v4916_v33 = vpop.f32.mrb[29].mxu1  ;;  %1797 = vmatmul.mubr.f32.gmra.mrb[134].mxu1 %v4476_v1 }
 0x13e   : > { %v789_v26 = vpop.f32.mrb[14].mxu0  ;;  %1801 = vmatprep.mubr.f32.mxu1 %v3962_v12 }
 0x13f   : > { %v4921_v2 = vadd.f32 %v4773_v39, %v789_v26  ;;  %v791_v7 = vpop.f32.mrb[15].mxu0  ;;  %3037 = vmatmul.mubr.msk.f32.gmra.mrb[120].mxu0 %vm2663_vm1, %v5417_v5  ;;  %v5426_v39 = vld [vmem:[#allocation40_spill] sm:$0xff] }
 0x140   : > { %v4926_v37 = vpop.f32.mrb[30].mxu1  ;;  %3039 = vmatprep.mubr.f32.mxu0 %v5418_v59 }
 0x141   : > { %v4929_v50 = vpop.f32.mrb[31].mxu1  ;;  %2619 = vmatmul.mubr.msk.f32.gmra.mrb[136].mxu1 %vm2662_vm3, %v4495_v3 }
 0x142   : > { %v794_v1 = vpop.f32.mrb[16].mxu0  ;;  %1806 = vmatprep.mubr.f32.mxu1 %v3980_v32 }
 0x143   : > { %v4936_v12 = vadd.f32 %v4788_v4, %v794_v1  ;;  %v796_v0 = vpop.f32.mrb[17].mxu0  ;;  %3040 = vmatmul.mubr.msk.f32.gmra.mrb[122].mxu0 %vm2663_vm1, %v5420_v13 }
 0x144   : > { %v1204_v5 = vpop.f32.mrb[32].mxu1  ;;  %3042 = vmatprep.mubr.f32.mxu0 %v5426_v39  ;;  %v5437_v39 = vld [vmem:[#allocation31_spill] sm:$0xff] }
 0x145   : > { %v4943_v59 = vadd.f32 %v1204_v5, %v4826_v51  ;;  %v1206_v8 = vpop.f32.mrb[33].mxu1  ;;  %1807 = vmatmul.mubr.f32.gmra.mrb[138].mxu1 %v4512_v38  ;;  %v5436_v5 = vld [vmem:[#allocation47_spill] sm:$0xff] }
 0x146   : > { %v799_v3 = vpop.f32.mrb[18].mxu0  ;;  %1811 = vmatprep.mubr.f32.mxu1 %v5427_v10 }
 0x147   : > { %v4948_v32 = vadd.f32 %v4785_v52, %v799_v3  ;;  %v801_v4 = vpop.f32.mrb[19].mxu0  ;;  %3043 = vmatmul.mubr.msk.f32.gmra.mrb[124].mxu0 %vm2663_vm1, %v5428_v17  ;;  %v5438_v17 = vld [vmem:[#allocation48_spill] sm:$0xff] }
 0x148   : > { %v1209_v13 = vpop.f32.mrb[34].mxu1  ;;  %3045 = vmatprep.mubr.f32.mxu0 %v5429_v49 }
 0x149   : > { %v4955_v51 = vadd.f32 %v1209_v13, %v4838_v6  ;;  %v1211_v28 = vpop.f32.mrb[35].mxu1  ;;  %2621 = vmatmul.mubr.msk.f32.gmra.mrb[140].mxu1 %vm2662_vm3, %v5430_v56  ;;  %v5439_v13 = vld [vmem:[#allocation32_spill] sm:$0xff] }
 0x14a   : > { %v804_v38 = vpop.f32.mrb[20].mxu0  ;;  %1816 = vmatprep.mubr.f32.mxu1 %v5431_v31 }
 0x14b   : > { %v4962_v52 = vadd.f32 %v4798_v41, %v804_v38  ;;  %v806_v11 = vpop.f32.mrb[21].mxu0  ;;  %3046 = vmatmul.mubr.f32.gmra.mrb[126].mxu0 %v5429_v49 }
 0x14c   : > { %v1214_v21 = vpop.f32.mrb[36].mxu1  ;;  %v5440_v11 = vld [vmem:[#allocation49_spill] sm:$0xff] }
 0x14d   : > { %v4966_v27 = vadd.f32 %v1214_v21, %v4852_v62  ;;  %v1216_v6 = vpop.f32.mrb[37].mxu1  ;;  %1817 = vmatmul.mubr.f32.gmra.mrb[142].mxu1 %v5432_v23  ;;  %v5441_v21 = vld [vmem:[#allocation35_spill] sm:$0xff] }
 0x14e   : > { %v809_v55 = vpop.f32.mrb[22].mxu0  ;;  %1821 = vmatprep.mubr.f32.mxu1 %v5433_v60 }
 0x14f   : > { %v4971_v18 = vadd.f32 %v4795_v30, %v809_v55  ;;  %v811_v40 = vpop.f32.mrb[23].mxu0 }
 0x150   : > { %v1219_v63 = vpop.f32.mrb[38].mxu1 }
 0x151   : > { %v4974_v41 = vadd.f32 %v1219_v63, %v4865_v48  ;;  %v1221_v44 = vpop.f32.mrb[39].mxu1  ;;  %2623 = vmatmul.mubr.msk.f32.gmra.mrb[144].mxu1 %vm2662_vm3, %v5434_v43  ;;  %v5443_v63 = vld [vmem:[#allocation36_spill] sm:$0xff] }
 0x152   : > { %v814_v62 = vpop.f32.mrb[24].mxu0  ;;  %1826 = vmatprep.mubr.f32.mxu1 %v5435_v45 }
 0x153   : > { %v4981_v26 = vadd.f32 %v4810_v9, %v814_v62  ;;  %v816_v7 = vpop.f32.mrb[25].mxu0 }
 0x154   : > { %v1224_v1 = vpop.f32.mrb[40].mxu1  ;;  %v5444_v7 = vld [vmem:[#allocation51_spill] sm:$0xff] }
 0x155   : > { %v4984_v30 = vadd.f32 %v1224_v1, %v4880_v24  ;;  %v1226_v0 = vpop.f32.mrb[41].mxu1  ;;  %1827 = vmatmul.mubr.f32.gmra.mrb[146].mxu1 %v5436_v5 }
 0x156   : > { %v819_v48 = vpop.f32.mrb[26].mxu0  ;;  %1831 = vmatprep.mubr.f32.mxu1 %v5437_v39 }
 0x157   : > { %v1045_v8 = vadd.f32 %v4807_v47, %v819_v48  ;;  %v821_v3 = vpop.f32.mrb[27].mxu0 }
 0x158   : > { %v1229_v10 = vpop.f32.mrb[42].mxu1 }
 0x159   : > { %v4990_v4 = vadd.f32 %v1229_v10, %v4893_v53  ;;  %v1231_v9 = vpop.f32.mrb[43].mxu1  ;;  %2625 = vmatmul.mubr.msk.f32.gmra.mrb[148].mxu1 %vm2662_vm3, %v5438_v17 }
 0x15a   : > { %v824_v24 = vpop.f32.mrb[28].mxu0  ;;  %1836 = vmatprep.mubr.f32.mxu1 %v5439_v13 }
 0x15b   : > { %v1050_v28 = vadd.f32 %v4820_v16, %v824_v24  ;;  %v826_v56 = vpop.f32.mrb[29].mxu0  ;;  %v5442_v16 = vld [vmem:[#allocation50_spill] sm:$0xff] }
 0x15c   : > { %v1234_v38 = vpop.f32.mrb[44].mxu1 }
 0x15d   : > { %v4998_v31 = vadd.f32 %v1234_v38, %v4908_v34  ;;  %v1236_v47 = vpop.f32.mrb[45].mxu1  ;;  %1837 = vmatmul.mubr.f32.gmra.mrb[150].mxu1 %v5440_v11 }
 0x15e   : > { %v829_v53 = vpop.f32.mrb[30].mxu0  ;;  %1841 = vmatprep.mubr.f32.mxu1 %v5441_v21 }
 0x15f   : > { %v1055_v6 = vadd.f32 %v4817_v58, %v829_v53  ;;  %v831_v23 = vpop.f32.mrb[31].mxu0 }
 0x160   : > { %v1239_v55 = vpop.f32.mrb[46].mxu1 }
 0x161   : > { %v5004_v60 = vadd.f32 %v1239_v55, %v4921_v2  ;;  %v1241_v40 = vpop.f32.mrb[47].mxu1  ;;  %2627 = vmatmul.mubr.msk.f32.gmra.mrb[152].mxu1 %vm2662_vm3, %v5442_v16 }
 0x162   : > { %v834_v34 = vpop.f32.mrb[32].mxu0  ;;  %1846 = vmatprep.mubr.f32.mxu1 %v5443_v63 }
 0x163   : > { %v1060_v44 = vadd.f32 %v4834_v42, %v834_v34  ;;  %v836_v43 = vpop.f32.mrb[33].mxu0 }
 0x164   : > { %v1244_v62 = vpop.f32.mrb[48].mxu1 }
 0x165   : > { %v5012_v45 = vadd.f32 %v1244_v62, %v4936_v12  ;;  %v1246_v58 = vpop.f32.mrb[49].mxu1  ;;  %1847 = vmatmul.mubr.f32.gmra.mrb[154].mxu1 %v5444_v7 }
 0x166   : > { %v839_v2 = vpop.f32.mrb[34].mxu0  ;;  %1851 = vmatprep.mubr.f32.mxu1 %v5429_v49 }
 0x167   : > { %v1065_v1 = vadd.f32 %v4831_v54, %v839_v2  ;;  %v841_v0 = vpop.f32.mrb[35].mxu0 }
 0x168   : > { %v1249_v5 = vpop.f32.mrb[50].mxu1 }
 0x169   : > { %v5018_v48 = vadd.f32 %v1249_v5, %v4948_v32  ;;  %v1251_v39 = vpop.f32.mrb[51].mxu1  ;;  %1852 = vmatmul.mubr.f32.gmra.mrb[156].mxu1 %v5429_v49 }
 0x16a   : > { %v844_v42 = vpop.f32.mrb[36].mxu0  ;;  %1856 = vmatprep.mubr.f32.mxu1 %v5429_v49 }
 0x16b   : > { %v1070_v12 = vadd.f32 %v4846_v19, %v844_v42  ;;  %v846_v3 = vpop.f32.mrb[37].mxu0 }
 0x16c   : > { %v1254_v10 = vpop.f32.mrb[52].mxu1 }
 0x16d   : > { %v5024_v9 = vadd.f32 %v1254_v10, %v4962_v52  ;;  %v1256_v17 = vpop.f32.mrb[53].mxu1  ;;  %1857 = vmatmul.mubr.f32.gmra.mrb[158].mxu1 %v5429_v49 }
 0x16e   : > { %v849_v54 = vpop.f32.mrb[38].mxu0 }
 0x16f   : > { %v1075_v32 = vadd.f32 %v4843_v46, %v849_v54  ;;  %v851_v24 = vpop.f32.mrb[39].mxu0 }
 0x170   : > { %v1259_v13 = vpop.f32.mrb[54].mxu1 }
 0x171   : > { %v5029_v56 = vadd.f32 %v1259_v13, %v4971_v18  ;;  %v1261_v38 = vpop.f32.mrb[55].mxu1 }
 0x172   : > { %v854_v47 = vpop.f32.mrb[40].mxu0 }
 0x173   : > { %v1080_v19 = vadd.f32 %v4860_v25, %v854_v47  ;;  %v856_v11 = vpop.f32.mrb[41].mxu0 }
 0x174   : > { %v1264_v53 = vpop.f32.mrb[56].mxu1 }
 0x175   : > { %v5033_v52 = vadd.f32 %v1264_v53, %v4981_v26  ;;  %v1266_v21 = vpop.f32.mrb[57].mxu1 }
 0x176   : > { %v859_v23 = vpop.f32.mrb[42].mxu0 }
 0x177   : > { %v1085_v49 = vadd.f32 %v4857_v22, %v859_v23  ;;  %v861_v55 = vpop.f32.mrb[43].mxu0 }
 0x178   : > { %v1269_v46 = vpop.f32.mrb[58].mxu1 }
 0x179   : > { %v5036_v40 = vadd.f32 %v1269_v46, %v1045_v8  ;;  %v1271_v16 = vpop.f32.mrb[59].mxu1 }
 0x17a   : > { %v864_v18 = vpop.f32.mrb[44].mxu0 }
 0x17b   : > { %v1090_v34 = vadd.f32 %v4873_v20, %v864_v18  ;;  %v866_v63 = vpop.f32.mrb[45].mxu0 }
 0x17c   : > { %v1274_v43 = vpop.f32.mrb[60].mxu1 }
 0x17d   : > { %v5039_v25 = vadd.f32 %v1274_v43, %v1050_v28  ;;  %v1276_v62 = vpop.f32.mrb[61].mxu1 }
 0x17e   : > { %v869_v58 = vpop.f32.mrb[46].mxu0 }
 0x17f   : > { %v1095_v26 = vadd.f32 %v4870_v61, %v869_v58  ;;  %v871_v7 = vpop.f32.mrb[47].mxu0 }
 0x180   : > { %v1279_v2 = vpop.f32.mrb[62].mxu1 }
 0x181   : > { %v5042_v0 = vadd.f32 %v1279_v2, %v1055_v6  ;;  %v1281_v22 = vpop.f32.mrb[63].mxu1 }
 0x182   : > { %v874_v5 = vpop.f32.mrb[48].mxu0 }
 0x183   : > { %v1100_v8 = vadd.f32 %v4888_v57, %v874_v5  ;;  %v876_v39 = vpop.f32.mrb[49].mxu0 }
 0x184   : > { %v1284_v42 = vpop.f32.mrb[64].mxu1 }
 0x185   : > { %v5045_v3 = vadd.f32 %v1284_v42, %v1060_v44  ;;  %v1286_v20 = vpop.f32.mrb[65].mxu1 }
 0x186   : > { %v879_v10 = vpop.f32.mrb[50].mxu0 }
 0x187   : > { %v1105_v28 = vadd.f32 %v4885_v14, %v879_v10  ;;  %v881_v17 = vpop.f32.mrb[51].mxu0 }
 0x188   : > { %v1289_v54 = vpop.f32.mrb[66].mxu1 }
 0x189   : > { %v5048_v24 = vadd.f32 %v1289_v54, %v1065_v1  ;;  %v1291_v61 = vpop.f32.mrb[67].mxu1 }
 0x18a   : > { %v884_v13 = vpop.f32.mrb[52].mxu0 }
 0x18b   : > { %v1110_v6 = vadd.f32 %v4901_v29, %v884_v13  ;;  %v886_v38 = vpop.f32.mrb[53].mxu0 }
 0x18c   : > { %v1294_v47 = vpop.f32.mrb[68].mxu1 }
 0x18d   : > { %v5051_v11 = vadd.f32 %v1294_v47, %v1070_v12  ;;  %v1296_v57 = vpop.f32.mrb[69].mxu1 }
 0x18e   : > { %v889_v53 = vpop.f32.mrb[54].mxu0 }
 0x18f   : > { %v1115_v44 = vadd.f32 %v4898_v15, %v889_v53  ;;  %v891_v21 = vpop.f32.mrb[55].mxu0 }
 0x190   : > { %v1299_v23 = vpop.f32.mrb[70].mxu1 }
 0x191   : > { %v5054_v55 = vadd.f32 %v1299_v23, %v1075_v32  ;;  %v1301_v14 = vpop.f32.mrb[71].mxu1 }
 0x192   : > { %v894_v46 = vpop.f32.mrb[56].mxu0 }
 0x193   : > { %v1120_v1 = vadd.f32 %v4916_v33, %v894_v46  ;;  %v896_v16 = vpop.f32.mrb[57].mxu0 }
 0x194   : > { %v1304_v18 = vpop.f32.mrb[72].mxu1 }
 0x195   : > { %v5057_v63 = vadd.f32 %v1304_v18, %v1080_v19  ;;  %v1306_v29 = vpop.f32.mrb[73].mxu1 }
 0x196   : > { %v899_v43 = vpop.f32.mrb[58].mxu0 }
 0x197   : > { %v1125_v12 = vadd.f32 %v4913_v35, %v899_v43  ;;  %v901_v62 = vpop.f32.mrb[59].mxu0 }
 0x198   : > { %v1309_v58 = vpop.f32.mrb[74].mxu1 }
 0x199   : > { %v5060_v7 = vadd.f32 %v1309_v58, %v1085_v49  ;;  %v1311_v15 = vpop.f32.mrb[75].mxu1 }
 0x19a   : > { %v904_v2 = vpop.f32.mrb[60].mxu0 }
 0x19b   : > { %v1130_v32 = vadd.f32 %v4929_v50, %v904_v2  ;;  %v906_v22 = vpop.f32.mrb[61].mxu0 }
 0x19c   : > { %v1314_v5 = vpop.f32.mrb[76].mxu1 }
 0x19d   : > { %v5063_v39 = vadd.f32 %v1314_v5, %v1090_v34  ;;  %v1316_v33 = vpop.f32.mrb[77].mxu1 }
 0x19e   : > { %v909_v42 = vpop.f32.mrb[62].mxu0 }
 0x19f   : > { %v1135_v19 = vadd.f32 %v4926_v37, %v909_v42  ;;  %v911_v20 = vpop.f32.mrb[63].mxu0 }
 0x1a0   : > { %v1319_v10 = vpop.f32.mrb[78].mxu1 }
 0x1a1   : > { %v5066_v17 = vadd.f32 %v1319_v10, %v1095_v26  ;;  %v1321_v35 = vpop.f32.mrb[79].mxu1 }
 0x1a2   : > { %v2922_v54 = vpop.f32.mrb[64].mxu0 }
 0x1a3   : > { %v5069_v49 = vadd.f32 %v2922_v54, %v4955_v51  ;;  %v1429_v61 = vpop.f32.mrb[65].mxu0 }
 0x1a4   : > { %v1324_v13 = vpop.f32.mrb[80].mxu1  ;;  %v5072_v50 = vadd.f32 %v1429_v61, %v4943_v59 }
 0x1a5   : > { %v5074_v34 = vadd.f32 %v1324_v13, %v1100_v8  ;;  %v1326_v38 = vpop.f32.mrb[81].mxu1 }
 0x1a6   : > { %v2925_v47 = vpop.f32.mrb[66].mxu0 }
 0x1a7   : > { %v5077_v37 = vadd.f32 %v2925_v47, %v4974_v41  ;;  %v1439_v57 = vpop.f32.mrb[67].mxu0 }
 0x1a8   : > { %v1329_v26 = vpop.f32.mrb[82].mxu1  ;;  %v5080_v53 = vadd.f32 %v1439_v57, %v4966_v27 }
 0x1a9   : > { %v5082_v21 = vadd.f32 %v1329_v26, %v1105_v28  ;;  %v1331_v51 = vpop.f32.mrb[83].mxu1 }
 0x1aa   : > { %v2928_v23 = vpop.f32.mrb[68].mxu0 }
 0x1ab   : > { %v5085_v14 = vadd.f32 %v2928_v23, %v4990_v4  ;;  %v1449_v59 = vpop.f32.mrb[69].mxu0 }
 0x1ac   : > { %v1334_v8 = vpop.f32.mrb[84].mxu1  ;;  %v5088_v46 = vadd.f32 %v1449_v59, %v4984_v30 }
 0x1ad   : > { %v5090_v16 = vadd.f32 %v1334_v8, %v1110_v6  ;;  %v1336_v41 = vpop.f32.mrb[85].mxu1 }
 0x1ae   : > { %v2931_v18 = vpop.f32.mrb[70].mxu0 }
 0x1af   : > { %v5093_v29 = vadd.f32 %v2931_v18, %v5004_v60  ;;  %v1459_v27 = vpop.f32.mrb[71].mxu0 }
 0x1b0   : > { %v1339_v28 = vpop.f32.mrb[86].mxu1  ;;  %v5096_v43 = vadd.f32 %v1459_v27, %v4998_v31 }
 0x1b1   : > { %v1340_v62 = vadd.f32 %v1339_v28, %v1115_v44  ;;  %v1341_v4 = vpop.f32.mrb[87].mxu1 }
 0x1b2   : > { %v2934_v58 = vpop.f32.mrb[72].mxu0 }
 0x1b3   : > { %v5099_v15 = vadd.f32 %v2934_v58, %v5018_v48  ;;  %v1469_v30 = vpop.f32.mrb[73].mxu0 }
 0x1b4   : > { %v1344_v2 = vpop.f32.mrb[88].mxu1  ;;  %v5102_v6 = vadd.f32 %v1469_v30, %v5012_v45 }
 0x1b5   : > { %v1345_v22 = vadd.f32 %v1344_v2, %v1120_v1  ;;  %v1346_v5 = vpop.f32.mrb[89].mxu1 }
 0x1b6   : > { %v2937_v60 = vpop.f32.mrb[74].mxu0 }
 0x1b7   : > { %v5105_v33 = vadd.f32 %v2937_v60, %v5029_v56  ;;  %v1479_v42 = vpop.f32.mrb[75].mxu0 }
 0x1b8   : > { %v1349_v31 = vpop.f32.mrb[90].mxu1  ;;  %v5108_v44 = vadd.f32 %v1479_v42, %v5024_v9 }
 0x1b9   : > { %v1350_v20 = vadd.f32 %v1349_v31, %v1125_v12  ;;  %v1351_v10 = vpop.f32.mrb[91].mxu1 }
 0x1ba   : > { %v2940_v48 = vpop.f32.mrb[76].mxu0 }
 0x1bb   : > { %v5111_v35 = vadd.f32 %v2940_v48, %v5036_v40  ;;  %v1489_v54 = vpop.f32.mrb[77].mxu0 }
 0x1bc   : > { %v1354_v45 = vpop.f32.mrb[92].mxu1  ;;  %v5114_v1 = vadd.f32 %v1489_v54, %v5033_v52 }
 0x1bd   : > { %v1355_v61 = vadd.f32 %v1354_v45, %v1130_v32  ;;  %v1356_v13 = vpop.f32.mrb[93].mxu1 }
 0x1be   : > { %v2943_v56 = vpop.f32.mrb[78].mxu0 }
 0x1bf   : > { %v5117_v38 = vadd.f32 %v2943_v56, %v5042_v0  ;;  %v1499_v47 = vpop.f32.mrb[79].mxu0 }
 0x1c0   : > { %v1359_v9 = vpop.f32.mrb[94].mxu1  ;;  %v5120_v12 = vadd.f32 %v1499_v47, %v5039_v25 }
 0x1c1   : > { %v1360_v57 = vadd.f32 %v1359_v9, %v1135_v19  ;;  %v1361_v26 = vpop.f32.mrb[95].mxu1 }
 0x1c2   : > { %v2946_v40 = vpop.f32.mrb[80].mxu0 }
 0x1c3   : > { %v5123_v51 = vadd.f32 %v2946_v40, %v5048_v24  ;;  %v1509_v23 = vpop.f32.mrb[81].mxu0 }
 0x1c4   : > { %v5126_v52 = vadd.f32 %v1509_v23, %v5045_v3  ;;  %v1703_v32 = vpop.f32.mrb[96].mxu1 }
 0x1c5   : > { %v1705_v59 = vpop.f32.mrb[97].mxu1 }
 0x1c6   : > { %v2949_v8 = vpop.f32.mrb[82].mxu0 }
 0x1c7   : > { %v5129_v0 = vadd.f32 %v2949_v8, %v5054_v55  ;;  %v1519_v41 = vpop.f32.mrb[83].mxu0 }
 0x1c8   : > { %v5132_v25 = vadd.f32 %v1519_v41, %v5051_v11  ;;  %v1708_v19 = vpop.f32.mrb[98].mxu1 }
 0x1c9   : > { %v1710_v18 = vpop.f32.mrb[99].mxu1 }
 0x1ca   : > { %v2952_v27 = vpop.f32.mrb[84].mxu0 }
 0x1cb   : > { %v5135_v24 = vadd.f32 %v2952_v27, %v5060_v7  ;;  %v1529_v28 = vpop.f32.mrb[85].mxu0 }
 0x1cc   : > { %v5138_v3 = vadd.f32 %v1529_v28, %v5057_v63  ;;  %v1713_v4 = vpop.f32.mrb[100].mxu1 }
 0x1cd   : > { %v1715_v58 = vpop.f32.mrb[101].mxu1 }
 0x1ce   : > { %v2955_v30 = vpop.f32.mrb[86].mxu0 }
 0x1cf   : > { %v5141_v55 = vadd.f32 %v2955_v30, %v5066_v17  ;;  %v1539_v2 = vpop.f32.mrb[87].mxu0 }
 0x1d0   : > { %v5144_v11 = vadd.f32 %v1539_v2, %v5063_v39  ;;  %v1718_v5 = vpop.f32.mrb[102].mxu1 }
 0x1d1   : > { %v1720_v60 = vpop.f32.mrb[103].mxu1 }
 0x1d2   : > { %v2958_v42 = vpop.f32.mrb[88].mxu0 }
 0x1d3   : > { %v5147_v7 = vadd.f32 %v2958_v42, %v5082_v21  ;;  %v1549_v31 = vpop.f32.mrb[89].mxu0 }
 0x1d4   : > { %v5150_v63 = vadd.f32 %v1549_v31, %v5074_v34  ;;  %v1723_v10 = vpop.f32.mrb[104].mxu1 }
 0x1d5   : > { %v1725_v48 = vpop.f32.mrb[105].mxu1 }
 0x1d6   : > { %v2961_v54 = vpop.f32.mrb[90].mxu0 }
 0x1d7   : > { %v5152_v45 = vadd.f32 %v2961_v54, %v1340_v62  ;;  %v1559_v17 = vpop.f32.mrb[91].mxu0 }
 0x1d8   : > { %v5155_v13 = vadd.f32 %v1559_v17, %v5090_v16  ;;  %v1728_v39 = vpop.f32.mrb[106].mxu1 }
 0x1d9   : > { %v1730_v56 = vpop.f32.mrb[107].mxu1 }
 0x1da   : > { %v2964_v47 = vpop.f32.mrb[92].mxu0 }
 0x1db   : > { %v5157_v9 = vadd.f32 %v2964_v47, %v1350_v20  ;;  %v1569_v21 = vpop.f32.mrb[93].mxu0 }
 0x1dc   : > { %v5159_v26 = vadd.f32 %v1569_v21, %v1345_v22  ;;  %v1733_v34 = vpop.f32.mrb[108].mxu1 }
 0x1dd   : > { %v1735_v40 = vpop.f32.mrb[109].mxu1 }
 0x1de   : > { %v2967_v23 = vpop.f32.mrb[94].mxu0 }
 0x1df   : > { %v5161_v59 = vadd.f32 %v2967_v23, %v1360_v57  ;;  %v1579_v62 = vpop.f32.mrb[95].mxu0 }
 0x1e0   : > { %v5163_v8 = vadd.f32 %v1579_v62, %v1355_v61  ;;  %v1738_v41 = vpop.f32.mrb[110].mxu1 }
 0x1e1   : > { %v1740_v16 = vpop.f32.mrb[111].mxu1 }
 0x1e2   : > { %v3002_v18 = vpop.f32.mrb[96].mxu0 }
 0x1e3   : > { %v1934_v27 = vadd.f32 %v3002_v18, %v1708_v19  ;;  %v1928_v28 = vpop.f32.mrb[97].mxu0 }
 0x1e4   : > { %v1743_v22 = vpop.f32.mrb[112].mxu1  ;;  %v1929_v20 = vadd.f32 %v1928_v28, %v1703_v32 }
 0x1e5   : > { %v2088_v57 = vadd.f32 %v1934_v27, %v5069_v49  ;;  %v1745_v58 = vpop.f32.mrb[113].mxu1 }
 0x1e6   : > { %v2087_v61 = vadd.f32 %v1929_v20, %v5072_v50  ;;  %v3005_v30 = vpop.f32.mrb[98].mxu0 }
 0x1e7   : > { %2120 = vst [vmem:[%s5170_s10 + $0x8] sm:$0xff] %v2088_v57  ;;  %v2189_v19 = vmul.f32 %v2088_v57, %v2088_v57  ;;  %v1944_v2 = vadd.f32 %v3005_v30, %v1718_v5  ;;  %v1938_v60 = vpop.f32.mrb[99].mxu0 }
 0x1e8   : > { %2119 = vst [vmem:[%s5170_s10] sm:$0xff] %v2087_v61  ;;  %v2151_v42 = vadd.f32 %v2088_v57, %v2087_v61  ;;  %v2188_v31 = vmul.f32 %v2087_v61, %v2087_v61  ;;  %v1748_v48 = vpop.f32.mrb[114].mxu1  ;;  %v1939_v54 = vadd.f32 %v1938_v60, %v1713_v4 }
 0x1e9   : > { %v2090_v17 = vadd.f32 %v1944_v2, %v5077_v37  ;;  %v1750_v32 = vpop.f32.mrb[115].mxu1 }
 0x1ea   : > { %v2220_v56 = vadd.f32 %v2189_v19, %v2188_v31  ;;  %v2089_v49 = vadd.f32 %v1939_v54, %v5080_v53  ;;  %v3008_v47 = vpop.f32.mrb[100].mxu0 }
 0x1eb   : > { %2122 = vst [vmem:[%s5170_s10 + $0x18] sm:$0xff] %v2090_v17  ;;  %v1954_v50 = vadd.f32 %v3008_v47, %v1728_v39  ;;  %v1948_v21 = vpop.f32.mrb[101].mxu0  ;;  %v2191_v18 = vmul.f32 %v2090_v17, %v2090_v17 }
 0x1ec   : > { %2121 = vst [vmem:[%s5170_s10 + $0x10] sm:$0xff] %v2089_v49  ;;  %v2152_v5 = vadd.f32 %v2151_v42, %v2089_v49  ;;  %v2190_v40 = vmul.f32 %v2089_v49, %v2089_v49  ;;  %v1753_v23 = vpop.f32.mrb[116].mxu1  ;;  %v1949_v62 = vadd.f32 %v1948_v21, %v1723_v10 }
 0x1ed   : > { %v2092_v16 = vadd.f32 %v1954_v50, %v5085_v14  ;;  %v1755_v4 = vpop.f32.mrb[117].mxu1 }
 0x1ee   : > { %v2221_v37 = vadd.f32 %v2220_v56, %v2190_v40  ;;  %v2091_v27 = vadd.f32 %v1949_v62, %v5088_v46  ;;  %v2153_v28 = vadd.f32 %v2152_v5, %v2090_v17  ;;  %v3011_v53 = vpop.f32.mrb[102].mxu0 }
 0x1ef   : > { %2124 = vst [vmem:[%s5170_s10 + $0x28] sm:$0xff] %v2092_v16  ;;  %v1964_v20 = vadd.f32 %v3011_v53, %v1738_v41  ;;  %v1958_v39 = vpop.f32.mrb[103].mxu0  ;;  %v2193_v2 = vmul.f32 %v2092_v16, %v2092_v16 }
 0x1f0   : > { %2123 = vst [vmem:[%s5170_s10 + $0x20] sm:$0xff] %v2091_v27  ;;  %v2154_v57 = vadd.f32 %v2153_v28, %v2091_v27  ;;  %v2192_v58 = vmul.f32 %v2091_v27, %v2091_v27  ;;  %v2222_v61 = vadd.f32 %v2221_v37, %v2191_v18  ;;  %v1758_v30 = vpop.f32.mrb[118].mxu1  ;;  %v1959_v10 = vadd.f32 %v1958_v39, %v1733_v34 }
 0x1f1   : > { %v2094_v14 = vadd.f32 %v1964_v20, %v5093_v29  ;;  %v1760_v19 = vpop.f32.mrb[119].mxu1 }
 0x1f2   : > { %v2223_v60 = vadd.f32 %v2222_v61, %v2192_v58  ;;  %v2093_v46 = vadd.f32 %v1959_v10, %v5096_v43  ;;  %v2155_v42 = vadd.f32 %v2154_v57, %v2092_v16  ;;  %v3014_v31 = vpop.f32.mrb[104].mxu0 }
 0x1f3   : > { %2126 = vst [vmem:[%s5170_s10 + $0x38] sm:$0xff] %v2094_v14  ;;  %v1974_v41 = vadd.f32 %v3014_v31, %v1748_v48  ;;  %v1968_v54 = vpop.f32.mrb[105].mxu0  ;;  %v2195_v50 = vmul.f32 %v2094_v14, %v2094_v14 }
 0x1f4   : > { %2125 = vst [vmem:[%s5170_s10 + $0x30] sm:$0xff] %v2093_v46  ;;  %v2156_v17 = vadd.f32 %v2155_v42, %v2093_v46  ;;  %v2194_v32 = vmul.f32 %v2093_v46, %v2093_v46  ;;  %v2224_v56 = vadd.f32 %v2223_v60, %v2193_v2  ;;  %v1763_v49 = vpop.f32.mrb[120].mxu1  ;;  %v1969_v34 = vadd.f32 %v1968_v54, %v1743_v22 }
 0x1f5   : > { %v2096_v29 = vadd.f32 %v1974_v41, %v5099_v15  ;;  %v1765_v47 = vpop.f32.mrb[121].mxu1 }
 0x1f6   : > { %v2225_v21 = vadd.f32 %v2224_v56, %v2194_v32  ;;  %v2095_v43 = vadd.f32 %v1969_v34, %v5102_v6  ;;  %v2157_v5 = vadd.f32 %v2156_v17, %v2094_v14  ;;  %v3017_v40 = vpop.f32.mrb[106].mxu0 }
 0x1f7   : > { %2128 = vst [vmem:[%s5170_s10 + $0x48] sm:$0xff] %v2096_v29  ;;  %v1984_v48 = vadd.f32 %v3017_v40, %v1758_v30  ;;  %v1978_v62 = vpop.f32.mrb[107].mxu0  ;;  %v2197_v28 = vmul.f32 %v2096_v29, %v2096_v29 }
 0x1f8   : > { %2127 = vst [vmem:[%s5170_s10 + $0x40] sm:$0xff] %v2095_v43  ;;  %v2158_v16 = vadd.f32 %v2157_v5, %v2095_v43  ;;  %v2196_v4 = vmul.f32 %v2095_v43, %v2095_v43  ;;  %v2226_v18 = vadd.f32 %v2225_v21, %v2195_v50  ;;  %v1768_v37 = vpop.f32.mrb[122].mxu1  ;;  %v1979_v22 = vadd.f32 %v1978_v62, %v1753_v23 }
 0x1f9   : > { %v2098_v15 = vadd.f32 %v1984_v48, %v5105_v33  ;;  %v1770_v27 = vpop.f32.mrb[123].mxu1 }
 0x1fa   : > { %v2227_v53 = vadd.f32 %v2226_v18, %v2196_v4  ;;  %v2097_v6 = vadd.f32 %v1979_v22, %v5108_v44  ;;  %v2159_v20 = vadd.f32 %v2158_v16, %v2096_v29  ;;  %v3020_v39 = vpop.f32.mrb[108].mxu0 }
 0x1fb   : > { %2130 = vst [vmem:[%s5170_s10 + $0x58] sm:$0xff] %v2098_v15  ;;  %v1994_v57 = vadd.f32 %v3020_v39, %v1768_v37  ;;  %v1988_v58 = vpop.f32.mrb[109].mxu0  ;;  %v2199_v2 = vmul.f32 %v2098_v15, %v2098_v15 }
 0x1fc   : > { %2129 = vst [vmem:[%s5170_s10 + $0x50] sm:$0xff] %v2097_v6  ;;  %v2160_v61 = vadd.f32 %v2159_v20, %v2097_v6  ;;  %v2198_v30 = vmul.f32 %v2097_v6, %v2097_v6  ;;  %v2228_v10 = vadd.f32 %v2227_v53, %v2197_v28  ;;  %v1773_v14 = vpop.f32.mrb[124].mxu1  ;;  %v1989_v23 = vadd.f32 %v1988_v58, %v1763_v49 }
 0x1fd   : > { %v2100_v33 = vadd.f32 %v1994_v57, %v5111_v35  ;;  %v1775_v19 = vpop.f32.mrb[125].mxu1 }
 0x1fe   : > { %v2229_v60 = vadd.f32 %v2228_v10, %v2198_v30  ;;  %v2099_v44 = vadd.f32 %v1989_v23, %v5114_v1  ;;  %v2161_v46 = vadd.f32 %v2160_v61, %v2098_v15  ;;  %v3023_v42 = vpop.f32.mrb[110].mxu0 }
 0x1ff   : > { %2132 = vst [vmem:[%s5170_s10 + $0x68] sm:$0xff] %v2100_v33  ;;  %v1998_v31 = vpop.f32.mrb[111].mxu0  ;;  %v2201_v35 = vmul.f32 %v2100_v33, %v2100_v33 }
 0x200   : > { %2131 = vst [vmem:[%s5170_s10 + $0x60] sm:$0xff] %v2099_v44  ;;  %v2162_v41 = vadd.f32 %v2161_v46, %v2099_v44  ;;  %v2200_v54 = vmul.f32 %v2099_v44, %v2099_v44  ;;  %v2230_v17 = vadd.f32 %v2229_v60, %v2199_v2  ;;  %v1778_v32 = vpop.f32.mrb[126].mxu1  ;;  %v1999_v56 = vadd.f32 %v1998_v31, %v1773_v14 }
 0x201   : > { %v2004_v49 = vadd.f32 %v3023_v42, %v1778_v32  ;;  %v1780_v34 = vpop.f32.mrb[127].mxu1 }
 0x202   : > { %v2231_v29 = vadd.f32 %v2230_v17, %v2200_v54  ;;  %v2101_v47 = vadd.f32 %v1999_v56, %v5120_v12  ;;  %v2163_v50 = vadd.f32 %v2162_v41, %v2100_v33  ;;  %v3026_v1 = vpop.f32.mrb[112].mxu0 }
 0x203   : > { %v2102_v21 = vadd.f32 %v2004_v49, %v5117_v38  ;;  %v2008_v43 = vpop.f32.mrb[113].mxu0 }
 0x204   : > { %2133 = vst [vmem:[%s5170_s10 + $0x70] sm:$0xff] %v2101_v47  ;;  %v2164_v5 = vadd.f32 %v2163_v50, %v2101_v47  ;;  %v2202_v40 = vmul.f32 %v2101_v47, %v2101_v47  ;;  %v2232_v48 = vadd.f32 %v2231_v29, %v2201_v35  ;;  %v1783_v62 = vpop.f32.mrb[128].mxu1 }
 0x205   : > { %2134 = vst [vmem:[%s5170_s10 + $0x78] sm:$0xff] %v2102_v21  ;;  %v2009_v16 = vadd.f32 %v2008_v43, %v1783_v62  ;;  %v1785_v4 = vpop.f32.mrb[129].mxu1  ;;  %v2203_v18 = vmul.f32 %v2102_v21, %v2102_v21 }
 0x206   : > { %v2233_v37 = vadd.f32 %v2232_v48, %v2202_v40  ;;  %v2165_v22 = vadd.f32 %v2164_v5, %v2102_v21  ;;  %v3029_v15 = vpop.f32.mrb[114].mxu0 }
 0x207   : > { %v2103_v12 = vadd.f32 %v2009_v16, %v5126_v52  ;;  %v2018_v27 = vpop.f32.mrb[115].mxu0 }
 0x208   : > { %v2234_v28 = vadd.f32 %v2233_v37, %v2203_v18  ;;  %v1788_v38 = vpop.f32.mrb[130].mxu1 }
 0x209   : > { %2135 = vst [vmem:[%s5170_s10 + $0x80] sm:$0xff] %v2103_v12  ;;  %v2166_v53 = vadd.f32 %v2165_v22, %v2103_v12  ;;  %v2204_v6 = vmul.f32 %v2103_v12, %v2103_v12  ;;  %v2014_v20 = vadd.f32 %v3026_v1, %v1788_v38  ;;  %v1790_v39 = vpop.f32.mrb[131].mxu1 }
 0x20a   : > { %v3032_v57 = vpop.f32.mrb[116].mxu0 }
 0x20b   : > { %v2235_v58 = vadd.f32 %v2234_v28, %v2204_v6  ;;  %v2104_v61 = vadd.f32 %v2014_v20, %v5123_v51  ;;  %v2028_v30 = vpop.f32.mrb[117].mxu0 }
 0x20c   : > { %v1793_v10 = vpop.f32.mrb[132].mxu1 }
 0x20d   : > { %2136 = vst [vmem:[%s5170_s10 + $0x88] sm:$0xff] %v2104_v61  ;;  %v2167_v14 = vadd.f32 %v2166_v53, %v2104_v61  ;;  %v2205_v23 = vmul.f32 %v2104_v61, %v2104_v61  ;;  %v2019_v33 = vadd.f32 %v2018_v27, %v1793_v10  ;;  %v1795_v52 = vpop.f32.mrb[133].mxu1 }
 0x20e   : > { %v3035_v19 = vpop.f32.mrb[118].mxu0 }
 0x20f   : > { %v2236_v2 = vadd.f32 %v2235_v58, %v2205_v23  ;;  %v2105_v60 = vadd.f32 %v2019_v33, %v5132_v25  ;;  %v2038_v44 = vpop.f32.mrb[119].mxu0 }
 0x210   : > { %v1798_v46 = vpop.f32.mrb[134].mxu1 }
 0x211   : > { %2137 = vst [vmem:[%s5170_s10 + $0x90] sm:$0xff] %v2105_v60  ;;  %v2168_v42 = vadd.f32 %v2167_v14, %v2105_v60  ;;  %v2206_v31 = vmul.f32 %v2105_v60, %v2105_v60  ;;  %v2024_v41 = vadd.f32 %v3029_v15, %v1798_v46  ;;  %v1800_v54 = vpop.f32.mrb[135].mxu1 }
 0x212   : > { %v3038_v51 = vpop.f32.mrb[120].mxu0 }
 0x213   : > { %v2237_v17 = vadd.f32 %v2236_v2, %v2206_v31  ;;  %v2106_v32 = vadd.f32 %v2024_v41, %v5129_v0  ;;  %v2048_v56 = vpop.f32.mrb[121].mxu0 }
 0x214   : > { %v1803_v49 = vpop.f32.mrb[136].mxu1 }
 0x215   : > { %2138 = vst [vmem:[%s5170_s10 + $0x98] sm:$0xff] %v2106_v32  ;;  %v2169_v34 = vadd.f32 %v2168_v42, %v2106_v32  ;;  %v2207_v35 = vmul.f32 %v2106_v32, %v2106_v32  ;;  %v2029_v29 = vadd.f32 %v2028_v30, %v1803_v49  ;;  %v1805_v47 = vpop.f32.mrb[137].mxu1 }
 0x216   : > { %v3041_v25 = vpop.f32.mrb[122].mxu0 }
 0x217   : > { %v2238_v50 = vadd.f32 %v2237_v17, %v2207_v35  ;;  %v2107_v1 = vadd.f32 %v2029_v29, %v5138_v3  ;;  %v2058_v21 = vpop.f32.mrb[123].mxu0 }
 0x218   : > { %v1808_v43 = vpop.f32.mrb[138].mxu1 }
 0x219   : > { %2139 = vst [vmem:[%s5170_s10 + $0xa0] sm:$0xff] %v2107_v1  ;;  %v2170_v5 = vadd.f32 %v2169_v34, %v2107_v1  ;;  %v2208_v40 = vmul.f32 %v2107_v1, %v2107_v1  ;;  %v2034_v48 = vadd.f32 %v3032_v57, %v1808_v43  ;;  %v1810_v62 = vpop.f32.mrb[139].mxu1 }
 0x21a   : > { %v5214_v0 = vpop.f32.mrb[124].mxu0 }
 0x21b   : > { %v2239_v16 = vadd.f32 %v2238_v50, %v2208_v40  ;;  %v2108_v4 = vadd.f32 %v2034_v48, %v5135_v24  ;;  %v2068_v18 = vpop.f32.mrb[125].mxu0 }
 0x21c   : > { %v1813_v37 = vpop.f32.mrb[140].mxu1 }
 0x21d   : > { %2140 = vst [vmem:[%s5170_s10 + $0xa8] sm:$0xff] %v2108_v4  ;;  %v2171_v22 = vadd.f32 %v2170_v5, %v2108_v4  ;;  %v2209_v15 = vmul.f32 %v2108_v4, %v2108_v4  ;;  %v2039_v3 = vadd.f32 %v2038_v44, %v1813_v37  ;;  %v1815_v12 = vpop.f32.mrb[141].mxu1 }
 0x21e   : > { %v5218_v27 = vpop.f32.mrb[126].mxu0 }
 0x21f   : > { %v2240_v28 = vadd.f32 %v2239_v16, %v2209_v15  ;;  %v2109_v38 = vadd.f32 %v2039_v3, %v5144_v11  ;;  %v2078_v53 = vpop.f32.mrb[127].mxu0 }
 0x220   : > { %v1818_v6 = vpop.f32.mrb[142].mxu1 }
 0x221   : > { %2141 = vst [vmem:[%s5170_s10 + $0xb0] sm:$0xff] %v2109_v38  ;;  %v2172_v20 = vadd.f32 %v2171_v22, %v2109_v38  ;;  %v2210_v39 = vmul.f32 %v2109_v38, %v2109_v38  ;;  %v2044_v24 = vadd.f32 %v3035_v19, %v1818_v6  ;;  %v1820_v57 = vpop.f32.mrb[143].mxu1 }
 0x223   : > { %v2241_v58 = vadd.f32 %v2240_v28, %v2210_v39  ;;  %v2110_v61 = vadd.f32 %v2044_v24, %v5141_v55 }
 0x224   : > { %v1823_v30 = vpop.f32.mrb[144].mxu1 }
 0x225   : > { %2142 = vst [vmem:[%s5170_s10 + $0xb8] sm:$0xff] %v2110_v61  ;;  %v2173_v10 = vadd.f32 %v2172_v20, %v2110_v61  ;;  %v2211_v14 = vmul.f32 %v2110_v61, %v2110_v61  ;;  %v2049_v23 = vadd.f32 %v2048_v56, %v1823_v30  ;;  %v1825_v33 = vpop.f32.mrb[145].mxu1 }
 0x227   : > { %v2242_v52 = vadd.f32 %v2241_v58, %v2211_v14  ;;  %v2111_v11 = vadd.f32 %v2049_v23, %v5150_v63  ;;  %v3309_v23 = vmov 1966171168  }
 0x228   : > { %v1828_v2 = vpop.f32.mrb[146].mxu1  ;;  %v2261_v33 = vunpack.c.l.s4 %v3309_v23 }
 0x229   : > { %2143 = vst [vmem:[%s5170_s10 + $0xc0] sm:$0xff] %v2111_v11  ;;  %v2174_v60 = vadd.f32 %v2173_v10, %v2111_v11  ;;  %v2212_v44 = vmul.f32 %v2111_v11, %v2111_v11  ;;  %v2054_v19 = vadd.f32 %v3038_v51, %v1828_v2  ;;  %v1830_v46 = vpop.f32.mrb[147].mxu1 }
 0x22b   : > { %v2243_v42 = vadd.f32 %v2242_v52, %v2212_v44  ;;  %v2112_v55 = vadd.f32 %v2054_v19, %v5147_v7 }
 0x22c   : > { %v1833_v31 = vpop.f32.mrb[148].mxu1 }
 0x22d   : > { %2144 = vst [vmem:[%s5170_s10 + $0xc8] sm:$0xff] %v2112_v55  ;;  %v2175_v41 = vadd.f32 %v2174_v60, %v2112_v55  ;;  %v2213_v54 = vmul.f32 %v2112_v55, %v2112_v55  ;;  %v2059_v17 = vadd.f32 %v2058_v21, %v1833_v31  ;;  %v1835_v32 = vpop.f32.mrb[149].mxu1  ;;  %v2262_v60 = vunpack.c.0.s8 %v2261_v33 }
 0x22e   : > { %v5445_v31 = vlaneseq }
 0x22f   : > { %v2244_v56 = vadd.f32 %v2243_v42, %v2213_v54  ;;  %v2113_v63 = vadd.f32 %v2059_v17, %v5155_v13  ;;  %v2265_v46 = vsub.s32 %v2262_v60, %v3437_v36 }
 0x230   : > { %v1838_v49 = vpop.f32.mrb[150].mxu1  ;;  %vm2277_vm4 = vcmp.lt.s32.totalorder %v5445_v31, 256 }
 0x231   : > { %2145 = vst [vmem:[%s5170_s10 + $0xd0] sm:$0xff] %v2113_v63  ;;  %v2176_v34 = vadd.f32 %v2175_v41, %v2113_v63  ;;  %v2214_v35 = vmul.f32 %v2113_v63, %v2113_v63  ;;  %v2064_v51 = vadd.f32 %v3041_v25, %v1838_v49  ;;  %v1840_v29 = vpop.f32.mrb[151].mxu1 }
 0x233   : > { %v2245_v47 = vadd.f32 %v2244_v56, %v2214_v35  ;;  %v2114_v7 = vadd.f32 %v2064_v51, %v5152_v45 }
 0x234   : > { %v1843_v50 = vpop.f32.mrb[152].mxu1 }
 0x235   : > { %2146 = vst [vmem:[%s5170_s10 + $0xd8] sm:$0xff] %v2114_v7  ;;  %v2177_v1 = vadd.f32 %v2176_v34, %v2114_v7  ;;  %v2215_v43 = vmul.f32 %v2114_v7, %v2114_v7  ;;  %v2069_v21 = vadd.f32 %v2068_v18, %v1843_v50  ;;  %v1845_v5 = vpop.f32.mrb[153].mxu1 }
 0x237   : > { %v2246_v40 = vadd.f32 %v2245_v47, %v2215_v43  ;;  %v2115_v13 = vadd.f32 %v2069_v21, %v5159_v26 }
 0x238   : > { %v1848_v48 = vpop.f32.mrb[154].mxu1 }
 0x239   : > { %2147 = vst [vmem:[%s5170_s10 + $0xe0] sm:$0xff] %v2115_v13  ;;  %v2178_v62 = vadd.f32 %v2177_v1, %v2115_v13  ;;  %v2216_v16 = vmul.f32 %v2115_v13, %v2115_v13  ;;  %v2074_v25 = vadd.f32 %v5214_v0, %v1848_v48  ;;  %v1850_v4 = vpop.f32.mrb[155].mxu1 }
 0x23b   : > { %v2247_v37 = vadd.f32 %v2246_v40, %v2216_v16  ;;  %v2116_v45 = vadd.f32 %v2074_v25, %v5157_v9 }
 0x23c   : > { %v1853_v22 = vpop.f32.mrb[156].mxu1 }
 0x23d   : > { %2148 = vst [vmem:[%s5170_s10 + $0xe8] sm:$0xff] %v2116_v45  ;;  %v2179_v15 = vadd.f32 %v2178_v62, %v2116_v45  ;;  %v2217_v18 = vmul.f32 %v2116_v45, %v2116_v45  ;;  %v2079_v3 = vadd.f32 %v2078_v53, %v1853_v22  ;;  %v1855_v12 = vpop.f32.mrb[157].mxu1 }
 0x23f   : > { %v2248_v28 = vadd.f32 %v2247_v37, %v2217_v18  ;;  %v2117_v26 = vadd.f32 %v2079_v3, %v5163_v8 }
 0x240   : > { %v1858_v38 = vpop.f32.mrb[158].mxu1 }
 0x241   : > { %2149 = vst [vmem:[%s5170_s10 + $0xf0] sm:$0xff] %v2117_v26  ;;  %v2180_v6 = vadd.f32 %v2179_v15, %v2117_v26  ;;  %v2218_v20 = vmul.f32 %v2117_v26, %v2117_v26  ;;  %v2084_v0 = vadd.f32 %v5218_v27, %v1858_v38  ;;  %v1860_v39 = vpop.f32.mrb[159].mxu1 }
 0x243   : > { %v2249_v24 = vadd.f32 %v2248_v28, %v2218_v20  ;;  %v2118_v9 = vadd.f32 %v2084_v0, %v5161_v59 }
 0x245   : > { %2150 = vst [vmem:[%s5170_s10 + $0xf8] sm:$0xff] %v2118_v9  ;;  %v2181_v57 = vadd.f32 %v2180_v6, %v2118_v9  ;;  %v2219_v58 = vmul.f32 %v2118_v9, %v2118_v9 }
 0x247   : > { %v2182_v61 = vrot.slane %v2181_v57, 4  ;;  %v2250_v30 = vadd.f32 %v2249_v24, %v2219_v58 }
 0x249   : > { %v2183_v53 = vadd.f32 %v2182_v61, %v2181_v57  ;;  %v2251_v10 = vrot.slane %v2250_v30, 4 }
 0x24b   : > { %v2184_v14 = vrot.slane %v2183_v53, 2  ;;  %v2252_v8 = vadd.f32 %v2251_v10, %v2250_v30 }
 0x24d   : > { %v2185_v52 = vadd.f32 %v2184_v14, %v2183_v53  ;;  %v2253_v11 = vrot.slane %v2252_v8, 2 }
 0x24f   : > { %v2186_v2 = vrot.slane %v2185_v52, 1  ;;  %v2254_v27 = vadd.f32 %v2253_v11, %v2252_v8 }
 0x251   : > { %v2255_v44 = vrot.slane %v2254_v27, 1  ;;  %v2187_v19 = vadd.f32 %v2186_v2, %v2185_v52 }
 0x253   : > { %v2256_v59 = vadd.f32 %v2255_v44, %v2254_v27 }
 0x255   : > { %v2259_v42 = vcombine.low %v2187_v19, %v2256_v59 }
 0x257   : > { %v2266_v55 = vrot.slane %v2259_v42, %v2265_v46 }
 0x259   : > { %v2273_v41 = vrot.slane %v2266_v55, %v2265_v46 }
 0x25b   : > { %2279 = vst.msk [vmem:[%s235_s13] sm:$0x3] %vm2277_vm4, %v2273_v41 }
 0x25c PF: > { %s16_s18 = sadd.s32 1, %s3305_s18  }
 0x25d   : > { %p13_p4 = scmp.ge.s32.totalorder %s16_s18, 4  }
 0x25f   :  { %15 = sbr.rel (!%p13_p4) target bundleno = 1 (0x1), region = 80 }

</bundles_post_ra>
